<compile_context>
chip_gen: v7x
topology: tpu7x:2x2x1
jax: 0.10.0
libtpu: 0.0.40
codegen_flags: <defaults>
</compile_context>

<pallas_src>
import functools

import jax
import jax.numpy as jnp
from jax.experimental import pallas as pl
from jax.experimental.pallas import tpu as pltpu

_EPS = 1e-5


def _round_up(x, m):
    return ((x + m - 1) // m) * m


# --------------------------------------------------------------------------
# In-kernel math helpers (f32 elementwise; bf16 only at MXU inputs)
# --------------------------------------------------------------------------
def _softmax_last(s):
    s = s - jnp.max(s, axis=-1, keepdims=True)          # stable (== torch)
    e = jnp.exp(s)
    return e * pl.reciprocal(jnp.sum(e, axis=-1, keepdims=True), approx=False)


def _layer_norm(x, g, b):
    mu = jnp.mean(x, axis=-1, keepdims=True)
    var = jnp.mean(jnp.square(x - mu), axis=-1, keepdims=True)   # biased (torch)
    return (x - mu) * jax.lax.rsqrt(var + _EPS) * g + b


# --------------------------------------------------------------------------
# The fused kernel: grid axis = encoder layer (front-end runs at step 0)
# --------------------------------------------------------------------------
def _fused_kernel(img_ref, gene_ref, wf_ref, bf_ref,
                  wla_ref, wlb_ref, bl_ref, out_ref, x_ref,
                  *, co_out, dim_ff):
    d_model = 2 * co_out
    layer = pl.program_id(0)

    def dotb(a, w16):
        # bf16 x bf16 MXU matmul, f32 accumulation
        return jnp.dot(a.astype(jnp.bfloat16), w16,
                       preferred_element_type=jnp.float32)

    def dot_qkT(q, k):
        # q @ k.T contracting last dims of both operands (no XLU transpose)
        return jax.lax.dot_general(q, k, (((1,), (1,)), ((), ())),
                                   preferred_element_type=jnp.float32)

    def wf(i, j):
        # columns [i*co_out, j*co_out) of the front-end weight slab (bf16)
        return wf_ref[:, i * co_out: j * co_out]

    # -----------------------------------------------------------------
    # Step 0: CoAttention + DualCrossAttention + DualCrossAttention2.
    # Result (N, 512) lands in the VMEM scratch x_ref and is carried
    # across the encoder-layer grid steps.
    # -----------------------------------------------------------------
    @pl.when(layer == 0)
    def _front_end():
        img = img_ref[...]          # (N, 256) f32
        gene = gene_ref[...]        # (N, 256) f32 (feature dim zero-padded)

        # ---- CoAttention: fused q|k|v projections (bias-free) ----
        qkv_i = dotb(img, wf(0, 3))     # (N, 3*co_out)
        qkv_g = dotb(gene, wf(3, 6))
        q_img = qkv_i[:, :co_out]
        k_img = qkv_i[:, co_out:2 * co_out]
        v_img = qkv_i[:, 2 * co_out:]
        q_gene = qkv_g[:, :co_out]
        k_gene = qkv_g[:, co_out:2 * co_out]
        v_gene = qkv_g[:, 2 * co_out:]
        co_img = jnp.dot(_softmax_last(dot_qkT(q_img, k_gene)), v_gene,
                         preferred_element_type=jnp.float32)
        co_gene = jnp.dot(_softmax_last(dot_qkT(q_gene, k_img)), v_img,
                          preferred_element_type=jnp.float32)

        # ---- ScaledDotProductAttention (xk == xv): fused k|v projection,
        #      1/scale pre-folded into q weight/bias (exact: scale = 16) ----
        def sdpa(xq, xkv, qi, kvi, qb, kvb):
            q = dotb(xq, wf(qi, qi + 1)) + bf_ref[qb:qb + 1, :co_out]
            kv = dotb(xkv, wf(kvi, kvi + 2)) + bf_ref[kvb:kvb + 1, :]
            k = kv[:, :co_out]
            v = kv[:, co_out:]
            p = _softmax_last(dot_qkT(q, k))
            return jnp.dot(p, v, preferred_element_type=jnp.float32)

        # DualCrossAttention
        att_ig = sdpa(co_img, co_gene, 6, 7, 0, 1)
        att_gi = sdpa(co_gene, co_img, 9, 10, 2, 3)

        # DualCrossAttention2
        refined_img = sdpa(att_ig, img, 12, 13, 4, 5)
        adj_gene = dotb(gene, wf(15, 16)) + bf_ref[6:7, :co_out]
        refined_gene = sdpa(att_gi, adj_gene, 16, 17, 7, 8)

        # torch.cat(..., dim=2) built directly in the carried scratch
        x_ref[:, :co_out] = refined_img
        x_ref[:, co_out:] = refined_gene

    # -----------------------------------------------------------------
    # One TransformerEncoder layer per grid step (post-norm, relu FFN).
    # seq_len == 1  =>  MHA == out_proj(v_proj(x)); dropout == identity.
    # -----------------------------------------------------------------
    x = x_ref[...]                                   # (N, d_model) f32

    wv = wla_ref[0, :, :d_model]                     # (d_model, d_model) bf16
    wo = wla_ref[0, :, d_model:2 * d_model]
    w1 = wla_ref[0, :, 2 * d_model:2 * d_model + dim_ff]
    w2 = wlb_ref[0]                                  # (dim_ff, d_model) bf16
    bv, bo = bl_ref[0, 0:1, :], bl_ref[0, 1:2, :]
    g1, be1 = bl_ref[0, 2:3, :], bl_ref[0, 3:4, :]
    b1 = bl_ref[0, 4:5, :dim_ff]
    b2 = bl_ref[0, 5:6, :]
    g2, be2 = bl_ref[0, 6:7, :], bl_ref[0, 7:8, :]

    v = dotb(x, wv) + bv
    attn = dotb(v, wo) + bo
    x = _layer_norm(x + attn, g1, be1)
    h = jnp.maximum(dotb(x, w1) + b1, 0.0)
    ff = dotb(h, w2) + b2
    x = _layer_norm(x + ff, g2, be2)

    x_ref[...] = x
    out_ref[...] = x


# --------------------------------------------------------------------------
# Forward wrapper: one pallas_call, grid over encoder layers
# --------------------------------------------------------------------------
def co_dual_cross_attention_forward(packed, img, gene, *, num_layers, co_out,
                                    gene_pad_dim, dim_ff):
    w_front, b_front, w_enc_a, w_enc_b, b_enc = packed
    n = img.shape[0]
    d_model = 2 * co_out
    pad = gene_pad_dim - gene.shape[1]
    gene_p = jnp.pad(gene, ((0, 0), (0, pad))) if pad else gene

    def resident(shape):
        nd = len(shape)
        return pl.BlockSpec(shape, lambda *_: (0,) * nd)     # VMEM-resident

    def per_layer(shape_rest):
        return pl.BlockSpec((1,) + tuple(shape_rest), lambda l: (l, 0, 0))

    kern = functools.partial(_fused_kernel, co_out=co_out, dim_ff=dim_ff)
    return pl.pallas_call(
        kern,
        grid=(num_layers,),
        in_specs=[
            resident((n, img.shape[1])),          # img
            resident((n, gene_pad_dim)),          # gene (padded)
            resident(w_front.shape),              # front-end weight slab (bf16)
            resident(b_front.shape),              # front-end bias slab (f32)
            per_layer(w_enc_a.shape[1:]),         # encoder slab A, streamed per layer
            per_layer(w_enc_b.shape[1:]),         # encoder slab B, streamed per layer
            per_layer(b_enc.shape[1:]),           # encoder bias/LN rows
        ],
        out_specs=pl.BlockSpec((n, d_model), lambda l: (0, 0)),
        out_shape=jax.ShapeDtypeStruct((n, d_model), jnp.float32),
        scratch_shapes=[pltpu.VMEM((n, d_model), jnp.float32)],
        compiler_params=pltpu.CompilerParams(
            dimension_semantics=("arbitrary",),
            vmem_limit_bytes=16 * 1024 * 1024,
        ),
    )(img, gene_p, w_front, b_front, w_enc_a, w_enc_b, b_enc)


# --------------------------------------------------------------------------
# Deterministic synthetic parameters (weights stored as [in, out])
# --------------------------------------------------------------------------
def _lin_init(key, din, dout, bias=True, scale=0.05):
    kw, kb = jax.random.split(key)
    w = scale * jax.random.normal(kw, (din, dout), jnp.float32)
    b = (scale * jax.random.normal(kb, (1, dout), jnp.float32)
         if bias else jnp.zeros((1, dout), jnp.float32))
    return w, b


def init_params(key, img_dim, gene_dim, co_out, cross_out, d_model,
                num_layers, dim_ff):
    keys = iter(jax.random.split(key, 128))
    p = {}

    # --- CoAttention (all Linear(..., bias=False)) ---
    for name, din in (("co_img_q", img_dim), ("co_img_k", img_dim), ("co_img_v", img_dim),
                      ("co_gene_q", gene_dim), ("co_gene_k", gene_dim), ("co_gene_v", gene_dim)):
        p[name], _ = _lin_init(next(keys), din, co_out, bias=False)

    # --- DualCrossAttention: 2x ScaledDotProductAttention(co_out -> cross_out) ---
    for blk in ("dc1", "dc2"):
        for proj in ("q", "k", "v"):
            p[f"{blk}_{proj}_w"], p[f"{blk}_{proj}_b"] = _lin_init(next(keys), co_out, cross_out)

    # --- DualCrossAttention2 (hard-coded 256 / 138 / 256) ---
    for blk in ("d2a1", "d2a2"):
        for proj in ("q", "k", "v"):
            p[f"{blk}_{proj}_w"], p[f"{blk}_{proj}_b"] = _lin_init(next(keys), 256, 256)
    p["adj_w"], p["adj_b"] = _lin_init(next(keys), 138, 256)

    # --- TransformerEncoder layers (d_model=512, relu, post-norm, eval dropout) ---
    layers = []
    for _ in range(num_layers):
        lyr = {}
        # q/k in-projections of nn.MultiheadAttention omitted: dead for seq_len==1.
        lyr["wv"], lyr["bv"] = _lin_init(next(keys), d_model, d_model)
        lyr["wo"], lyr["bo"] = _lin_init(next(keys), d_model, d_model)
        lyr["ln1_g"] = jnp.ones((1, d_model), jnp.float32)
        lyr["ln1_b"] = jnp.zeros((1, d_model), jnp.float32)
        lyr["w1"], lyr["b1"] = _lin_init(next(keys), d_model, dim_ff)
        lyr["w2"], lyr["b2"] = _lin_init(next(keys), dim_ff, d_model)
        lyr["ln2_g"] = jnp.ones((1, d_model), jnp.float32)
        lyr["ln2_b"] = jnp.zeros((1, d_model), jnp.float32)
        layers.append(lyr)
    p["enc_layers"] = layers
    return p


def prepare_params(p, *, gene_dim, gene_pad_dim, cross_out, d_model, dim_ff):
    """Pack params into a few large tile-aligned slabs (weights bf16):
       - w_front (256, 19*256) bf16 : every front-end projection weight,
         gene-K dims zero-padded, 1/scale folded into q weights.
       - b_front (16, 512) f32     : front-end biases (q rows + fused k|v rows).
       - w_enc_a (L, 512, 1024+ff) bf16 : per-layer [wv | wo | w1].
       - w_enc_b (L, ff, 512) bf16      : per-layer w2.
       - b_enc   (L, 8, 512) f32        : per-layer biases + LN params.
    """
    def padk(w):
        return jnp.pad(w, ((0, gene_pad_dim - gene_dim), (0, 0)))

    inv1 = 1.0 / (cross_out ** 0.5)   # DualCrossAttention scale
    inv2 = 1.0 / (256.0 ** 0.5)       # DualCrossAttention2 scale (hard-coded 256)

    w_cols = [
        p["co_img_q"], p["co_img_k"], p["co_img_v"],
        padk(p["co_gene_q"]), padk(p["co_gene_k"]), padk(p["co_gene_v"]),
        p["dc1_q_w"] * inv1, p["dc1_k_w"], p["dc1_v_w"],
        p["dc2_q_w"] * inv1, p["dc2_k_w"], p["dc2_v_w"],
        p["d2a1_q_w"] * inv2, p["d2a1_k_w"], p["d2a1_v_w"],
        padk(p["adj_w"]),
        p["d2a2_q_w"] * inv2, p["d2a2_k_w"], p["d2a2_v_w"],
    ]
    w_front = jnp.concatenate(w_cols, axis=1).astype(jnp.bfloat16)

    zero = jnp.zeros((1, cross_out), jnp.float32)

    def row(a, b=None):
        return jnp.concatenate([a, zero if b is None else b], axis=1)

    rows = [
        row(p["dc1_q_b"] * inv1), row(p["dc1_k_b"], p["dc1_v_b"]),
        row(p["dc2_q_b"] * inv1), row(p["dc2_k_b"], p["dc2_v_b"]),
        row(p["d2a1_q_b"] * inv2), row(p["d2a1_k_b"], p["d2a1_v_b"]),
        row(p["adj_b"]),
        row(p["d2a2_q_b"] * inv2), row(p["d2a2_k_b"], p["d2a2_v_b"]),
    ]
    b_front = jnp.concatenate(rows, axis=0)
    b_front = jnp.pad(b_front, ((0, 16 - b_front.shape[0]), (0, 0)))

    wa, wb, be = [], [], []
    for lyr in p["enc_layers"]:
        wa.append(jnp.concatenate([lyr["wv"], lyr["wo"], lyr["w1"]], axis=1))
        wb.append(lyr["w2"])
        b1_pad = jnp.pad(lyr["b1"], ((0, 0), (0, d_model - dim_ff)))
        be.append(jnp.concatenate([lyr["bv"], lyr["bo"], lyr["ln1_g"], lyr["ln1_b"],
                                   b1_pad, lyr["b2"], lyr["ln2_g"], lyr["ln2_b"]], axis=0))
    w_enc_a = jnp.stack(wa).astype(jnp.bfloat16)
    w_enc_b = jnp.stack(wb).astype(jnp.bfloat16)
    b_enc = jnp.stack(be)
    return (w_front, b_front, w_enc_a, w_enc_b, b_enc)


# --------------------------------------------------------------------------
# Pure-JAX reference of the eval-mode forward (un-padded, un-folded, f32)
# --------------------------------------------------------------------------
def reference_forward(p, img, gene, *, cross_out):
    hp = jax.lax.Precision.HIGHEST
    dot = lambda a, b: jnp.dot(a, b, precision=hp)

    q_img = dot(img, p["co_img_q"]); k_img = dot(img, p["co_img_k"]); v_img = dot(img, p["co_img_v"])
    q_gene = dot(gene, p["co_gene_q"]); k_gene = dot(gene, p["co_gene_k"]); v_gene = dot(gene, p["co_gene_v"])
    co_img = dot(jax.nn.softmax(dot(q_img, k_gene.T), axis=-1), v_gene)
    co_gene = dot(jax.nn.softmax(dot(q_gene, k_img.T), axis=-1), v_img)

    def sdpa(xq, xk, xv, pre, scale):
        q = dot(xq, p[pre + "_q_w"]) + p[pre + "_q_b"]
        k = dot(xk, p[pre + "_k_w"]) + p[pre + "_k_b"]
        v = dot(xv, p[pre + "_v_w"]) + p[pre + "_v_b"]
        return dot(jax.nn.softmax(dot(q, k.T) / scale, axis=-1), v)

    s1 = cross_out ** 0.5
    a_ig = sdpa(co_img, co_gene, co_gene, "dc1", s1)
    a_gi = sdpa(co_gene, co_img, co_img, "dc2", s1)

    s2 = 256.0 ** 0.5
    r_img = sdpa(a_ig, img, img, "d2a1", s2)
    adj = dot(gene, p["adj_w"]) + p["adj_b"]
    r_gene = sdpa(a_gi, adj, adj, "d2a2", s2)

    x = jnp.concatenate([r_img, r_gene], axis=-1)

    def ln(x, g, b):
        mu = x.mean(-1, keepdims=True)
        var = ((x - mu) ** 2).mean(-1, keepdims=True)
        return (x - mu) / jnp.sqrt(var + _EPS) * g + b

    for lyr in p["enc_layers"]:
        attn = dot(dot(x, lyr["wv"]) + lyr["bv"], lyr["wo"]) + lyr["bo"]
        x = ln(x + attn, lyr["ln1_g"], lyr["ln1_b"])
        ff = dot(jnp.maximum(dot(x, lyr["w1"]) + lyr["b1"], 0.0), lyr["w2"]) + lyr["b2"]
        x = ln(x + ff, lyr["ln2_g"], lyr["ln2_b"])
    return x


# --------------------------------------------------------------------------
# Demo
# --------------------------------------------------------------------------
if __name__ == "__main__":
    # Shapes forced by the module: DualCrossAttention2 hard-codes img_dim=256,
    # gene_dim=138, output_dim=256, and the encoder hard-codes d_model=512,
    # so co_output_dim == cross_output_dim == 256 and both modalities share N.
    N = 8
    IMG_DIM, GENE_DIM = 256, 138
    CO_OUT = CROSS_OUT = 256
    D_MODEL, NHEAD, NUM_LAYERS, DIM_FF = 512, 4, 2, 128
    assert D_MODEL == 2 * CO_OUT and D_MODEL % NHEAD == 0 and DIM_FF <= D_MODEL

    key = jax.random.PRNGKey(0)
    k_img, k_gene, k_par = jax.random.split(key, 3)
    img_features = jax.random.normal(k_img, (N, IMG_DIM), jnp.float32)
    gene_features = jax.random.normal(k_gene, (N, GENE_DIM), jnp.float32)

    params = init_params(k_par, IMG_DIM, GENE_DIM, CO_OUT, CROSS_OUT,
                         D_MODEL, NUM_LAYERS, DIM_FF)

    GENE_PAD = _round_up(GENE_DIM, 128)            # 138 -> 256 (lane aligned)
    packed = prepare_params(params, gene_dim=GENE_DIM, gene_pad_dim=GENE_PAD,
                            cross_out=CROSS_OUT, d_model=D_MODEL, dim_ff=DIM_FF)

    fwd = jax.jit(functools.partial(co_dual_cross_attention_forward,
                                    num_layers=NUM_LAYERS, co_out=CO_OUT,
                                    gene_pad_dim=GENE_PAD, dim_ff=DIM_FF))
    out = jax.block_until_ready(fwd(packed, img_features, gene_features))

    assert out.shape == (N, D_MODEL), out.shape
    assert out.dtype == jnp.float32
    assert bool(jnp.all(jnp.isfinite(out)))

    # sanity check against a pure-JAX f32 reference of the same eval-mode math
    # (tolerance reflects bf16 weights/activations at the MXU inputs)
    ref = reference_forward(params, img_features, gene_features, cross_out=CROSS_OUT)
    max_err = float(jnp.max(jnp.abs(out - ref)))
    assert max_err < 1e-1, f"mismatch vs pure-JAX reference: {max_err}"

    print("KERNEL_OK")
</pallas_src>

<mosaic_0001>
module attributes {stable_mosaic.version = 11 : i64} {
  func.func @_fused_kernel(%arg0: i32, %arg1: memref<8x256xf32, #tpu.memory_space<vmem>>, %arg2: memref<8x256xf32, #tpu.memory_space<vmem>>, %arg3: memref<256x4864xbf16, #tpu.memory_space<vmem>>, %arg4: memref<16x512xf32, #tpu.memory_space<vmem>>, %arg5: memref<1x512x1152xbf16, #tpu.memory_space<vmem>>, %arg6: memref<1x128x512xbf16, #tpu.memory_space<vmem>>, %arg7: memref<1x8x512xf32, #tpu.memory_space<vmem>>, %arg8: memref<8x512xf32, #tpu.memory_space<vmem>>, %arg9: memref<8x512xf32, #tpu.memory_space<vmem>>) attributes {dimension_semantics = [#tpu.dimension_semantics<arbitrary>], iteration_bounds = array<i64: 2>, scalar_prefetch = 0 : i64, scratch_operands = 1 : i64, tpu.core_type = #tpu.core_type<tc>, window_params = [{pipeline_mode = #tpu.pipeline_mode<synchronous>, transform_indices = @transform_0, window_bounds = array<i64: 8, 256>}, {pipeline_mode = #tpu.pipeline_mode<synchronous>, transform_indices = @transform_1, window_bounds = array<i64: 8, 256>}, {pipeline_mode = #tpu.pipeline_mode<synchronous>, transform_indices = @transform_2, window_bounds = array<i64: 256, 4864>}, {pipeline_mode = #tpu.pipeline_mode<synchronous>, transform_indices = @transform_3, window_bounds = array<i64: 16, 512>}, {transform_indices = @transform_4, window_bounds = array<i64: 1, 512, 1152>}, {transform_indices = @transform_5, window_bounds = array<i64: 1, 128, 512>}, {transform_indices = @transform_6, window_bounds = array<i64: 1, 8, 512>}, {pipeline_mode = #tpu.pipeline_mode<synchronous>, transform_indices = @transform_7, window_bounds = array<i64: 8, 512>}]} {
    %c0_i32 = arith.constant 0 : i32
    %0 = arith.cmpi eq, %arg0, %c0_i32 : i32
    %1 = arith.extui %0 : i1 to i32
    %c0_i32_0 = arith.constant 0 : i32
    %2 = arith.cmpi ne, %1, %c0_i32_0 : i32
    scf.if %2 {
      %c0_47 = arith.constant 0 : index
      %c0_48 = arith.constant 0 : index
      %94 = vector.load %arg1[%c0_47, %c0_48] : memref<8x256xf32, #tpu.memory_space<vmem>>, vector<8x256xf32>
      %c0_49 = arith.constant 0 : index
      %c0_50 = arith.constant 0 : index
      %95 = vector.load %arg2[%c0_49, %c0_50] : memref<8x256xf32, #tpu.memory_space<vmem>>, vector<8x256xf32>
      %c0_51 = arith.constant 0 : index
      %c0_52 = arith.constant 0 : index
      %96 = vector.load %arg3[%c0_51, %c0_52] : memref<256x4864xbf16, #tpu.memory_space<vmem>>, vector<256x768xbf16>
      %97 = arith.truncf %94 : vector<8x256xf32> to vector<8x256xbf16>
      %cst_53 = arith.constant dense<0.000000e+00> : vector<8x768xf32>
      %98 = tpu.matmul %97, %96, %cst_53 {dimension_numbers = #tpu.dot_dimension_numbers<[1], [0], [0], [1], [0, 0, 1, 1], [], []>} : vector<8x256xbf16>, vector<256x768xbf16>, vector<8x768xf32> -> vector<8x768xf32>
      %c0_54 = arith.constant 0 : index
      %c768 = arith.constant 768 : index
      %99 = vector.load %arg3[%c0_54, %c768] : memref<256x4864xbf16, #tpu.memory_space<vmem>>, vector<256x768xbf16>
      %100 = arith.truncf %95 : vector<8x256xf32> to vector<8x256xbf16>
      %cst_55 = arith.constant dense<0.000000e+00> : vector<8x768xf32>
      %101 = tpu.matmul %100, %99, %cst_55 {dimension_numbers = #tpu.dot_dimension_numbers<[1], [0], [0], [1], [0, 0, 1, 1], [], []>} : vector<8x256xbf16>, vector<256x768xbf16>, vector<8x768xf32> -> vector<8x768xf32>
      %102 = vector.extract_strided_slice %98 {offsets = [0, 0], sizes = [8, 256], strides = [1, 1]} : vector<8x768xf32> to vector<8x256xf32>
      %103 = vector.extract_strided_slice %98 {offsets = [0, 256], sizes = [8, 256], strides = [1, 1]} : vector<8x768xf32> to vector<8x256xf32>
      %104 = vector.extract_strided_slice %98 {offsets = [0, 512], sizes = [8, 256], strides = [1, 1]} : vector<8x768xf32> to vector<8x256xf32>
      %105 = vector.extract_strided_slice %101 {offsets = [0, 0], sizes = [8, 256], strides = [1, 1]} : vector<8x768xf32> to vector<8x256xf32>
      %106 = vector.extract_strided_slice %101 {offsets = [0, 256], sizes = [8, 256], strides = [1, 1]} : vector<8x768xf32> to vector<8x256xf32>
      %107 = vector.extract_strided_slice %101 {offsets = [0, 512], sizes = [8, 256], strides = [1, 1]} : vector<8x768xf32> to vector<8x256xf32>
      %cst_56 = arith.constant dense<0.000000e+00> : vector<8x8xf32>
      %108 = tpu.matmul %102, %106, %cst_56 {dimension_numbers = #tpu.dot_dimension_numbers<[1], [1], [0], [0], [0, 0, 1, 0], [], []>} : vector<8x256xf32>, vector<8x256xf32>, vector<8x8xf32> -> vector<8x8xf32>
      %cst_57 = arith.constant dense<0xFF800000> : vector<8xf32>
      %109 = vector.multi_reduction <maximumf>, %108, %cst_57 [1] : vector<8x8xf32> to vector<8xf32>
      %110 = vector.shape_cast %109 : vector<8xf32> to vector<8x1xf32>
      %111 = vector.broadcast %110 : vector<8x1xf32> to vector<8x8xf32>
      %112 = arith.subf %108, %111 : vector<8x8xf32>
      %113 = math.exp %112 : vector<8x8xf32>
      %cst_58 = arith.constant dense<0.000000e+00> : vector<8xf32>
      %114 = vector.multi_reduction <add>, %113, %cst_58 [1] : vector<8x8xf32> to vector<8xf32>
      %115 = vector.shape_cast %114 : vector<8xf32> to vector<8x1xf32>
      %116 = tpu.reciprocal %115 : vector<8x1xf32> -> vector<8x1xf32>
      %117 = vector.broadcast %116 : vector<8x1xf32> to vector<8x8xf32>
      %118 = arith.mulf %113, %117 : vector<8x8xf32>
      %cst_59 = arith.constant dense<0.000000e+00> : vector<8x256xf32>
      %119 = tpu.matmul %118, %107, %cst_59 {dimension_numbers = #tpu.dot_dimension_numbers<[1], [0], [0], [1], [0, 0, 1, 1], [], []>} : vector<8x8xf32>, vector<8x256xf32>, vector<8x256xf32> -> vector<8x256xf32>
      %cst_60 = arith.constant dense<0.000000e+00> : vector<8x8xf32>
      %120 = tpu.matmul %105, %103, %cst_60 {dimension_numbers = #tpu.dot_dimension_numbers<[1], [1], [0], [0], [0, 0, 1, 0], [], []>} : vector<8x256xf32>, vector<8x256xf32>, vector<8x8xf32> -> vector<8x8xf32>
      %cst_61 = arith.constant dense<0xFF800000> : vector<8xf32>
      %121 = vector.multi_reduction <maximumf>, %120, %cst_61 [1] : vector<8x8xf32> to vector<8xf32>
      %122 = vector.shape_cast %121 : vector<8xf32> to vector<8x1xf32>
      %123 = vector.broadcast %122 : vector<8x1xf32> to vector<8x8xf32>
      %124 = arith.subf %120, %123 : vector<8x8xf32>
      %125 = math.exp %124 : vector<8x8xf32>
      %cst_62 = arith.constant dense<0.000000e+00> : vector<8xf32>
      %126 = vector.multi_reduction <add>, %125, %cst_62 [1] : vector<8x8xf32> to vector<8xf32>
      %127 = vector.shape_cast %126 : vector<8xf32> to vector<8x1xf32>
      %128 = tpu.reciprocal %127 : vector<8x1xf32> -> vector<8x1xf32>
      %129 = vector.broadcast %128 : vector<8x1xf32> to vector<8x8xf32>
      %130 = arith.mulf %125, %129 : vector<8x8xf32>
      %cst_63 = arith.constant dense<0.000000e+00> : vector<8x256xf32>
      %131 = tpu.matmul %130, %104, %cst_63 {dimension_numbers = #tpu.dot_dimension_numbers<[1], [0], [0], [1], [0, 0, 1, 1], [], []>} : vector<8x8xf32>, vector<8x256xf32>, vector<8x256xf32> -> vector<8x256xf32>
      %c0_64 = arith.constant 0 : index
      %c1536 = arith.constant 1536 : index
      %132 = vector.load %arg3[%c0_64, %c1536] : memref<256x4864xbf16, #tpu.memory_space<vmem>>, vector<256x256xbf16>
      %133 = arith.truncf %119 : vector<8x256xf32> to vector<8x256xbf16>
      %cst_65 = arith.constant dense<0.000000e+00> : vector<8x256xf32>
      %134 = tpu.matmul %133, %132, %cst_65 {dimension_numbers = #tpu.dot_dimension_numbers<[1], [0], [0], [1], [0, 0, 1, 1], [], []>} : vector<8x256xbf16>, vector<256x256xbf16>, vector<8x256xf32> -> vector<8x256xf32>
      %c0_66 = arith.constant 0 : index
      %c0_67 = arith.constant 0 : index
      %135 = vector.load %arg4[%c0_66, %c0_67] : memref<16x512xf32, #tpu.memory_space<vmem>>, vector<1x256xf32>
      %136 = vector.broadcast %135 : vector<1x256xf32> to vector<8x256xf32>
      %137 = arith.addf %134, %136 : vector<8x256xf32>
      %c0_68 = arith.constant 0 : index
      %c1792 = arith.constant 1792 : index
      %138 = vector.load %arg3[%c0_68, %c1792] : memref<256x4864xbf16, #tpu.memory_space<vmem>>, vector<256x512xbf16>
      %139 = arith.truncf %131 : vector<8x256xf32> to vector<8x256xbf16>
      %cst_69 = arith.constant dense<0.000000e+00> : vector<8x512xf32>
      %140 = tpu.matmul %139, %138, %cst_69 {dimension_numbers = #tpu.dot_dimension_numbers<[1], [0], [0], [1], [0, 0, 1, 1], [], []>} : vector<8x256xbf16>, vector<256x512xbf16>, vector<8x512xf32> -> vector<8x512xf32>
      %c1_70 = arith.constant 1 : index
      %c0_71 = arith.constant 0 : index
      %141 = vector.load %arg4[%c1_70, %c0_71] : memref<16x512xf32, #tpu.memory_space<vmem>>, vector<1x512xf32>
      %142 = vector.broadcast %141 : vector<1x512xf32> to vector<8x512xf32>
      %143 = arith.addf %140, %142 : vector<8x512xf32>
      %144 = vector.extract_strided_slice %143 {offsets = [0, 0], sizes = [8, 256], strides = [1, 1]} : vector<8x512xf32> to vector<8x256xf32>
      %145 = vector.extract_strided_slice %143 {offsets = [0, 256], sizes = [8, 256], strides = [1, 1]} : vector<8x512xf32> to vector<8x256xf32>
      %cst_72 = arith.constant dense<0.000000e+00> : vector<8x8xf32>
      %146 = tpu.matmul %137, %144, %cst_72 {dimension_numbers = #tpu.dot_dimension_numbers<[1], [1], [0], [0], [0, 0, 1, 0], [], []>} : vector<8x256xf32>, vector<8x256xf32>, vector<8x8xf32> -> vector<8x8xf32>
      %cst_73 = arith.constant dense<0xFF800000> : vector<8xf32>
      %147 = vector.multi_reduction <maximumf>, %146, %cst_73 [1] : vector<8x8xf32> to vector<8xf32>
      %148 = vector.shape_cast %147 : vector<8xf32> to vector<8x1xf32>
      %149 = vector.broadcast %148 : vector<8x1xf32> to vector<8x8xf32>
      %150 = arith.subf %146, %149 : vector<8x8xf32>
      %151 = math.exp %150 : vector<8x8xf32>
      %cst_74 = arith.constant dense<0.000000e+00> : vector<8xf32>
      %152 = vector.multi_reduction <add>, %151, %cst_74 [1] : vector<8x8xf32> to vector<8xf32>
      %153 = vector.shape_cast %152 : vector<8xf32> to vector<8x1xf32>
      %154 = tpu.reciprocal %153 : vector<8x1xf32> -> vector<8x1xf32>
      %155 = vector.broadcast %154 : vector<8x1xf32> to vector<8x8xf32>
      %156 = arith.mulf %151, %155 : vector<8x8xf32>
      %cst_75 = arith.constant dense<0.000000e+00> : vector<8x256xf32>
      %157 = tpu.matmul %156, %145, %cst_75 {dimension_numbers = #tpu.dot_dimension_numbers<[1], [0], [0], [1], [0, 0, 1, 1], [], []>} : vector<8x8xf32>, vector<8x256xf32>, vector<8x256xf32> -> vector<8x256xf32>
      %c0_76 = arith.constant 0 : index
      %c2304 = arith.constant 2304 : index
      %158 = vector.load %arg3[%c0_76, %c2304] : memref<256x4864xbf16, #tpu.memory_space<vmem>>, vector<256x256xbf16>
      %159 = arith.truncf %131 : vector<8x256xf32> to vector<8x256xbf16>
      %cst_77 = arith.constant dense<0.000000e+00> : vector<8x256xf32>
      %160 = tpu.matmul %159, %158, %cst_77 {dimension_numbers = #tpu.dot_dimension_numbers<[1], [0], [0], [1], [0, 0, 1, 1], [], []>} : vector<8x256xbf16>, vector<256x256xbf16>, vector<8x256xf32> -> vector<8x256xf32>
      %c2_78 = arith.constant 2 : index
      %c0_79 = arith.constant 0 : index
      %161 = vector.load %arg4[%c2_78, %c0_79] : memref<16x512xf32, #tpu.memory_space<vmem>>, vector<1x256xf32>
      %162 = vector.broadcast %161 : vector<1x256xf32> to vector<8x256xf32>
      %163 = arith.addf %160, %162 : vector<8x256xf32>
      %c0_80 = arith.constant 0 : index
      %c2560 = arith.constant 2560 : index
      %164 = vector.load %arg3[%c0_80, %c2560] : memref<256x4864xbf16, #tpu.memory_space<vmem>>, vector<256x512xbf16>
      %165 = arith.truncf %119 : vector<8x256xf32> to vector<8x256xbf16>
      %cst_81 = arith.constant dense<0.000000e+00> : vector<8x512xf32>
      %166 = tpu.matmul %165, %164, %cst_81 {dimension_numbers = #tpu.dot_dimension_numbers<[1], [0], [0], [1], [0, 0, 1, 1], [], []>} : vector<8x256xbf16>, vector<256x512xbf16>, vector<8x512xf32> -> vector<8x512xf32>
      %c3_82 = arith.constant 3 : index
      %c0_83 = arith.constant 0 : index
      %167 = vector.load %arg4[%c3_82, %c0_83] : memref<16x512xf32, #tpu.memory_space<vmem>>, vector<1x512xf32>
      %168 = vector.broadcast %167 : vector<1x512xf32> to vector<8x512xf32>
      %169 = arith.addf %166, %168 : vector<8x512xf32>
      %170 = vector.extract_strided_slice %169 {offsets = [0, 0], sizes = [8, 256], strides = [1, 1]} : vector<8x512xf32> to vector<8x256xf32>
      %171 = vector.extract_strided_slice %169 {offsets = [0, 256], sizes = [8, 256], strides = [1, 1]} : vector<8x512xf32> to vector<8x256xf32>
      %cst_84 = arith.constant dense<0.000000e+00> : vector<8x8xf32>
      %172 = tpu.matmul %163, %170, %cst_84 {dimension_numbers = #tpu.dot_dimension_numbers<[1], [1], [0], [0], [0, 0, 1, 0], [], []>} : vector<8x256xf32>, vector<8x256xf32>, vector<8x8xf32> -> vector<8x8xf32>
      %cst_85 = arith.constant dense<0xFF800000> : vector<8xf32>
      %173 = vector.multi_reduction <maximumf>, %172, %cst_85 [1] : vector<8x8xf32> to vector<8xf32>
      %174 = vector.shape_cast %173 : vector<8xf32> to vector<8x1xf32>
      %175 = vector.broadcast %174 : vector<8x1xf32> to vector<8x8xf32>
      %176 = arith.subf %172, %175 : vector<8x8xf32>
      %177 = math.exp %176 : vector<8x8xf32>
      %cst_86 = arith.constant dense<0.000000e+00> : vector<8xf32>
      %178 = vector.multi_reduction <add>, %177, %cst_86 [1] : vector<8x8xf32> to vector<8xf32>
      %179 = vector.shape_cast %178 : vector<8xf32> to vector<8x1xf32>
      %180 = tpu.reciprocal %179 : vector<8x1xf32> -> vector<8x1xf32>
      %181 = vector.broadcast %180 : vector<8x1xf32> to vector<8x8xf32>
      %182 = arith.mulf %177, %181 : vector<8x8xf32>
      %cst_87 = arith.constant dense<0.000000e+00> : vector<8x256xf32>
      %183 = tpu.matmul %182, %171, %cst_87 {dimension_numbers = #tpu.dot_dimension_numbers<[1], [0], [0], [1], [0, 0, 1, 1], [], []>} : vector<8x8xf32>, vector<8x256xf32>, vector<8x256xf32> -> vector<8x256xf32>
      %c0_88 = arith.constant 0 : index
      %c3072 = arith.constant 3072 : index
      %184 = vector.load %arg3[%c0_88, %c3072] : memref<256x4864xbf16, #tpu.memory_space<vmem>>, vector<256x256xbf16>
      %185 = arith.truncf %157 : vector<8x256xf32> to vector<8x256xbf16>
      %cst_89 = arith.constant dense<0.000000e+00> : vector<8x256xf32>
      %186 = tpu.matmul %185, %184, %cst_89 {dimension_numbers = #tpu.dot_dimension_numbers<[1], [0], [0], [1], [0, 0, 1, 1], [], []>} : vector<8x256xbf16>, vector<256x256xbf16>, vector<8x256xf32> -> vector<8x256xf32>
      %c4_90 = arith.constant 4 : index
      %c0_91 = arith.constant 0 : index
      %187 = vector.load %arg4[%c4_90, %c0_91] : memref<16x512xf32, #tpu.memory_space<vmem>>, vector<1x256xf32>
      %188 = vector.broadcast %187 : vector<1x256xf32> to vector<8x256xf32>
      %189 = arith.addf %186, %188 : vector<8x256xf32>
      %c0_92 = arith.constant 0 : index
      %c3328 = arith.constant 3328 : index
      %190 = vector.load %arg3[%c0_92, %c3328] : memref<256x4864xbf16, #tpu.memory_space<vmem>>, vector<256x512xbf16>
      %191 = arith.truncf %94 : vector<8x256xf32> to vector<8x256xbf16>
      %cst_93 = arith.constant dense<0.000000e+00> : vector<8x512xf32>
      %192 = tpu.matmul %191, %190, %cst_93 {dimension_numbers = #tpu.dot_dimension_numbers<[1], [0], [0], [1], [0, 0, 1, 1], [], []>} : vector<8x256xbf16>, vector<256x512xbf16>, vector<8x512xf32> -> vector<8x512xf32>
      %c5_94 = arith.constant 5 : index
      %c0_95 = arith.constant 0 : index
      %193 = vector.load %arg4[%c5_94, %c0_95] : memref<16x512xf32, #tpu.memory_space<vmem>>, vector<1x512xf32>
      %194 = vector.broadcast %193 : vector<1x512xf32> to vector<8x512xf32>
      %195 = arith.addf %192, %194 : vector<8x512xf32>
      %196 = vector.extract_strided_slice %195 {offsets = [0, 0], sizes = [8, 256], strides = [1, 1]} : vector<8x512xf32> to vector<8x256xf32>
      %197 = vector.extract_strided_slice %195 {offsets = [0, 256], sizes = [8, 256], strides = [1, 1]} : vector<8x512xf32> to vector<8x256xf32>
      %cst_96 = arith.constant dense<0.000000e+00> : vector<8x8xf32>
      %198 = tpu.matmul %189, %196, %cst_96 {dimension_numbers = #tpu.dot_dimension_numbers<[1], [1], [0], [0], [0, 0, 1, 0], [], []>} : vector<8x256xf32>, vector<8x256xf32>, vector<8x8xf32> -> vector<8x8xf32>
      %cst_97 = arith.constant dense<0xFF800000> : vector<8xf32>
      %199 = vector.multi_reduction <maximumf>, %198, %cst_97 [1] : vector<8x8xf32> to vector<8xf32>
      %200 = vector.shape_cast %199 : vector<8xf32> to vector<8x1xf32>
      %201 = vector.broadcast %200 : vector<8x1xf32> to vector<8x8xf32>
      %202 = arith.subf %198, %201 : vector<8x8xf32>
      %203 = math.exp %202 : vector<8x8xf32>
      %cst_98 = arith.constant dense<0.000000e+00> : vector<8xf32>
      %204 = vector.multi_reduction <add>, %203, %cst_98 [1] : vector<8x8xf32> to vector<8xf32>
      %205 = vector.shape_cast %204 : vector<8xf32> to vector<8x1xf32>
      %206 = tpu.reciprocal %205 : vector<8x1xf32> -> vector<8x1xf32>
      %207 = vector.broadcast %206 : vector<8x1xf32> to vector<8x8xf32>
      %208 = arith.mulf %203, %207 : vector<8x8xf32>
      %cst_99 = arith.constant dense<0.000000e+00> : vector<8x256xf32>
      %209 = tpu.matmul %208, %197, %cst_99 {dimension_numbers = #tpu.dot_dimension_numbers<[1], [0], [0], [1], [0, 0, 1, 1], [], []>} : vector<8x8xf32>, vector<8x256xf32>, vector<8x256xf32> -> vector<8x256xf32>
      %c0_100 = arith.constant 0 : index
      %c3840 = arith.constant 3840 : index
      %210 = vector.load %arg3[%c0_100, %c3840] : memref<256x4864xbf16, #tpu.memory_space<vmem>>, vector<256x256xbf16>
      %211 = arith.truncf %95 : vector<8x256xf32> to vector<8x256xbf16>
      %cst_101 = arith.constant dense<0.000000e+00> : vector<8x256xf32>
      %212 = tpu.matmul %211, %210, %cst_101 {dimension_numbers = #tpu.dot_dimension_numbers<[1], [0], [0], [1], [0, 0, 1, 1], [], []>} : vector<8x256xbf16>, vector<256x256xbf16>, vector<8x256xf32> -> vector<8x256xf32>
      %c6_102 = arith.constant 6 : index
      %c0_103 = arith.constant 0 : index
      %213 = vector.load %arg4[%c6_102, %c0_103] : memref<16x512xf32, #tpu.memory_space<vmem>>, vector<1x256xf32>
      %214 = vector.broadcast %213 : vector<1x256xf32> to vector<8x256xf32>
      %215 = arith.addf %212, %214 : vector<8x256xf32>
      %c0_104 = arith.constant 0 : index
      %c4096 = arith.constant 4096 : index
      %216 = vector.load %arg3[%c0_104, %c4096] : memref<256x4864xbf16, #tpu.memory_space<vmem>>, vector<256x256xbf16>
      %217 = arith.truncf %183 : vector<8x256xf32> to vector<8x256xbf16>
      %cst_105 = arith.constant dense<0.000000e+00> : vector<8x256xf32>
      %218 = tpu.matmul %217, %216, %cst_105 {dimension_numbers = #tpu.dot_dimension_numbers<[1], [0], [0], [1], [0, 0, 1, 1], [], []>} : vector<8x256xbf16>, vector<256x256xbf16>, vector<8x256xf32> -> vector<8x256xf32>
      %c7_106 = arith.constant 7 : index
      %c0_107 = arith.constant 0 : index
      %219 = vector.load %arg4[%c7_106, %c0_107] : memref<16x512xf32, #tpu.memory_space<vmem>>, vector<1x256xf32>
      %220 = vector.broadcast %219 : vector<1x256xf32> to vector<8x256xf32>
      %221 = arith.addf %218, %220 : vector<8x256xf32>
      %c0_108 = arith.constant 0 : index
      %c4352 = arith.constant 4352 : index
      %222 = vector.load %arg3[%c0_108, %c4352] : memref<256x4864xbf16, #tpu.memory_space<vmem>>, vector<256x512xbf16>
      %223 = arith.truncf %215 : vector<8x256xf32> to vector<8x256xbf16>
      %cst_109 = arith.constant dense<0.000000e+00> : vector<8x512xf32>
      %224 = tpu.matmul %223, %222, %cst_109 {dimension_numbers = #tpu.dot_dimension_numbers<[1], [0], [0], [1], [0, 0, 1, 1], [], []>} : vector<8x256xbf16>, vector<256x512xbf16>, vector<8x512xf32> -> vector<8x512xf32>
      %c8 = arith.constant 8 : index
      %c0_110 = arith.constant 0 : index
      %225 = vector.load %arg4[%c8, %c0_110] : memref<16x512xf32, #tpu.memory_space<vmem>>, vector<1x512xf32>
      %226 = vector.broadcast %225 : vector<1x512xf32> to vector<8x512xf32>
      %227 = arith.addf %224, %226 : vector<8x512xf32>
      %228 = vector.extract_strided_slice %227 {offsets = [0, 0], sizes = [8, 256], strides = [1, 1]} : vector<8x512xf32> to vector<8x256xf32>
      %229 = vector.extract_strided_slice %227 {offsets = [0, 256], sizes = [8, 256], strides = [1, 1]} : vector<8x512xf32> to vector<8x256xf32>
      %cst_111 = arith.constant dense<0.000000e+00> : vector<8x8xf32>
      %230 = tpu.matmul %221, %228, %cst_111 {dimension_numbers = #tpu.dot_dimension_numbers<[1], [1], [0], [0], [0, 0, 1, 0], [], []>} : vector<8x256xf32>, vector<8x256xf32>, vector<8x8xf32> -> vector<8x8xf32>
      %cst_112 = arith.constant dense<0xFF800000> : vector<8xf32>
      %231 = vector.multi_reduction <maximumf>, %230, %cst_112 [1] : vector<8x8xf32> to vector<8xf32>
      %232 = vector.shape_cast %231 : vector<8xf32> to vector<8x1xf32>
      %233 = vector.broadcast %232 : vector<8x1xf32> to vector<8x8xf32>
      %234 = arith.subf %230, %233 : vector<8x8xf32>
      %235 = math.exp %234 : vector<8x8xf32>
      %cst_113 = arith.constant dense<0.000000e+00> : vector<8xf32>
      %236 = vector.multi_reduction <add>, %235, %cst_113 [1] : vector<8x8xf32> to vector<8xf32>
      %237 = vector.shape_cast %236 : vector<8xf32> to vector<8x1xf32>
      %238 = tpu.reciprocal %237 : vector<8x1xf32> -> vector<8x1xf32>
      %239 = vector.broadcast %238 : vector<8x1xf32> to vector<8x8xf32>
      %240 = arith.mulf %235, %239 : vector<8x8xf32>
      %cst_114 = arith.constant dense<0.000000e+00> : vector<8x256xf32>
      %241 = tpu.matmul %240, %229, %cst_114 {dimension_numbers = #tpu.dot_dimension_numbers<[1], [0], [0], [1], [0, 0, 1, 1], [], []>} : vector<8x8xf32>, vector<8x256xf32>, vector<8x256xf32> -> vector<8x256xf32>
      %c0_115 = arith.constant 0 : index
      %c0_116 = arith.constant 0 : index
      %242 = vector.load %arg9[%c0_115, %c0_116] : memref<8x512xf32, #tpu.memory_space<vmem>>, vector<8x256xf32>
      tpu.vector_store %arg9[%c0_115, %c0_116], %209 {strides = array<i32>} : memref<8x512xf32, #tpu.memory_space<vmem>>, vector<8x256xf32>,
      %c0_117 = arith.constant 0 : index
      %c256 = arith.constant 256 : index
      %243 = vector.load %arg9[%c0_117, %c256] : memref<8x512xf32, #tpu.memory_space<vmem>>, vector<8x256xf32>
      tpu.vector_store %arg9[%c0_117, %c256], %241 {strides = array<i32>} : memref<8x512xf32, #tpu.memory_space<vmem>>, vector<8x256xf32>,
    } else {
    }
    %c0 = arith.constant 0 : index
    %c0_1 = arith.constant 0 : index
    %3 = vector.load %arg9[%c0, %c0_1] : memref<8x512xf32, #tpu.memory_space<vmem>>, vector<8x512xf32>
    %c0_2 = arith.constant 0 : index
    %c0_3 = arith.constant 0 : index
    %c0_4 = arith.constant 0 : index
    %4 = vector.load %arg5[%c0_2, %c0_3, %c0_4] : memref<1x512x1152xbf16, #tpu.memory_space<vmem>>, vector<1x512x512xbf16>
    %5 = vector.shape_cast %4 : vector<1x512x512xbf16> to vector<512x512xbf16>
    %c0_5 = arith.constant 0 : index
    %c0_6 = arith.constant 0 : index
    %c512 = arith.constant 512 : index
    %6 = vector.load %arg5[%c0_5, %c0_6, %c512] : memref<1x512x1152xbf16, #tpu.memory_space<vmem>>, vector<1x512x512xbf16>
    %7 = vector.shape_cast %6 : vector<1x512x512xbf16> to vector<512x512xbf16>
    %c0_7 = arith.constant 0 : index
    %c0_8 = arith.constant 0 : index
    %c1024 = arith.constant 1024 : index
    %8 = vector.load %arg5[%c0_7, %c0_8, %c1024] : memref<1x512x1152xbf16, #tpu.memory_space<vmem>>, vector<1x512x128xbf16>
    %9 = vector.shape_cast %8 : vector<1x512x128xbf16> to vector<512x128xbf16>
    %c0_9 = arith.constant 0 : index
    %c0_10 = arith.constant 0 : index
    %c0_11 = arith.constant 0 : index
    %10 = vector.load %arg6[%c0_9, %c0_10, %c0_11] : memref<1x128x512xbf16, #tpu.memory_space<vmem>>, vector<1x128x512xbf16>
    %11 = vector.shape_cast %10 : vector<1x128x512xbf16> to vector<128x512xbf16>
    %c0_12 = arith.constant 0 : index
    %c0_13 = arith.constant 0 : index
    %c0_14 = arith.constant 0 : index
    %12 = vector.load %arg7[%c0_12, %c0_13, %c0_14] : memref<1x8x512xf32, #tpu.memory_space<vmem>>, vector<1x1x512xf32>
    %13 = vector.shape_cast %12 : vector<1x1x512xf32> to vector<1x512xf32>
    %c0_15 = arith.constant 0 : index
    %c1 = arith.constant 1 : index
    %c0_16 = arith.constant 0 : index
    %14 = vector.load %arg7[%c0_15, %c1, %c0_16] : memref<1x8x512xf32, #tpu.memory_space<vmem>>, vector<1x1x512xf32>
    %15 = vector.shape_cast %14 : vector<1x1x512xf32> to vector<1x512xf32>
    %c0_17 = arith.constant 0 : index
    %c2 = arith.constant 2 : index
    %c0_18 = arith.constant 0 : index
    %16 = vector.load %arg7[%c0_17, %c2, %c0_18] : memref<1x8x512xf32, #tpu.memory_space<vmem>>, vector<1x1x512xf32>
    %17 = vector.shape_cast %16 : vector<1x1x512xf32> to vector<1x512xf32>
    %c0_19 = arith.constant 0 : index
    %c3 = arith.constant 3 : index
    %c0_20 = arith.constant 0 : index
    %18 = vector.load %arg7[%c0_19, %c3, %c0_20] : memref<1x8x512xf32, #tpu.memory_space<vmem>>, vector<1x1x512xf32>
    %19 = vector.shape_cast %18 : vector<1x1x512xf32> to vector<1x512xf32>
    %c0_21 = arith.constant 0 : index
    %c4 = arith.constant 4 : index
    %c0_22 = arith.constant 0 : index
    %20 = vector.load %arg7[%c0_21, %c4, %c0_22] : memref<1x8x512xf32, #tpu.memory_space<vmem>>, vector<1x1x128xf32>
    %21 = vector.shape_cast %20 : vector<1x1x128xf32> to vector<1x128xf32>
    %c0_23 = arith.constant 0 : index
    %c5 = arith.constant 5 : index
    %c0_24 = arith.constant 0 : index
    %22 = vector.load %arg7[%c0_23, %c5, %c0_24] : memref<1x8x512xf32, #tpu.memory_space<vmem>>, vector<1x1x512xf32>
    %23 = vector.shape_cast %22 : vector<1x1x512xf32> to vector<1x512xf32>
    %c0_25 = arith.constant 0 : index
    %c6 = arith.constant 6 : index
    %c0_26 = arith.constant 0 : index
    %24 = vector.load %arg7[%c0_25, %c6, %c0_26] : memref<1x8x512xf32, #tpu.memory_space<vmem>>, vector<1x1x512xf32>
    %25 = vector.shape_cast %24 : vector<1x1x512xf32> to vector<1x512xf32>
    %c0_27 = arith.constant 0 : index
    %c7 = arith.constant 7 : index
    %c0_28 = arith.constant 0 : index
    %26 = vector.load %arg7[%c0_27, %c7, %c0_28] : memref<1x8x512xf32, #tpu.memory_space<vmem>>, vector<1x1x512xf32>
    %27 = vector.shape_cast %26 : vector<1x1x512xf32> to vector<1x512xf32>
    %28 = arith.truncf %3 : vector<8x512xf32> to vector<8x512xbf16>
    %cst = arith.constant dense<0.000000e+00> : vector<8x512xf32>
    %29 = tpu.matmul %28, %5, %cst {dimension_numbers = #tpu.dot_dimension_numbers<[1], [0], [0], [1], [0, 0, 1, 1], [], []>} : vector<8x512xbf16>, vector<512x512xbf16>, vector<8x512xf32> -> vector<8x512xf32>
    %30 = vector.broadcast %13 : vector<1x512xf32> to vector<8x512xf32>
    %31 = arith.addf %29, %30 : vector<8x512xf32>
    %32 = arith.truncf %31 : vector<8x512xf32> to vector<8x512xbf16>
    %cst_29 = arith.constant dense<0.000000e+00> : vector<8x512xf32>
    %33 = tpu.matmul %32, %7, %cst_29 {dimension_numbers = #tpu.dot_dimension_numbers<[1], [0], [0], [1], [0, 0, 1, 1], [], []>} : vector<8x512xbf16>, vector<512x512xbf16>, vector<8x512xf32> -> vector<8x512xf32>
    %34 = vector.broadcast %15 : vector<1x512xf32> to vector<8x512xf32>
    %35 = arith.addf %33, %34 : vector<8x512xf32>
    %36 = arith.addf %3, %35 : vector<8x512xf32>
    %cst_30 = arith.constant dense<0.000000e+00> : vector<8xf32>
    %37 = vector.multi_reduction <add>, %36, %cst_30 [1] : vector<8x512xf32> to vector<8xf32>
    %38 = vector.shape_cast %37 : vector<8xf32> to vector<8x1xf32>
    %cst_31 = arith.constant 5.120000e+02 : f32
    %39 = vector.broadcast %cst_31 : f32 to vector<8x1xf32>
    %40 = arith.divf %38, %39 : vector<8x1xf32>
    %41 = vector.broadcast %40 : vector<8x1xf32> to vector<8x512xf32>
    %42 = arith.subf %36, %41 : vector<8x512xf32>
    %43 = arith.mulf %42, %42 : vector<8x512xf32>
    %cst_32 = arith.constant dense<0.000000e+00> : vector<8xf32>
    %44 = vector.multi_reduction <add>, %43, %cst_32 [1] : vector<8x512xf32> to vector<8xf32>
    %45 = vector.shape_cast %44 : vector<8xf32> to vector<8x1xf32>
    %cst_33 = arith.constant 5.120000e+02 : f32
    %46 = vector.broadcast %cst_33 : f32 to vector<8x1xf32>
    %47 = arith.divf %45, %46 : vector<8x1xf32>
    %48 = vector.broadcast %40 : vector<8x1xf32> to vector<8x512xf32>
    %49 = arith.subf %36, %48 : vector<8x512xf32>
    %cst_34 = arith.constant 9.99999974E-6 : f32
    %50 = vector.broadcast %cst_34 : f32 to vector<8x1xf32>
    %51 = arith.addf %47, %50 : vector<8x1xf32>
    %52 = math.rsqrt %51 : vector<8x1xf32>
    %53 = vector.broadcast %52 : vector<8x1xf32> to vector<8x512xf32>
    %54 = arith.mulf %49, %53 : vector<8x512xf32>
    %55 = vector.broadcast %17 : vector<1x512xf32> to vector<8x512xf32>
    %56 = arith.mulf %54, %55 : vector<8x512xf32>
    %57 = vector.broadcast %19 : vector<1x512xf32> to vector<8x512xf32>
    %58 = arith.addf %56, %57 : vector<8x512xf32>
    %59 = arith.truncf %58 : vector<8x512xf32> to vector<8x512xbf16>
    %cst_35 = arith.constant dense<0.000000e+00> : vector<8x128xf32>
    %60 = tpu.matmul %59, %9, %cst_35 {dimension_numbers = #tpu.dot_dimension_numbers<[1], [0], [0], [1], [0, 0, 1, 1], [], []>} : vector<8x512xbf16>, vector<512x128xbf16>, vector<8x128xf32> -> vector<8x128xf32>
    %61 = vector.broadcast %21 : vector<1x128xf32> to vector<8x128xf32>
    %62 = arith.addf %60, %61 : vector<8x128xf32>
    %cst_36 = arith.constant 0.000000e+00 : f32
    %63 = vector.broadcast %cst_36 : f32 to vector<8x128xf32>
    %64 = arith.maximumf %62, %63 : vector<8x128xf32>
    %65 = arith.truncf %64 : vector<8x128xf32> to vector<8x128xbf16>
    %cst_37 = arith.constant dense<0.000000e+00> : vector<8x512xf32>
    %66 = tpu.matmul %65, %11, %cst_37 {dimension_numbers = #tpu.dot_dimension_numbers<[1], [0], [0], [1], [0, 0, 1, 1], [], []>} : vector<8x128xbf16>, vector<128x512xbf16>, vector<8x512xf32> -> vector<8x512xf32>
    %67 = vector.broadcast %23 : vector<1x512xf32> to vector<8x512xf32>
    %68 = arith.addf %66, %67 : vector<8x512xf32>
    %69 = arith.addf %58, %68 : vector<8x512xf32>
    %cst_38 = arith.constant dense<0.000000e+00> : vector<8xf32>
    %70 = vector.multi_reduction <add>, %69, %cst_38 [1] : vector<8x512xf32> to vector<8xf32>
    %71 = vector.shape_cast %70 : vector<8xf32> to vector<8x1xf32>
    %cst_39 = arith.constant 5.120000e+02 : f32
    %72 = vector.broadcast %cst_39 : f32 to vector<8x1xf32>
    %73 = arith.divf %71, %72 : vector<8x1xf32>
    %74 = vector.broadcast %73 : vector<8x1xf32> to vector<8x512xf32>
    %75 = arith.subf %69, %74 : vector<8x512xf32>
    %76 = arith.mulf %75, %75 : vector<8x512xf32>
    %cst_40 = arith.constant dense<0.000000e+00> : vector<8xf32>
    %77 = vector.multi_reduction <add>, %76, %cst_40 [1] : vector<8x512xf32> to vector<8xf32>
    %78 = vector.shape_cast %77 : vector<8xf32> to vector<8x1xf32>
    %cst_41 = arith.constant 5.120000e+02 : f32
    %79 = vector.broadcast %cst_41 : f32 to vector<8x1xf32>
    %80 = arith.divf %78, %79 : vector<8x1xf32>
    %81 = vector.broadcast %73 : vector<8x1xf32> to vector<8x512xf32>
    %82 = arith.subf %69, %81 : vector<8x512xf32>
    %cst_42 = arith.constant 9.99999974E-6 : f32
    %83 = vector.broadcast %cst_42 : f32 to vector<8x1xf32>
    %84 = arith.addf %80, %83 : vector<8x1xf32>
    %85 = math.rsqrt %84 : vector<8x1xf32>
    %86 = vector.broadcast %85 : vector<8x1xf32> to vector<8x512xf32>
    %87 = arith.mulf %82, %86 : vector<8x512xf32>
    %88 = vector.broadcast %25 : vector<1x512xf32> to vector<8x512xf32>
    %89 = arith.mulf %87, %88 : vector<8x512xf32>
    %90 = vector.broadcast %27 : vector<1x512xf32> to vector<8x512xf32>
    %91 = arith.addf %89, %90 : vector<8x512xf32>
    %c0_43 = arith.constant 0 : index
    %c0_44 = arith.constant 0 : index
    %92 = vector.load %arg9[%c0_43, %c0_44] : memref<8x512xf32, #tpu.memory_space<vmem>>, vector<8x512xf32>
    tpu.vector_store %arg9[%c0_43, %c0_44], %91 {strides = array<i32>} : memref<8x512xf32, #tpu.memory_space<vmem>>, vector<8x512xf32>,
    %c0_45 = arith.constant 0 : index
    %c0_46 = arith.constant 0 : index
    %93 = vector.load %arg8[%c0_45, %c0_46] : memref<8x512xf32, #tpu.memory_space<vmem>>, vector<8x512xf32>
    tpu.vector_store %arg8[%c0_45, %c0_46], %91 {strides = array<i32>} : memref<8x512xf32, #tpu.memory_space<vmem>>, vector<8x512xf32>,
    return
  }
  func.func @transform_0(%arg0: i32) -> (i32, i32) {
    %c0_i32 = arith.constant 0 : i32
    %c0_i32_0 = arith.constant 0 : i32
    %c0_i32_1 = arith.constant 0 : i32
    return %c0_i32, %c0_i32_0 : i32, i32
  }
  func.func @transform_1(%arg0: i32) -> (i32, i32) {
    %c0_i32 = arith.constant 0 : i32
    %c0_i32_0 = arith.constant 0 : i32
    %c0_i32_1 = arith.constant 0 : i32
    return %c0_i32, %c0_i32_0 : i32, i32
  }
  func.func @transform_2(%arg0: i32) -> (i32, i32) {
    %c0_i32 = arith.constant 0 : i32
    %c0_i32_0 = arith.constant 0 : i32
    %c0_i32_1 = arith.constant 0 : i32
    return %c0_i32, %c0_i32_0 : i32, i32
  }
  func.func @transform_3(%arg0: i32) -> (i32, i32) {
    %c0_i32 = arith.constant 0 : i32
    %c0_i32_0 = arith.constant 0 : i32
    %c0_i32_1 = arith.constant 0 : i32
    return %c0_i32, %c0_i32_0 : i32, i32
  }
  func.func @transform_4(%arg0: i32) -> (i32, i32, i32) {
    %c0_i32 = arith.constant 0 : i32
    %c0_i32_0 = arith.constant 0 : i32
    %c0_i32_1 = arith.constant 0 : i32
    return %arg0, %c0_i32, %c0_i32_0 : i32, i32, i32
  }
  func.func @transform_5(%arg0: i32) -> (i32, i32, i32) {
    %c0_i32 = arith.constant 0 : i32
    %c0_i32_0 = arith.constant 0 : i32
    %c0_i32_1 = arith.constant 0 : i32
    return %arg0, %c0_i32, %c0_i32_0 : i32, i32, i32
  }
  func.func @transform_6(%arg0: i32) -> (i32, i32, i32) {
    %c0_i32 = arith.constant 0 : i32
    %c0_i32_0 = arith.constant 0 : i32
    %c0_i32_1 = arith.constant 0 : i32
    return %arg0, %c0_i32, %c0_i32_0 : i32, i32, i32
  }
  func.func @transform_7(%arg0: i32) -> (i32, i32) {
    %c0_i32 = arith.constant 0 : i32
    %c0_i32_0 = arith.constant 0 : i32
    %c0_i32_1 = arith.constant 0 : i32
    return %c0_i32, %c0_i32_0 : i32, i32
  }
}

</mosaic_0001>

<bundles_post_ra>
// kernel: co_dual_cross_attention_forward.1
= control target key start
LH: loop header
LB: loop body
LE: loop exit
PB: predicated region body
PF: predicated region fallthrough
CT: control target
= control target key end

     0   :  { %s12537_s0 = inlined_call_operand.hbm [shape: f32[8,256], index: 0, kind: input, shape index: {}]   ;;  %s12538_s1 = inlined_call_operand.vmem [shape: f32[8,256], index: 1, kind: input, shape index: {}]   ;;  %s12539_s2 = inlined_call_operand.hbm [shape: bf16[256,4864], index: 2, kind: input, shape index: {}]   ;;  %s12540_s3 = inlined_call_operand.hbm [shape: f32[16,512], index: 3, kind: input, shape index: {}]   ;;  %s12541_s4 = inlined_call_operand.hbm [shape: bf16[2,512,1152], index: 4, kind: input, shape index: {}]   ;;  %s12542_s5 = inlined_call_operand.hbm [shape: bf16[2,128,512], index: 5, kind: input, shape index: {}]   ;;  %s12543_s6 = inlined_call_operand.hbm [shape: f32[2,8,512], index: 6, kind: input, shape index: {}]   ;;  %s12544_s7 = inlined_call_operand.hbm [shape: f32[8,512], index: 7, kind: output, shape index: {}]  }
   0x1   :  { %12557 = sst [smem:[#allocation23_spill]] %s12539_s2 }
   0x2   :  { %12558 = sst [smem:[#allocation24_spill]] %s12541_s4 }
   0x3   :  { %12 = vsyncpa [#allocation4], 0 }
   0x4   :  { %13 = vsyncpa [#allocation7], 0 }
   0x5   :  { %14 = vsyncpa [#allocation10], 0 }
   0x6   :  { %16 = vsyncpa [#allocation10 + $0x1], 0 }
   0x7   :  { %17 = vsyncpa [#allocation13], 0 }
   0x8   :  { %19 = vsyncpa [#allocation13 + $0x1], 0 }
   0x9   :  { %20 = vsyncpa [#allocation5], 0  ;;  %s11650_s24 = smov 0   ;;  %s11652_s25 = smov 0  }
   0xa   :  { %s11654_s26 = smov 0   ;;  %s11656_s27 = smov 0  }
   0xb LB: > { %12559 = sst [smem:[#allocation20_spill]] %s11587_s26  ;;  %s11669_s28 = sadd.s32 4294967295, %s11591_s27   ;;  %s11591_s27 = sphi %s11656_s27, %s12584_s27   ;;  %s11587_s26 = sphi %s11654_s26, %s12586_s26   ;;  %s11583_s25 = sphi %s11652_s25, %s12588_s25   ;;  %s11579_s24 = sphi %s11650_s24, %s12587_s24  }
   0xc   : > { %s11672_s29 = sadd.s32 1, %s11591_s27   ;;  %s117_s8 = sadd.s32 1, %s11587_s26 }
   0xd   : > { %12560 = sst [smem:[#allocation21_spill]] %s11672_s29  ;;  %s114_s30 = ssub.s32 %s11591_s27, %s11672_s29 }
   0xe   : > { %p115_p0 = scmp.eq.s32.totalorder %s114_s30, 0  ;;  %p124_p1 = scmp.ne.s32.totalorder %s11587_s26, %s11583_s25 }
   0xf   : > { %p125_p2 = scmp.eq.s32.totalorder %s11591_s27, 0  ;;  %p130_p3 = scmp.ne.s32.totalorder %s11583_s25, %s11579_s24 }
  0x10   : > { %s11682_s9 = scalar_select %p115_p0, %s11587_s26, %s117_s8  }
  0x11   : > { %p11684_p4 = por %p125_p2, %p124_p1  ;;  %p12545_p5 = scmp.eq.s32.totalorder %s11669_s28, 0 }
  0x12   : > { %12561 = sst [smem:[#allocation22_spill]] %s11682_s9  ;;  %p8813_p6 = scmp.ge.s32.totalorder %s11591_s27, 1 }
  0x13   : > { %s12562_s10 = scalar_select %p11684_p4, 1, 0 }
  0x14   : > { %p214_p7 = scmp.lt.s32.totalorder %s11591_s27, 3  ;;  %p11693_p8 = por %p12545_p5, %p130_p3 }
  0x15   : > { %s11593_s13 = smov [#allocation6]   ;;  %s267_s16 = sand.u32 1, %s11591_s27  }
  0x16   : > { %s12563_s11 = scalar_select %p11693_p8, 1, 0 }
  0x17   : > { %p11698_p10 = pnand %p8813_p6, %p214_p7  ;;  %s240_s14 = sshll.u32 %s11593_s13, 4  ;;  %s241_s14 = int_to_ptr.vmem [resolvable:$true] %s240_s14 }
  0x18   : > { %s11713_s17 = sand.u32 1, %s11587_s26   ;;  %s12566_s2 = sld [smem:[#allocation23_spill]] }
  0x19   : > { %s12564_s12 = scalar_select %p11698_p10, 1, 0 }
  0x1a   : > { %p9859_p11 = pneg %p11698_p10 }
  0x1c   : > { %p11706_p12 = pnand %p9859_p11, %p12545_p5 }
  0x1e   : > { %s12565_s15 = scalar_select %p11706_p12, 1, 0 }
  0x1f   : > { %s11341_s20 = scalar_lea.hbm %s12566_s2, 77824  ;;  %p11723_p1 = pneg %p11706_p12 }
  0x20   : > { %p11342_p0 = scmp.ne.s32.totalorder %s12566_s2, %s11341_s20  ;;  %p11348_p6 = scmp.lt.u32.totalorder %s11341_s20, %s12566_s2 }
  0x21   : > { %s12567_s23 = scalar_select %p11723_p1, 1, 0 }
  0x22   : > { %p11344_p2 = pnand %p11723_p1, %p11342_p0 }
  0x24   : > { %p11345_p3 = pneg %p11344_p2 }
  0x26   : > { %p11350_p7 = pnand %p11348_p6, %p11345_p3 }
  0x28   : > { %11353 = shalt.err (!%p11350_p7)
}
  0x29   : > { %s11354_s8 = scalar_lea.vmem %s241_s14, 77824  ;;  %p11362_p13 = scmp.lt.s32.totalorder %s241_s14, %s241_s14 }
  0x2a   : > { %p11355_p11 = scmp.ne.s32.totalorder %s241_s14, %s11354_s8  ;;  %p11363_p8 = scmp.lt.s32.totalorder %s11354_s8, %s11354_s8 }
  0x2c   : > { %p11357_p9 = pnand %p11355_p11, %p11723_p1  ;;  %p11364_p10 = por %p11363_p8, %p11362_p13 }
  0x2e   : > { %p11358_p5 = pneg %p11357_p9 }
  0x30   : > { %p11365_p4 = pnand %p11364_p10, %p11358_p5 }
  0x32   : > { %11368 = shalt.err (!%p11365_p4)
}
  0x33   : > { %s11594_s13 = smov 2432   ;;  %s11595_s18 = smov 152  }
  0x34   : > { %9865 = dma.hbm_to_vmem [thread:$0]  (!%p11706_p12), %s12566_s2, 77824, %s241_s14, [#allocation7], %s11594_s13, %s11594_s13, %s11595_s18  }
  0x35   : > { %s9834_s21 = smul.u32 2304, %s11713_s17  ;;  %p12568_p0 = scmp.ne.s32.totalorder %s12562_s10, 0 }
  0x36   : > { %p12569_p9 = scmp.lt.s32.totalorder %s11591_s27, 2  ;;  %s9835_s24 = smul.u32 36864, %s11591_s27 }
  0x37   : > { %s12571_s4 = sld [smem:[#allocation24_spill]]  ;;  %s271_s19 = scalar_lea.vmem [#allocation9], %s9834_s21 }
  0x38   : > { %p11744_p2 = pnand %p12569_p9, %p12568_p0  ;;  %s278_s14 = sshll.u32 %s271_s19, 4  ;;  %s11754_s14 = int_to_ptr.vmem [resolvable:$true] %s278_s14 }
  0x39   : > { %s11756_s10 = scalar_lea.sflag [#allocation10], %s267_s16 }
  0x3a   : > { %s12570_s22 = scalar_select %p11744_p2, 1, 0 }
  0x3b   : > { %p11762_p5 = pneg %p11744_p2 }
  0x3d   : > { %s11752_s9 = scalar_lea.hbm %s12571_s4, %s9835_s24  ;;  %s11374_s21 = scalar_lea.hbm %s12571_s4, 73728 }
  0x3e   : > { %s11369_s13 = scalar_lea.hbm %s11752_s9, 36864  ;;  %p11375_p13 = scmp.lt.u32.totalorder %s11752_s9, %s12571_s4 }
  0x3f   : > { %p11370_p4 = scmp.ne.s32.totalorder %s11752_s9, %s11369_s13  ;;  %p11376_p3 = scmp.lt.u32.totalorder %s11374_s21, %s11369_s13 }
  0x40   : > { %p11378_p7 = scmp.lt.u32.totalorder %s11369_s13, %s11752_s9 }
  0x41   : > { %p11372_p8 = pnand %p11762_p5, %p11370_p4  ;;  %p11377_p6 = por %p11376_p3, %p11375_p13 }
  0x43   : > { %p11373_p10 = pneg %p11372_p8  ;;  %p11379_p11 = por %p11378_p7, %p11377_p6 }
  0x45   : > { %p11380_p0 = pnand %p11379_p11, %p11373_p10 }
  0x47   : > { %11383 = shalt.err (!%p11380_p0)
}
  0x48   : > { %s11384_s16 = scalar_lea.vmem %s11754_s14, 36864  ;;  %s11596_s19 = smov [#allocation9]  }
  0x49   : > { %p11385_p9 = scmp.ne.s32.totalorder %s11754_s14, %s11384_s16  ;;  %s11389_s20 = sshll.u32 %s11596_s19, 4  ;;  %s11390_s20 = int_to_ptr.vmem [resolvable:$false] %s11389_s20 }
  0x4a   : > { %s11391_s24 = scalar_lea.vmem %s11390_s20, 73728  ;;  %p11392_p12 = scmp.lt.s32.totalorder %s11754_s14, %s11390_s20 }
  0x4b   : > { %p11387_p4 = pnand %p11385_p9, %p11762_p5  ;;  %p11393_p1 = scmp.lt.s32.totalorder %s11391_s24, %s11384_s16 }
  0x4d   : > { %p11388_p8 = pneg %p11387_p4  ;;  %p11394_p13 = por %p11393_p1, %p11392_p12 }
  0x4f   : > { %p11395_p3 = pnand %p11394_p13, %p11388_p8 }
  0x51   : > { %11398 = shalt.err (!%p11395_p3)
}
  0x52   : > { %s11597_s13 = smov 576   ;;  %s11598_s21 = smov 36  }
  0x53   : > { %9872 = dma.hbm_to_vmem [thread:$0]  (!%p11744_p2), %s11752_s9, 36864, %s11754_s14, %s11756_s10, %s11597_s13, %s11597_s13, %s11598_s21  }
  0x54   : > { %s11599_s30 = smov [#allocation3]   ;;  %s11600_s2 = smov [#allocation8]  }
  0x55   : > { %s227_s8 = sshll.u32 %s11599_s30, 4  ;;  %s253_s19 = sshll.u32 %s11600_s2, 4  ;;  %s228_s8 = int_to_ptr.vmem [resolvable:$true] %s227_s8  ;;  %s11786_s19 = int_to_ptr.vmem [resolvable:$true] %s253_s19 }
  0x56   : > { %s11399_s24 = scalar_lea.hbm %s12537_s0, 256  ;;  %p12573_p1 = scmp.ne.s32.totalorder %s12567_s23, 0 }
  0x57   : > { %p11400_p12 = scmp.ne.s32.totalorder %s12537_s0, %s11399_s24  ;;  %p11406_p7 = scmp.lt.u32.totalorder %s11399_s24, %s12537_s0 }
  0x59   : > { %p11402_p10 = pnand %p11400_p12, %p12573_p1 }
  0x5b   : > { %p11403_p6 = pneg %p11402_p10 }
  0x5d   : > { %p11408_p11 = pnand %p11406_p7, %p11403_p6 }
  0x5f   : > { %11411 = shalt.err (!%p11408_p11)
}
  0x60   : > { %s11412_s2 = scalar_lea.vmem %s228_s8, 256  ;;  %p11420_p8 = scmp.lt.s32.totalorder %s228_s8, %s228_s8 }
  0x61   : > { %p11413_p0 = scmp.ne.s32.totalorder %s228_s8, %s11412_s2  ;;  %p11421_p13 = scmp.lt.s32.totalorder %s11412_s2, %s11412_s2 }
  0x63   : > { %p11415_p9 = pnand %p11413_p0, %p12573_p1  ;;  %p11422_p3 = por %p11421_p13, %p11420_p8 }
  0x65   : > { %p11416_p4 = pneg %p11415_p9 }
  0x67   : > { %p11423_p2 = pnand %p11422_p3, %p11416_p4 }
  0x69   : > { %11426 = shalt.err (!%p11423_p2)
}
  0x6a   : > { %p12574_p12 = scmp.ne.s32.totalorder %s12565_s15, 0  ;;  %s11427_s13 = scalar_lea.hbm %s12540_s3, 1024 }
  0x6b   : > { %p11428_p10 = scmp.ne.s32.totalorder %s12540_s3, %s11427_s13  ;;  %p11434_p2 = scmp.lt.u32.totalorder %s11427_s13, %s12540_s3 }
  0x6c   : > { %9862 = dma.hbm_to_vmem [thread:$0]  (!%p12574_p12), %s12537_s0, 256, %s228_s8, [#allocation4]  }
  0x6d   : > { %p11430_p6 = pnand %p11428_p10, %p12573_p1 }
  0x6f   : > { %p11431_p7 = pneg %p11430_p6 }
  0x71   : > { %p11436_p11 = pnand %p11434_p2, %p11431_p7 }
  0x73   : > { %11439 = shalt.err (!%p11436_p11)
}
  0x74   : > { %s11440_s8 = scalar_lea.vmem %s11786_s19, 1024  ;;  %p11448_p8 = scmp.lt.s32.totalorder %s11786_s19, %s11786_s19 }
  0x75   : > { %p11441_p0 = scmp.ne.s32.totalorder %s11786_s19, %s11440_s8  ;;  %p11449_p13 = scmp.lt.s32.totalorder %s11440_s8, %s11440_s8 }
  0x77   : > { %p11443_p9 = pnand %p11441_p0, %p12573_p1  ;;  %p11450_p3 = por %p11449_p13, %p11448_p8 }
  0x79   : > { %p11444_p4 = pneg %p11443_p9 }
  0x7b   : > { %p11451_p10 = pnand %p11450_p3, %p11444_p4 }
  0x7d   : > { %11454 = shalt.err (!%p11451_p10)
}
  0x7e   : > { %s11601_s24 = smov 512   ;;  %s11602_s9 = smov 32  }
  0x7f   : > { %9868 = dma.hbm_to_vmem [thread:$0]  (!%p12574_p12), %s12540_s3, 1024, %s11786_s19, [#allocation7], %s11601_s24, %s11601_s24, %s11602_s9  }
  0x80   : > { %s8819_s23 = sshll.u32 %s11713_s17, 8  ;;  %s9776_s26 = sshll.u32 %s11591_s27, 12 }
  0x81   : > { %s11834_s13 = scalar_lea.hbm %s12542_s5, %s9776_s26  ;;  %s292_s21 = scalar_lea.vmem [#allocation11], %s8819_s23 }
  0x82   : > { %s299_s30 = sshll.u32 %s292_s21, 4  ;;  %s11455_s15 = scalar_lea.hbm %s11834_s13, 4096  ;;  %s11836_s30 = int_to_ptr.vmem [resolvable:$true] %s299_s30 }
  0x83   : > { %p11456_p1 = scmp.ne.s32.totalorder %s11834_s13, %s11455_s15  ;;  %s11460_s20 = scalar_lea.hbm %s12542_s5, 8192 }
  0x84   : > { %p11461_p7 = scmp.lt.u32.totalorder %s11834_s13, %s12542_s5  ;;  %p11462_p2 = scmp.lt.u32.totalorder %s11460_s20, %s11455_s15 }
  0x85   : > { %p11458_p6 = pnand %p11456_p1, %p11762_p5  ;;  %p11464_p0 = scmp.lt.u32.totalorder %s11455_s15, %s11834_s13 }
  0x86   : > { %p11463_p11 = por %p11462_p2, %p11461_p7 }
  0x87   : > { %p11459_p12 = pneg %p11458_p6 }
  0x88   : > { %p11465_p9 = por %p11464_p0, %p11463_p11 }
  0x8a   : > { %p11466_p4 = pnand %p11465_p9, %p11459_p12 }
  0x8c   : > { %11469 = shalt.err (!%p11466_p4)
}
  0x8d   : > { %s11470_s9 = scalar_lea.vmem %s11836_s30, 4096  ;;  %s11603_s2 = smov [#allocation11]  }
  0x8e   : > { %p11471_p8 = scmp.ne.s32.totalorder %s11836_s30, %s11470_s9  ;;  %s11475_s4 = sshll.u32 %s11603_s2, 4  ;;  %s11476_s4 = int_to_ptr.vmem [resolvable:$false] %s11475_s4 }
  0x8f   : > { %s11477_s23 = scalar_lea.vmem %s11476_s4, 8192  ;;  %p11478_p10 = scmp.lt.s32.totalorder %s11836_s30, %s11476_s4 }
  0x90   : > { %p11473_p13 = pnand %p11471_p8, %p11762_p5  ;;  %p11479_p1 = scmp.lt.s32.totalorder %s11477_s23, %s11470_s9 }
  0x92   : > { %p11474_p3 = pneg %p11473_p13  ;;  %p11480_p6 = por %p11479_p1, %p11478_p10 }
  0x94   : > { %p11481_p7 = pnand %p11480_p6, %p11474_p3 }
  0x96   : > { %11484 = shalt.err (!%p11481_p7)
}
  0x97   : > { %s11604_s26 = smov 256   ;;  %s11605_s29 = smov 16  }
  0x98   : > { %p12575_p12 = scmp.ne.s32.totalorder %s12570_s22, 0  ;;  %s8822_s14 = sshll.u32 %s11713_s17, 5 }
  0x99   : > { %s9777_s21 = sshll.u32 %s11591_s27, 9  ;;  %s313_s20 = scalar_lea.vmem [#allocation12], %s8822_s14 }
  0x9a   : > { %9875 = dma.hbm_to_vmem [thread:$0]  (!%p12575_p12), %s11834_s13, 4096, %s11836_s30, %s11756_s10, %s11604_s26, %s11604_s26, %s11605_s29  }
  0x9b   : > { %s11865_s16 = scalar_lea.hbm %s12543_s6, %s9777_s21  ;;  %s321_s8 = sshll.u32 %s313_s20, 4  ;;  %s322_s8 = int_to_ptr.vmem [resolvable:$true] %s321_s8 }
  0x9c   : > { %s310_s24 = scalar_lea.sflag [#allocation13], %s11713_s17  ;;  %s11485_s9 = scalar_lea.hbm %s11865_s16, 512 }
  0x9d   : > { %p11486_p2 = scmp.ne.s32.totalorder %s11865_s16, %s11485_s9  ;;  %s11490_s13 = scalar_lea.hbm %s12543_s6, 1024 }
  0x9e   : > { %p11491_p9 = scmp.lt.u32.totalorder %s11865_s16, %s12543_s6  ;;  %p11492_p4 = scmp.lt.u32.totalorder %s11490_s13, %s11485_s9 }
  0x9f   : > { %p11488_p11 = pnand %p11486_p2, %p11762_p5  ;;  %p11494_p13 = scmp.lt.u32.totalorder %s11485_s9, %s11865_s16 }
  0xa0   : > { %p11493_p8 = por %p11492_p4, %p11491_p9 }
  0xa1   : > { %p11489_p0 = pneg %p11488_p11 }
  0xa2   : > { %p11495_p3 = por %p11494_p13, %p11493_p8 }
  0xa4   : > { %p11496_p10 = pnand %p11495_p3, %p11489_p0 }
  0xa6   : > { %11499 = shalt.err (!%p11496_p10)
}
  0xa7   : > { %s11500_s17 = scalar_lea.vmem %s322_s8, 512  ;;  %s11606_s4 = smov [#allocation12]  }
  0xa8   : > { %p11501_p1 = scmp.ne.s32.totalorder %s322_s8, %s11500_s17  ;;  %s11505_s23 = sshll.u32 %s11606_s4, 4  ;;  %s11506_s23 = int_to_ptr.vmem [resolvable:$false] %s11505_s23 }
  0xa9   : > { %s11507_s26 = scalar_lea.vmem %s11506_s23, 1024  ;;  %p11508_p2 = scmp.lt.s32.totalorder %s322_s8, %s11506_s23 }
  0xaa   : > { %p11503_p6 = pnand %p11501_p1, %p11762_p5  ;;  %p11509_p11 = scmp.lt.s32.totalorder %s11507_s26, %s11500_s17 }
  0xac   : > { %p11504_p7 = pneg %p11503_p6  ;;  %p11510_p12 = por %p11509_p11, %p11508_p2 }
  0xae   : > { %p11511_p4 = pnand %p11510_p12, %p11504_p7 }
  0xb0   : > { %11514 = shalt.err (!%p11511_p4)
}
  0xb1   : > { %p12576_p9 = scmp.ne.s32.totalorder %s12570_s22, 0  ;;  %p12577_p0 = scmp.ne.s32.totalorder %s12564_s12, 0 }
  0xb2   : > { %p12578_p8 = scmp.eq.s32.totalorder (!%p12577_p0), %s11669_s28, 0 }
  0xb3   : > { %9878 = dma.hbm_to_vmem [thread:$0]  (!%p12576_p9), %s11865_s16, 512, %s322_s8, %s310_s24  }
  0xb4   : > { %330 = sbr.rel (%p12577_p0) target bundleno = 7219 (0x1c33), region = 48 }
  0xbb   : > { %11558 = dma.done.wait (%p12578_p8), [#allocation4], 256   ;;  %p12579_p5 = pmov %p12578_p8 }
  0xbd   : > { %11560 = vsyncadd (%p12579_p5), [#allocation4], 4294967040  ;;  %p12580_p13 = pmov %p12579_p5 }
  0xbe   : > { %p12581_p3 = pmov %p12579_p5 }
  0xbf   : > { %11562 = dma.done.wait (%p12580_p13), [#allocation7], 78848  }
  0xc0   : > { %11564 = vsyncadd (%p12581_p3), [#allocation7], 4294888448  ;;  %s344_s22 = sand.u32 1, %s11669_s28   ;;  %s346_s18 = sand.u32 1, %s11583_s25  }
  0xc1   : > { %s9836_s29 = smul.u32 2304, %s346_s18  ;;  %s345_s12 = scalar_lea.sflag [#allocation10], %s344_s22 }
  0xc2   : > { %p12582_p12 = scmp.ne.s32.totalorder %s12563_s11, 0 }
  0xc3   : > { %s11897_s14 = scalar_lea.vmem [#allocation9], %s9836_s29 }
  0xc4   : > { %11566 = dma.done.wait (%p12582_p12), %s345_s12, 40960  }
  0xc5   : > { %11568 = vsyncadd (%p12582_p12), %s345_s12, 4294926336  ;;  %s8829_s21 = sshll.u32 %s346_s18, 8  ;;  %s8830_s15 = sshll.u32 %s346_s18, 5 }
  0xc6   : > { %s11903_s19 = scalar_lea.vmem [#allocation11], %s8829_s21  ;;  %s363_s16 = scalar_lea.sflag [#allocation13], %s346_s18 }
  0xc7   : > { %s11905_s20 = scalar_lea.vmem [#allocation12], %s8830_s15 }
  0xc8   : > { %11570 = dma.done.wait (%p12582_p12), %s363_s16, 512  }
  0xc9   : > { %11572 = vsyncadd (%p12582_p12), %s363_s16, 4294966784  ;;  %p12583_p10 = scmp.ne.s32.totalorder %s11669_s28, 0 }
  0xca   : > { %v9934_v0 = vld [vmem:[#allocation6 + $0x4] ss:$152 sps:$4 sm:$0xff] (!%p12583_p10)   ;;  %v9936_v1 = vld [vmem:[#allocation6] ss:$152 sps:$4 sm:$0xff] (!%p12583_p10)   ;;  %v9937_v2 = vld [vmem:[#allocation6 + $0x134] ss:$152 sps:$4 sm:$0xff] (!%p12583_p10)  }
  0xcb   : > { %406 = sbr.rel (%p12583_p10) target bundleno = 5485 (0x156d), region = 76  ;;  %989 = vmatprep.subr.bf16.mxu0 (!%p12583_p10), %v9934_v0  ;;  %v9939_v3 = vld [vmem:[#allocation6 + $0x130] ss:$152 sps:$4 sm:$0xff] (!%p12583_p10)   ;;  %v9940_v4 = vld [vmem:[#allocation6 + $0x264] ss:$152 sps:$4 sm:$0xff] (!%p12583_p10)   ;;  %vm1883_vm0 = vcmask (!%p12583_p10), 64512  }
  0xcc   : > { %990 = vmatpush1.bf16.msra.mxu0 (!%p12583_p10), %v9936_v1  ;;  %v9942_v5 = vld [vmem:[#allocation6 + $0x260] ss:$152 sps:$4 sm:$0xff] (!%p12583_p10)   ;;  %v9943_v6 = vld [vmem:[#allocation6 + $0x394] ss:$152 sps:$4 sm:$0xff] (!%p12583_p10)   ;;  %v9945_v7 = vld [vmem:[#allocation6 + $0x390] ss:$152 sps:$4 sm:$0xff] (!%p12583_p10)  }
  0xcd   : > { %991 = vmatprep.subr.bf16.mxu0 (!%p12583_p10), %v9937_v2  ;;  %v9946_v8 = vld [vmem:[#allocation6 + $0x4c4] ss:$152 sps:$4 sm:$0xff] (!%p12583_p10)   ;;  %v9948_v9 = vld [vmem:[#allocation6 + $0x4c0] ss:$152 sps:$4 sm:$0xff] (!%p12583_p10)   ;;  %v9949_v10 = vld [vmem:[#allocation6 + $0x5f4] ss:$152 sps:$4 sm:$0xff] (!%p12583_p10)  }
  0xce   : > { %v9951_v11 = vld [vmem:[#allocation6 + $0x5f0] ss:$152 sps:$4 sm:$0xff] (!%p12583_p10)   ;;  %v9952_v12 = vld [vmem:[#allocation6 + $0x724] ss:$152 sps:$4 sm:$0xff] (!%p12583_p10)   ;;  %v9954_v15 = vld [vmem:[#allocation6 + $0x720] ss:$152 sps:$4 sm:$0xff] (!%p12583_p10)  }
  0xcf   : > { %v408_v13 = vld [vmem:[#allocation3 + $0x8] sm:$0xff] (!%p12583_p10)  ;;  %v9955_v16 = vld [vmem:[#allocation6 + $0x854] ss:$152 sps:$4 sm:$0xff] (!%p12583_p10)   ;;  %v9957_v17 = vld [vmem:[#allocation6 + $0x850] ss:$152 sps:$4 sm:$0xff] (!%p12583_p10)  }
  0xd0   : > { %992 = vmatpush1.bf16.msra.mxu0 (!%p12583_p10), %v9939_v3  ;;  %v11913_v14 = vpack.c.bf16 (!%p12583_p10), %v408_v13, %v408_v13  ;;  %v9958_v18 = vld [vmem:[#allocation6 + $0x984] ss:$152 sps:$4 sm:$0xff] (!%p12583_p10)   ;;  %v9996_v20 = vld [vmem:[#allocation6 + $0x8] ss:$152 sps:$4 sm:$0xff] (!%p12583_p10)   ;;  %v10002_v23 = vld [vmem:[#allocation6 + $0x138] ss:$152 sps:$4 sm:$0xff] (!%p12583_p10)  }
  0xd1   : > { %993 = vmatprep.subr.bf16.mxu0 (!%p12583_p10), %v9940_v4  ;;  %v9994_v19 = vld [vmem:[#allocation6 + $0xc] ss:$152 sps:$4 sm:$0xff] (!%p12583_p10)   ;;  %v9960_v21 = vld [vmem:[#allocation6 + $0x980] ss:$152 sps:$4 sm:$0xff] (!%p12583_p10)   ;;  %v10000_v22 = vld [vmem:[#allocation6 + $0x13c] ss:$152 sps:$4 sm:$0xff] (!%p12583_p10)  }
  0xd2   : > { %1021 = vmatprep.mubr.bf16.mxu0 %v11913_v14  ;;  %1062 = vmatprep.mubr.bf16.mxu1 %v11913_v14  ;;  %v9961_v24 = vld [vmem:[#allocation6 + $0xab4] ss:$152 sps:$4 sm:$0xff]   ;;  %v9963_v26 = vld [vmem:[#allocation6 + $0xab0] ss:$152 sps:$4 sm:$0xff]   ;;  %v9964_v28 = vld [vmem:[#allocation6 + $0xbe4] ss:$152 sps:$4 sm:$0xff]  }
  0xd3   : > { %1030 = vmatprep.subr.bf16.mxu1 %v9994_v19  ;;  %v10006_v25 = vld [vmem:[#allocation6 + $0x26c] ss:$152 sps:$4 sm:$0xff]   ;;  %v10008_v27 = vld [vmem:[#allocation6 + $0x268] ss:$152 sps:$4 sm:$0xff]   ;;  %v10012_v29 = vld [vmem:[#allocation6 + $0x39c] ss:$152 sps:$4 sm:$0xff]  }
  0xd4   : > { %994 = vmatpush1.bf16.msra.mxu0 %v9942_v5  ;;  %1031 = vmatpush1.bf16.msra.mxu1 %v9996_v20  ;;  %v9966_v30 = vld [vmem:[#allocation6 + $0xbe0] ss:$152 sps:$4 sm:$0xff]   ;;  %v9967_v32 = vld [vmem:[#allocation6 + $0xd14] ss:$152 sps:$4 sm:$0xff]   ;;  %v9969_v34 = vld [vmem:[#allocation6 + $0xd10] ss:$152 sps:$4 sm:$0xff]  }
  0xd5   : > { %995 = vmatprep.subr.bf16.mxu0 %v9943_v6  ;;  %1032 = vmatprep.subr.bf16.mxu1 %v10000_v22  ;;  %v10014_v31 = vld [vmem:[#allocation6 + $0x398] ss:$152 sps:$4 sm:$0xff]   ;;  %v10018_v33 = vld [vmem:[#allocation6 + $0x4cc] ss:$152 sps:$4 sm:$0xff]   ;;  %v10020_v35 = vld [vmem:[#allocation6 + $0x4c8] ss:$152 sps:$4 sm:$0xff]  }
  0xd6   : > { %v9970_v36 = vld [vmem:[#allocation6 + $0xe44] ss:$152 sps:$4 sm:$0xff]   ;;  %v9972_v38 = vld [vmem:[#allocation6 + $0xe40] ss:$152 sps:$4 sm:$0xff]   ;;  %v9973_v40 = vld [vmem:[#allocation6 + $0xf74] ss:$152 sps:$4 sm:$0xff]  }
  0xd7   : > { %v10024_v37 = vld [vmem:[#allocation6 + $0x5fc] ss:$152 sps:$4 sm:$0xff]   ;;  %v10026_v39 = vld [vmem:[#allocation6 + $0x5f8] ss:$152 sps:$4 sm:$0xff]   ;;  %v10030_v41 = vld [vmem:[#allocation6 + $0x72c] ss:$152 sps:$4 sm:$0xff]  }
  0xd8   : > { %996 = vmatpush1.bf16.msra.mxu0 %v9945_v7  ;;  %1033 = vmatpush1.bf16.msra.mxu1 %v10002_v23  ;;  %v9975_v42 = vld [vmem:[#allocation6 + $0xf70] ss:$152 sps:$4 sm:$0xff]   ;;  %v9976_v44 = vld [vmem:[#allocation6 + $0x10a4] ss:$152 sps:$4 sm:$0xff]   ;;  %v9978_v46 = vld [vmem:[#allocation6 + $0x10a0] ss:$152 sps:$4 sm:$0xff]  }
  0xd9   : > { %997 = vmatprep.subr.bf16.mxu0 %v9946_v8  ;;  %1034 = vmatprep.subr.bf16.mxu1 %v10006_v25  ;;  %v10032_v43 = vld [vmem:[#allocation6 + $0x728] ss:$152 sps:$4 sm:$0xff]   ;;  %v10036_v45 = vld [vmem:[#allocation6 + $0x85c] ss:$152 sps:$4 sm:$0xff]   ;;  %v10038_v47 = vld [vmem:[#allocation6 + $0x858] ss:$152 sps:$4 sm:$0xff]  }
  0xda   : > { %v9979_v48 = vld [vmem:[#allocation6 + $0x11d4] ss:$152 sps:$4 sm:$0xff]   ;;  %v9981_v50 = vld [vmem:[#allocation6 + $0x11d0] ss:$152 sps:$4 sm:$0xff]   ;;  %v9987_v58 = vld [vmem:[#allocation6 + $0x144] ss:$152 sps:$4 sm:$0xff]  }
  0xdb   : > { %v10042_v49 = vld [vmem:[#allocation6 + $0x98c] ss:$152 sps:$4 sm:$0xff]   ;;  %v407_v51 = vld [vmem:[#allocation3] sm:$0xff]  ;;  %v10044_v52 = vld [vmem:[#allocation6 + $0x988] ss:$152 sps:$4 sm:$0xff]  }
  0xdc   : > { %998 = vmatpush1.bf16.msra.mxu0 %v9948_v9  ;;  %1035 = vmatpush1.bf16.msra.mxu1 %v10008_v27  ;;  %v9984_v53 = vld [vmem:[#allocation6 + $0x14] ss:$152 sps:$4 sm:$0xff]   ;;  %v11917_v55 = vpack.c.bf16 %v407_v51, %v407_v51  ;;  %v9982_v56 = vld [vmem:[#allocation6 + $0x10] ss:$152 sps:$4 sm:$0xff]   ;;  %v9985_v60 = vld [vmem:[#allocation6 + $0x140] ss:$152 sps:$4 sm:$0xff]  }
  0xdd   : > { %999 = vmatprep.subr.bf16.mxu0 %v9949_v10  ;;  %1036 = vmatprep.subr.bf16.mxu1 %v10012_v29  ;;  %v10048_v54 = vld [vmem:[#allocation6 + $0xabc] ss:$152 sps:$4 sm:$0xff]   ;;  %v10050_v57 = vld [vmem:[#allocation6 + $0xab8] ss:$152 sps:$4 sm:$0xff]   ;;  %v10054_v59 = vld [vmem:[#allocation6 + $0xbec] ss:$152 sps:$4 sm:$0xff]  }
  0xde   : > { %v10056_v61 = vld [vmem:[#allocation6 + $0xbe8] ss:$152 sps:$4 sm:$0xff]   ;;  %v9990_v62 = vld [vmem:[#allocation6 + $0x274] ss:$152 sps:$4 sm:$0xff]   ;;  %v10062_v1 = vld [vmem:[#allocation6 + $0xd18] ss:$152 sps:$4 sm:$0xff]  }
  0xdf   : > { %v10060_v63 = vld [vmem:[#allocation6 + $0xd1c] ss:$152 sps:$4 sm:$0xff]   ;;  %v9988_v0 = vld [vmem:[#allocation6 + $0x270] ss:$152 sps:$4 sm:$0xff]   ;;  %v10066_v3 = vld [vmem:[#allocation6 + $0xe4c] ss:$152 sps:$4 sm:$0xff]  }
  0xe0   : > { %1000 = vmatpush1.bf16.msra.mxu0 %v9951_v11  ;;  %1037 = vmatpush1.bf16.msra.mxu1 %v10014_v31  ;;  %v9993_v2 = vld [vmem:[#allocation6 + $0x3a4] ss:$152 sps:$4 sm:$0xff]   ;;  %v9991_v4 = vld [vmem:[#allocation6 + $0x3a0] ss:$152 sps:$4 sm:$0xff]   ;;  %v9999_v6 = vld [vmem:[#allocation6 + $0x4d4] ss:$152 sps:$4 sm:$0xff]  }
  0xe1   : > { %1001 = vmatprep.subr.bf16.mxu0 %v9952_v12  ;;  %1038 = vmatprep.subr.bf16.mxu1 %v10018_v33  ;;  %v10068_v5 = vld [vmem:[#allocation6 + $0xe48] ss:$152 sps:$4 sm:$0xff]   ;;  %v10072_v7 = vld [vmem:[#allocation6 + $0xf7c] ss:$152 sps:$4 sm:$0xff]   ;;  %v10074_v9 = vld [vmem:[#allocation6 + $0xf78] ss:$152 sps:$4 sm:$0xff]  }
  0xe2   : > { %v9997_v8 = vld [vmem:[#allocation6 + $0x4d0] ss:$152 sps:$4 sm:$0xff]   ;;  %v10005_v10 = vld [vmem:[#allocation6 + $0x604] ss:$152 sps:$4 sm:$0xff]   ;;  %v10003_v12 = vld [vmem:[#allocation6 + $0x600] ss:$152 sps:$4 sm:$0xff]  }
  0xe3   : > { %v10078_v11 = vld [vmem:[#allocation6 + $0x10ac] ss:$152 sps:$4 sm:$0xff]   ;;  %v10080_v13 = vld [vmem:[#allocation6 + $0x10a8] ss:$152 sps:$4 sm:$0xff]   ;;  %v10092_v20 = vld [vmem:[#allocation6 + $0x1c] ss:$152 sps:$4 sm:$0xff]  }
  0xe4   : > { %1002 = vmatpush1.bf16.msra.mxu0 %v9954_v15  ;;  %1039 = vmatpush1.bf16.msra.mxu1 %v10020_v35  ;;  %v10011_v15 = vld [vmem:[#allocation6 + $0x734] ss:$152 sps:$4 sm:$0xff]   ;;  %v10017_v19 = vld [vmem:[#allocation6 + $0x864] ss:$152 sps:$4 sm:$0xff]   ;;  %v10090_v22 = vld [vmem:[#allocation6 + $0x18] ss:$152 sps:$4 sm:$0xff]  }
  0xe5   : > { %1003 = vmatprep.subr.bf16.mxu0 %v9955_v16  ;;  %1040 = vmatprep.subr.bf16.mxu1 %v10024_v37  ;;  %v10084_v16 = vld [vmem:[#allocation6 + $0x11dc] ss:$152 sps:$4 sm:$0xff]   ;;  %v10021_v25 = vld [vmem:[#allocation6 + $0x990] ss:$152 sps:$4 sm:$0xff]   ;;  %v10027_v29 = vld [vmem:[#allocation6 + $0xac0] ss:$152 sps:$4 sm:$0xff]  }
  0xe6   : > { %v10023_v23 = vld [vmem:[#allocation6 + $0x994] ss:$152 sps:$4 sm:$0xff]   ;;  %v10029_v27 = vld [vmem:[#allocation6 + $0xac4] ss:$152 sps:$4 sm:$0xff]   ;;  %v10033_v33 = vld [vmem:[#allocation6 + $0xbf0] ss:$152 sps:$4 sm:$0xff]  }
  0xe7   : > { %v10035_v31 = vld [vmem:[#allocation6 + $0xbf4] ss:$152 sps:$4 sm:$0xff]   ;;  %v10108_v35 = vld [vmem:[#allocation6 + $0x3a8] ss:$152 sps:$4 sm:$0xff]  }
  0xe8   : > { %1004 = vmatpush1.bf16.msra.mxu0 %v9957_v17  ;;  %1041 = vmatpush1.bf16.msra.mxu1 %v10026_v39  ;;  %v10009_v17 = vld [vmem:[#allocation6 + $0x730] ss:$152 sps:$4 sm:$0xff]   ;;  %v10116_v37 = vld [vmem:[#allocation6 + $0x4dc] ss:$152 sps:$4 sm:$0xff]   ;;  %v10039_v39 = vld [vmem:[#allocation6 + $0xd20] ss:$152 sps:$4 sm:$0xff]  }
  0xe9   : > { %1005 = vmatprep.subr.bf16.mxu0 %v9958_v18  ;;  %1042 = vmatprep.subr.bf16.mxu1 %v10030_v41  ;;  %v10086_v18 = vld [vmem:[#allocation6 + $0x11d8] ss:$152 sps:$4 sm:$0xff]  }
  0xea   : > { %v10114_v41 = vld [vmem:[#allocation6 + $0x4d8] ss:$152 sps:$4 sm:$0xff]  }
  0xeb   : > { %v10057_v51 = vld [vmem:[#allocation6 + $0x10b0] ss:$152 sps:$4 sm:$0xff]  }
  0xec   : > { %1006 = vmatpush1.bf16.msra.mxu0 %v9960_v21  ;;  %1043 = vmatpush1.bf16.msra.mxu1 %v10032_v43  ;;  %v10015_v21 = vld [vmem:[#allocation6 + $0x860] ss:$152 sps:$4 sm:$0xff]   ;;  %v10045_v43 = vld [vmem:[#allocation6 + $0xe50] ss:$152 sps:$4 sm:$0xff]  }
  0xed   : > { %1007 = vmatprep.subr.bf16.mxu0 %v9961_v24  ;;  %1044 = vmatprep.subr.bf16.mxu1 %v10036_v45  ;;  %v10098_v24 = vld [vmem:[#allocation6 + $0x14c] ss:$152 sps:$4 sm:$0xff]   ;;  %v10120_v45 = vld [vmem:[#allocation6 + $0x608] ss:$152 sps:$4 sm:$0xff]  }
  0xf0   : > { %1008 = vmatpush1.bf16.msra.mxu0 %v9963_v26  ;;  %1045 = vmatpush1.bf16.msra.mxu1 %v10038_v47  ;;  %v10096_v26 = vld [vmem:[#allocation6 + $0x148] ss:$152 sps:$4 sm:$0xff]  }
  0xf1   : > { %1009 = vmatprep.subr.bf16.mxu0 %v9964_v28  ;;  %1046 = vmatprep.subr.bf16.mxu1 %v10042_v49  ;;  %v10104_v28 = vld [vmem:[#allocation6 + $0x27c] ss:$152 sps:$4 sm:$0xff]   ;;  %v10051_v47 = vld [vmem:[#allocation6 + $0xf80] ss:$152 sps:$4 sm:$0xff]  }
  0xf2   : > { %v10126_v49 = vld [vmem:[#allocation6 + $0x738] ss:$152 sps:$4 sm:$0xff]  }
  0xf4   : > { %1010 = vmatpush1.bf16.msra.mxu0 %v9966_v30  ;;  %1047 = vmatpush1.bf16.msra.mxu1 %v10044_v52  ;;  %v10102_v30 = vld [vmem:[#allocation6 + $0x278] ss:$152 sps:$4 sm:$0xff]   ;;  %v10065_v52 = vld [vmem:[#allocation6 + $0x11e4] ss:$152 sps:$4 sm:$0xff]  }
  0xf5   : > { %1011 = vmatprep.subr.bf16.mxu0 %v9967_v32  ;;  %1048 = vmatprep.subr.bf16.mxu1 %v10048_v54  ;;  %v10110_v32 = vld [vmem:[#allocation6 + $0x3ac] ss:$152 sps:$4 sm:$0xff]   ;;  %v10140_v54 = vld [vmem:[#allocation6 + $0x99c] ss:$152 sps:$4 sm:$0xff]  }
  0xf8   : > { %1012 = vmatpush1.bf16.msra.mxu0 %v9969_v34  ;;  %1049 = vmatpush1.bf16.msra.mxu1 %v10050_v57  ;;  %v10041_v34 = vld [vmem:[#allocation6 + $0xd24] ss:$152 sps:$4 sm:$0xff]  }
  0xf9   : > { %1013 = vmatprep.subr.bf16.mxu0 %v9970_v36  ;;  %1050 = vmatprep.subr.bf16.mxu1 %v10054_v59  ;;  %v410_v36 = vld [vmem:[%s12538_s1 + $0x8] sm:$0xff]  ;;  %v10146_v59 = vld [vmem:[#allocation6 + $0xacc] ss:$152 sps:$4 sm:$0xff]  }
  0xfa   : > { %v10071_v57 = vld [vmem:[#allocation6 + $0x24] ss:$152 sps:$4 sm:$0xff]  }
  0xfc   : > { %1014 = vmatpush1.bf16.msra.mxu0 %v9972_v38  ;;  %1051 = vmatpush1.bf16.msra.mxu1 %v10056_v61  ;;  %v11925_v38 = vpack.c.bf16 %v410_v36, %v410_v36  ;;  %v10077_v61 = vld [vmem:[#allocation6 + $0x154] ss:$152 sps:$4 sm:$0xff]   ;;  %v10180_v36 = vld [vmem:[#allocation6 + $0x288] ss:$152 sps:$4 sm:$0xff]  }
  0xfd   : > { %1015 = vmatprep.subr.bf16.mxu0 %v9973_v40  ;;  %1052 = vmatprep.subr.bf16.mxu1 %v10060_v63  ;;  %v10047_v40 = vld [vmem:[#allocation6 + $0xe54] ss:$152 sps:$4 sm:$0xff]  }
  0xfe   : > { %v10152_v63 = vld [vmem:[#allocation6 + $0xbfc] ss:$152 sps:$4 sm:$0xff]  }
 0x100   : > { %1016 = vmatpush1.bf16.msra.mxu0 %v9975_v42  ;;  %1053 = vmatpush1.bf16.msra.mxu1 %v10062_v1  ;;  %v10122_v42 = vld [vmem:[#allocation6 + $0x60c] ss:$152 sps:$4 sm:$0xff]   ;;  %v10150_v1 = vld [vmem:[#allocation6 + $0xbf8] ss:$152 sps:$4 sm:$0xff]  }
 0x101   : > { %1017 = vmatprep.subr.bf16.mxu0 %v9976_v44  ;;  %1054 = vmatprep.subr.bf16.mxu1 %v10066_v3  ;;  %v10053_v44 = vld [vmem:[#allocation6 + $0xf84] ss:$152 sps:$4 sm:$0xff]  }
 0x102   : > { %v10158_v3 = vld [vmem:[#allocation6 + $0xd2c] ss:$152 sps:$4 sm:$0xff]  }
 0x104   : > { %1018 = vmatpush1.bf16.msra.mxu0 %v9978_v46  ;;  %1055 = vmatpush1.bf16.msra.mxu1 %v10068_v5  ;;  %v10128_v46 = vld [vmem:[#allocation6 + $0x73c] ss:$152 sps:$4 sm:$0xff]   ;;  %v10156_v5 = vld [vmem:[#allocation6 + $0xd28] ss:$152 sps:$4 sm:$0xff]  }
 0x105   : > { %1019 = vmatprep.subr.bf16.mxu0 %v9979_v48  ;;  %1056 = vmatprep.subr.bf16.mxu1 %v10072_v7  ;;  %v10059_v48 = vld [vmem:[#allocation6 + $0x10b4] ss:$152 sps:$4 sm:$0xff]  }
 0x106   : > { %v10164_v7 = vld [vmem:[#allocation6 + $0xe5c] ss:$152 sps:$4 sm:$0xff]  }
 0x108   : > { %1020 = vmatpush1.bf16.msra.mxu0 %v9981_v50  ;;  %1057 = vmatpush1.bf16.msra.mxu1 %v10074_v9  ;;  %v10134_v50 = vld [vmem:[#allocation6 + $0x86c] ss:$152 sps:$4 sm:$0xff]   ;;  %v10162_v9 = vld [vmem:[#allocation6 + $0xe58] ss:$152 sps:$4 sm:$0xff]  }
 0x109   : > { %1071 = vmatprep.subr.bf16.mxu0 %v9984_v53  ;;  %1058 = vmatprep.subr.bf16.mxu1 %v10078_v11  ;;  %v10132_v53 = vld [vmem:[#allocation6 + $0x868] ss:$152 sps:$4 sm:$0xff]   ;;  %v10167_v11 = vld [vmem:[#allocation6 + $0xf8c] ss:$152 sps:$4 sm:$0xff]  }
 0x10b   : > { %1022 = vmatmul.mubr.bf16.vlgmr.msra.gmra.mrb[0].mxu0 %v11917_v55 }
 0x10c   : > { %1072 = vmatpush1.bf16.msra.mxu0 %v9982_v56  ;;  %1103 = vmatprep.mubr.bf16.mxu0 %v11913_v14  ;;  %v10063_v56 = vld [vmem:[#allocation6 + $0x11e0] ss:$152 sps:$4 sm:$0xff]  }
 0x10d   : > { %1073 = vmatprep.subr.bf16.mxu0 %v9987_v58  ;;  %1059 = vmatpush1.bf16.msra.mxu1 %v10080_v13  ;;  %v10138_v58 = vld [vmem:[#allocation6 + $0x998] ss:$152 sps:$4 sm:$0xff]   ;;  %v10165_v13 = vld [vmem:[#allocation6 + $0xf88] ss:$152 sps:$4 sm:$0xff]  }
 0x10e   : > { %1060 = vmatprep.subr.bf16.mxu1 %v10084_v16  ;;  %v10170_v16 = vld [vmem:[#allocation6 + $0x10bc] ss:$152 sps:$4 sm:$0xff]  }
 0x110   : > { %1074 = vmatpush1.bf16.msra.mxu0 %v9985_v60  ;;  %v10069_v60 = vld [vmem:[#allocation6 + $0x20] ss:$152 sps:$4 sm:$0xff]  }
 0x111   : > { %1075 = vmatprep.subr.bf16.mxu0 %v9990_v62  ;;  %1061 = vmatpush1.bf16.msra.mxu1 %v10086_v18  ;;  %v10144_v62 = vld [vmem:[#allocation6 + $0xac8] ss:$152 sps:$4 sm:$0xff]   ;;  %v10168_v18 = vld [vmem:[#allocation6 + $0x10b8] ss:$152 sps:$4 sm:$0xff]  }
 0x112   : > { %1690 = vmatprep.subr.bf16.mxu1 %v10092_v20  ;;  %v10173_v20 = vld [vmem:[#allocation6 + $0x11ec] ss:$152 sps:$4 sm:$0xff]  }
 0x114   : > { %1076 = vmatpush1.bf16.msra.mxu0 %v9988_v0  ;;  %1063 = vmatmul.mubr.bf16.vlgmr.msra.gmra.mrb[0].mxu1 %v11917_v55  ;;  %v10075_v0 = vld [vmem:[#allocation6 + $0x150] ss:$152 sps:$4 sm:$0xff]  }
 0x115   : > { %1077 = vmatprep.subr.bf16.mxu0 %v9993_v2  ;;  %1691 = vmatpush1.bf16.msra.mxu1 %v10090_v22  ;;  %v10083_v2 = vld [vmem:[#allocation6 + $0x284] ss:$152 sps:$4 sm:$0xff]   ;;  %v10171_v22 = vld [vmem:[#allocation6 + $0x11e8] ss:$152 sps:$4 sm:$0xff]  }
 0x116   : > { %1692 = vmatprep.subr.bf16.mxu1 %v10098_v24  ;;  %1722 = vmatprep.mubr.bf16.mxu1 %v11925_v38  ;;  %v10176_v24 = vld [vmem:[#allocation6 + $0x2c] ss:$152 sps:$4 sm:$0xff]  }
 0x118   : > { %1078 = vmatpush1.bf16.msra.mxu0 %v9991_v4  ;;  %v10081_v4 = vld [vmem:[#allocation6 + $0x280] ss:$152 sps:$4 sm:$0xff]  }
 0x119   : > { %1079 = vmatprep.subr.bf16.mxu0 %v9999_v6  ;;  %1693 = vmatpush1.bf16.msra.mxu1 %v10096_v26  ;;  %v10089_v6 = vld [vmem:[#allocation6 + $0x3b4] ss:$152 sps:$4 sm:$0xff]   ;;  %v10111_v26 = vld [vmem:[#allocation6 + $0x870] ss:$152 sps:$4 sm:$0xff]  }
 0x11a   : > { %1694 = vmatprep.subr.bf16.mxu1 %v10104_v28  ;;  %v10119_v28 = vld [vmem:[#allocation6 + $0x9a4] ss:$152 sps:$4 sm:$0xff]  }
 0x11c   : > { %1080 = vmatpush1.bf16.msra.mxu0 %v9997_v8  ;;  %v10087_v8 = vld [vmem:[#allocation6 + $0x3b0] ss:$152 sps:$4 sm:$0xff]  }
 0x11d   : > { %1081 = vmatprep.subr.bf16.mxu0 %v10005_v10  ;;  %1695 = vmatpush1.bf16.msra.mxu1 %v10102_v30  ;;  %v10095_v10 = vld [vmem:[#allocation6 + $0x4e4] ss:$152 sps:$4 sm:$0xff]  }
 0x11e   : > { %1696 = vmatprep.subr.bf16.mxu1 %v10110_v32  ;;  %v10177_v32 = vld [vmem:[#allocation6 + $0x158] ss:$152 sps:$4 sm:$0xff]  }
 0x120   : > { %1082 = vmatpush1.bf16.msra.mxu0 %v10003_v12  ;;  %v10093_v12 = vld [vmem:[#allocation6 + $0x4e0] ss:$152 sps:$4 sm:$0xff]  }
 0x121   : > { %1083 = vmatprep.subr.bf16.mxu0 %v10011_v15  ;;  %1697 = vmatpush1.bf16.msra.mxu1 %v10108_v35  ;;  %v10101_v15 = vld [vmem:[#allocation6 + $0x614] ss:$152 sps:$4 sm:$0xff]   ;;  %v10123_v35 = vld [vmem:[#allocation6 + $0xad0] ss:$152 sps:$4 sm:$0xff]  }
 0x122   : > { %1698 = vmatprep.subr.bf16.mxu1 %v10116_v37  ;;  %v10131_v37 = vld [vmem:[#allocation6 + $0xc04] ss:$152 sps:$4 sm:$0xff]  }
 0x124   : > { %1084 = vmatpush1.bf16.msra.mxu0 %v10009_v17  ;;  %v10099_v17 = vld [vmem:[#allocation6 + $0x610] ss:$152 sps:$4 sm:$0xff]  }
 0x125   : > { %1085 = vmatprep.subr.bf16.mxu0 %v10017_v19  ;;  %1699 = vmatpush1.bf16.msra.mxu1 %v10114_v41  ;;  %v10107_v19 = vld [vmem:[#allocation6 + $0x744] ss:$152 sps:$4 sm:$0xff]   ;;  %v10183_v41 = vld [vmem:[#allocation6 + $0x3b8] ss:$152 sps:$4 sm:$0xff]  }
 0x126   : > { %1700 = vmatprep.subr.bf16.mxu1 %v10122_v42  ;;  %v10137_v42 = vld [vmem:[#allocation6 + $0xd34] ss:$152 sps:$4 sm:$0xff]  }
 0x128   : > { %1086 = vmatpush1.bf16.msra.mxu0 %v10015_v21  ;;  %v10105_v21 = vld [vmem:[#allocation6 + $0x740] ss:$152 sps:$4 sm:$0xff]  }
 0x129   : > { %1087 = vmatprep.subr.bf16.mxu0 %v10023_v23  ;;  %1701 = vmatpush1.bf16.msra.mxu1 %v10120_v45  ;;  %v10113_v23 = vld [vmem:[#allocation6 + $0x874] ss:$152 sps:$4 sm:$0xff]   ;;  %v10186_v45 = vld [vmem:[#allocation6 + $0x4e8] ss:$152 sps:$4 sm:$0xff]  }
 0x12a   : > { %1702 = vmatprep.subr.bf16.mxu1 %v10128_v46  ;;  %v10143_v46 = vld [vmem:[#allocation6 + $0xe64] ss:$152 sps:$4 sm:$0xff]  }
 0x12c   : > { %1088 = vmatpush1.bf16.msra.mxu0 %v10021_v25  ;;  %v409_v25 = vld [vmem:[%s12538_s1] sm:$0xff] }
 0x12d   : > { %1089 = vmatprep.subr.bf16.mxu0 %v10029_v27  ;;  %1703 = vmatpush1.bf16.msra.mxu1 %v10126_v49  ;;  %v10174_v27 = vld [vmem:[#allocation6 + $0x28] ss:$152 sps:$4 sm:$0xff]   ;;  %v11933_v30 = vpack.c.bf16 %v409_v25, %v409_v25  ;;  %v10189_v49 = vld [vmem:[#allocation6 + $0x618] ss:$152 sps:$4 sm:$0xff]  }
 0x12e   : > { %1704 = vmatprep.subr.bf16.mxu1 %v10134_v50  ;;  %v10149_v50 = vld [vmem:[#allocation6 + $0xf94] ss:$152 sps:$4 sm:$0xff]  }
 0x130   : > { %1090 = vmatpush1.bf16.msra.mxu0 %v10027_v29  ;;  %v10179_v29 = vld [vmem:[#allocation6 + $0x15c] ss:$152 sps:$4 sm:$0xff]  }
 0x131   : > { %1091 = vmatprep.subr.bf16.mxu0 %v10035_v31  ;;  %1705 = vmatpush1.bf16.msra.mxu1 %v10132_v53  ;;  %v10117_v31 = vld [vmem:[#allocation6 + $0x9a0] ss:$152 sps:$4 sm:$0xff]  }
 0x132   : > { %1706 = vmatprep.subr.bf16.mxu1 %v10140_v54  ;;  %v10192_v53 = vld [vmem:[#allocation6 + $0x748] ss:$152 sps:$4 sm:$0xff]   ;;  %v10155_v54 = vld [vmem:[#allocation6 + $0x10c4] ss:$152 sps:$4 sm:$0xff]  }
 0x134   : > { %1092 = vmatpush1.bf16.msra.mxu0 %v10033_v33  ;;  %v10125_v33 = vld [vmem:[#allocation6 + $0xad4] ss:$152 sps:$4 sm:$0xff]  }
 0x135   : > { %1093 = vmatprep.subr.bf16.mxu0 %v10041_v34  ;;  %1707 = vmatpush1.bf16.msra.mxu1 %v10138_v58  ;;  %v10182_v34 = vld [vmem:[#allocation6 + $0x28c] ss:$152 sps:$4 sm:$0xff]   ;;  %v10195_v58 = vld [vmem:[#allocation6 + $0x878] ss:$152 sps:$4 sm:$0xff]  }
 0x136   : > { %1708 = vmatprep.subr.bf16.mxu1 %v10146_v59  ;;  %v10161_v59 = vld [vmem:[#allocation6 + $0x11f4] ss:$152 sps:$4 sm:$0xff]  }
 0x138   : > { %1094 = vmatpush1.bf16.msra.mxu0 %v10039_v39  ;;  %v10185_v39 = vld [vmem:[#allocation6 + $0x3bc] ss:$152 sps:$4 sm:$0xff]  }
 0x139   : > { %1095 = vmatprep.subr.bf16.mxu0 %v10047_v40  ;;  %1709 = vmatpush1.bf16.msra.mxu1 %v10144_v62  ;;  %v10129_v40 = vld [vmem:[#allocation6 + $0xc00] ss:$152 sps:$4 sm:$0xff]  }
 0x13a   : > { %1710 = vmatprep.subr.bf16.mxu1 %v10152_v63  ;;  %v10198_v62 = vld [vmem:[#allocation6 + $0x9a8] ss:$152 sps:$4 sm:$0xff]   ;;  %v10203_v63 = vld [vmem:[#allocation6 + $0xadc] ss:$152 sps:$4 sm:$0xff]  }
 0x13c   : > { %1096 = vmatpush1.bf16.msra.mxu0 %v10045_v43  ;;  %v10188_v43 = vld [vmem:[#allocation6 + $0x4ec] ss:$152 sps:$4 sm:$0xff]  }
 0x13d   : > { %1097 = vmatprep.subr.bf16.mxu0 %v10053_v44  ;;  %1711 = vmatpush1.bf16.msra.mxu1 %v10150_v1  ;;  %v10135_v44 = vld [vmem:[#allocation6 + $0xd30] ss:$152 sps:$4 sm:$0xff]   ;;  %v10206_v1 = vld [vmem:[#allocation6 + $0xc0c] ss:$152 sps:$4 sm:$0xff]  }
 0x13e   : > { %1712 = vmatprep.subr.bf16.mxu1 %v10158_v3  ;;  %v10209_v3 = vld [vmem:[#allocation6 + $0xd3c] ss:$152 sps:$4 sm:$0xff]  }
 0x140   : > { %1098 = vmatpush1.bf16.msra.mxu0 %v10051_v47  ;;  %v10191_v47 = vld [vmem:[#allocation6 + $0x61c] ss:$152 sps:$4 sm:$0xff]  }
 0x141   : > { %1099 = vmatprep.subr.bf16.mxu0 %v10059_v48  ;;  %1713 = vmatpush1.bf16.msra.mxu1 %v10156_v5  ;;  %v10141_v48 = vld [vmem:[#allocation6 + $0xe60] ss:$152 sps:$4 sm:$0xff]   ;;  %v10212_v5 = vld [vmem:[#allocation6 + $0xe6c] ss:$152 sps:$4 sm:$0xff]  }
 0x142   : > { %1714 = vmatprep.subr.bf16.mxu1 %v10164_v7  ;;  %v10215_v7 = vld [vmem:[#allocation6 + $0xf9c] ss:$152 sps:$4 sm:$0xff]  }
 0x144   : > { %1100 = vmatpush1.bf16.msra.mxu0 %v10057_v51  ;;  %v10194_v51 = vld [vmem:[#allocation6 + $0x74c] ss:$152 sps:$4 sm:$0xff]  }
 0x145   : > { %1101 = vmatprep.subr.bf16.mxu0 %v10065_v52  ;;  %1715 = vmatpush1.bf16.msra.mxu1 %v10162_v9  ;;  %v10147_v52 = vld [vmem:[#allocation6 + $0xf90] ss:$152 sps:$4 sm:$0xff]   ;;  %v10218_v9 = vld [vmem:[#allocation6 + $0x10cc] ss:$152 sps:$4 sm:$0xff]  }
 0x146   : > { %1716 = vmatprep.subr.bf16.mxu1 %v10167_v11  ;;  %v10221_v11 = vld [vmem:[#allocation6 + $0x11fc] ss:$152 sps:$4 sm:$0xff]  }
 0x148   : > { %1102 = vmatpush1.bf16.msra.mxu0 %v10063_v56  ;;  %v10197_v56 = vld [vmem:[#allocation6 + $0x87c] ss:$152 sps:$4 sm:$0xff]  }
 0x149   : > { %1731 = vmatprep.subr.bf16.mxu0 %v10071_v57  ;;  %1717 = vmatpush1.bf16.msra.mxu1 %v10165_v13  ;;  %v10153_v57 = vld [vmem:[#allocation6 + $0x10c0] ss:$152 sps:$4 sm:$0xff]  }
 0x14a   : > { %1718 = vmatprep.subr.bf16.mxu1 %v10170_v16 }
 0x14b   : > { %1104 = vmatmul.mubr.bf16.vlgmr.msra.gmra.mrb[4].mxu0 %v11917_v55 }
 0x14c   : > { %1732 = vmatpush1.bf16.msra.mxu0 %v10069_v60  ;;  %1763 = vmatprep.mubr.bf16.mxu0 %v11925_v38  ;;  %v10200_v60 = vld [vmem:[#allocation6 + $0x9ac] ss:$152 sps:$4 sm:$0xff]  }
 0x14d   : > { %1733 = vmatprep.subr.bf16.mxu0 %v10077_v61  ;;  %1719 = vmatpush1.bf16.msra.mxu1 %v10168_v18  ;;  %v10159_v61 = vld [vmem:[#allocation6 + $0x11f0] ss:$152 sps:$4 sm:$0xff]  }
 0x14e   : > { %1720 = vmatprep.subr.bf16.mxu1 %v10173_v20 }
 0x150   : > { %1734 = vmatpush1.bf16.msra.mxu0 %v10075_v0  ;;  %v10201_v0 = vld [vmem:[#allocation6 + $0xad8] ss:$152 sps:$4 sm:$0xff]  }
 0x151   : > { %1735 = vmatprep.subr.bf16.mxu0 %v10083_v2  ;;  %1721 = vmatpush1.bf16.msra.mxu1 %v10171_v22  ;;  %v10204_v2 = vld [vmem:[#allocation6 + $0xc08] ss:$152 sps:$4 sm:$0xff]  }
 0x152   : > { %1772 = vmatprep.subr.bf16.mxu1 %v10176_v24 }
 0x154   : > { %1736 = vmatpush1.bf16.msra.mxu0 %v10081_v4  ;;  %1723 = vmatmul.mubr.bf16.vlgmr.msra.gmra.mrb[4].mxu1 %v11933_v30  ;;  %v10207_v4 = vld [vmem:[#allocation6 + $0xd38] ss:$152 sps:$4 sm:$0xff]  }
 0x155   : > { %1737 = vmatprep.subr.bf16.mxu0 %v10089_v6  ;;  %1773 = vmatpush1.bf16.msra.mxu1 %v10174_v27  ;;  %v10210_v6 = vld [vmem:[#allocation6 + $0xe68] ss:$152 sps:$4 sm:$0xff]  }
 0x156   : > { %1774 = vmatprep.subr.bf16.mxu1 %v10179_v29  ;;  %1804 = vmatprep.mubr.bf16.mxu1 %v11925_v38 }
 0x158   : > { %1738 = vmatpush1.bf16.msra.mxu0 %v10087_v8  ;;  %v10213_v8 = vld [vmem:[#allocation6 + $0xf98] ss:$152 sps:$4 sm:$0xff]  }
 0x159   : > { %1739 = vmatprep.subr.bf16.mxu0 %v10095_v10  ;;  %1775 = vmatpush1.bf16.msra.mxu1 %v10177_v32  ;;  %v10216_v10 = vld [vmem:[#allocation6 + $0x10c8] ss:$152 sps:$4 sm:$0xff]  }
 0x15a   : > { %1776 = vmatprep.subr.bf16.mxu1 %v10182_v34 }
 0x15c   : > { %1740 = vmatpush1.bf16.msra.mxu0 %v10093_v12  ;;  %v10219_v12 = vld [vmem:[#allocation6 + $0x11f8] ss:$152 sps:$4 sm:$0xff]  }
 0x15d   : > { %1741 = vmatprep.subr.bf16.mxu0 %v10101_v15  ;;  %1777 = vmatpush1.bf16.msra.mxu1 %v10180_v36 }
 0x15e   : > { %1778 = vmatprep.subr.bf16.mxu1 %v10185_v39 }
 0x160   : > { %1742 = vmatpush1.bf16.msra.mxu0 %v10099_v17 }
 0x161   : > { %1743 = vmatprep.subr.bf16.mxu0 %v10107_v19  ;;  %1779 = vmatpush1.bf16.msra.mxu1 %v10183_v41 }
 0x162   : > { %1780 = vmatprep.subr.bf16.mxu1 %v10188_v43 }
 0x164   : > { %1744 = vmatpush1.bf16.msra.mxu0 %v10105_v21 }
 0x165   : > { %1745 = vmatprep.subr.bf16.mxu0 %v10113_v23  ;;  %1781 = vmatpush1.bf16.msra.mxu1 %v10186_v45 }
 0x166   : > { %1782 = vmatprep.subr.bf16.mxu1 %v10191_v47 }
 0x168   : > { %1746 = vmatpush1.bf16.msra.mxu0 %v10111_v26 }
 0x169   : > { %1747 = vmatprep.subr.bf16.mxu0 %v10119_v28  ;;  %1783 = vmatpush1.bf16.msra.mxu1 %v10189_v49  ;;  %v10222_v49 = vld [vmem:[#allocation6 + $0x30] ss:$152 sps:$4 sm:$0xff]  }
 0x16a   : > { %1784 = vmatprep.subr.bf16.mxu1 %v10194_v51  ;;  %v10227_v51 = vld [vmem:[#allocation6 + $0x164] ss:$152 sps:$4 sm:$0xff]  }
 0x16c   : > { %1748 = vmatpush1.bf16.msra.mxu0 %v10117_v31 }
 0x16d   : > { %1749 = vmatprep.subr.bf16.mxu0 %v10125_v33  ;;  %1785 = vmatpush1.bf16.msra.mxu1 %v10192_v53  ;;  %v10230_v53 = vld [vmem:[#allocation6 + $0x294] ss:$152 sps:$4 sm:$0xff]  }
 0x16e   : > { %1786 = vmatprep.subr.bf16.mxu1 %v10197_v56  ;;  %v10233_v56 = vld [vmem:[#allocation6 + $0x3c4] ss:$152 sps:$4 sm:$0xff]  }
 0x170   : > { %1750 = vmatpush1.bf16.msra.mxu0 %v10123_v35 }
 0x171   : > { %1751 = vmatprep.subr.bf16.mxu0 %v10131_v37  ;;  %1787 = vmatpush1.bf16.msra.mxu1 %v10195_v58  ;;  %v10236_v58 = vld [vmem:[#allocation6 + $0x4f4] ss:$152 sps:$4 sm:$0xff]  }
 0x172   : > { %1788 = vmatprep.subr.bf16.mxu1 %v10200_v60  ;;  %v10239_v60 = vld [vmem:[#allocation6 + $0x624] ss:$152 sps:$4 sm:$0xff]  }
 0x174   : > { %1752 = vmatpush1.bf16.msra.mxu0 %v10129_v40 }
 0x175   : > { %1753 = vmatprep.subr.bf16.mxu0 %v10137_v42  ;;  %1789 = vmatpush1.bf16.msra.mxu1 %v10198_v62  ;;  %v10242_v62 = vld [vmem:[#allocation6 + $0x754] ss:$152 sps:$4 sm:$0xff]  }
 0x176   : > { %1790 = vmatprep.subr.bf16.mxu1 %v10203_v63  ;;  %v10240_v63 = vld [vmem:[#allocation6 + $0x750] ss:$152 sps:$4 sm:$0xff]  }
 0x178   : > { %1754 = vmatpush1.bf16.msra.mxu0 %v10135_v44 }
 0x179   : > { %1755 = vmatprep.subr.bf16.mxu0 %v10143_v46  ;;  %1791 = vmatpush1.bf16.msra.mxu1 %v10201_v0  ;;  %v10245_v0 = vld [vmem:[#allocation6 + $0x884] ss:$152 sps:$4 sm:$0xff]  }
 0x17a   : > { %1792 = vmatprep.subr.bf16.mxu1 %v10206_v1  ;;  %v10243_v1 = vld [vmem:[#allocation6 + $0x880] ss:$152 sps:$4 sm:$0xff]  }
 0x17c   : > { %1756 = vmatpush1.bf16.msra.mxu0 %v10141_v48  ;;  %v11607_v48 = vmov 0.0  }
 0x17d   : > { %1757 = vmatprep.subr.bf16.mxu0 %v10149_v50  ;;  %1793 = vmatpush1.bf16.msra.mxu1 %v10204_v2  ;;  %v10224_v50 = vld [vmem:[#allocation6 + $0x34] ss:$152 sps:$4 sm:$0xff]  }
 0x17e   : > { %1794 = vmatprep.subr.bf16.mxu1 %v10209_v3  ;;  %v10248_v2 = vld [vmem:[#allocation6 + $0x9b4] ss:$152 sps:$4 sm:$0xff]   ;;  %v10246_v3 = vld [vmem:[#allocation6 + $0x9b0] ss:$152 sps:$4 sm:$0xff]  }
 0x180   : > { %1758 = vmatpush1.bf16.msra.mxu0 %v10147_v52  ;;  %v10225_v52 = vld [vmem:[#allocation6 + $0x160] ss:$152 sps:$4 sm:$0xff]  }
 0x181   : > { %1759 = vmatprep.subr.bf16.mxu0 %v10155_v54  ;;  %1795 = vmatpush1.bf16.msra.mxu1 %v10207_v4  ;;  %v10228_v54 = vld [vmem:[#allocation6 + $0x290] ss:$152 sps:$4 sm:$0xff]   ;;  %v10251_v4 = vld [vmem:[#allocation6 + $0xae4] ss:$152 sps:$4 sm:$0xff]  }
 0x182   : > { %1796 = vmatprep.subr.bf16.mxu1 %v10212_v5  ;;  %v10249_v5 = vld [vmem:[#allocation6 + $0xae0] ss:$152 sps:$4 sm:$0xff]  }
 0x184   : > { %1760 = vmatpush1.bf16.msra.mxu0 %v10153_v57  ;;  %v10231_v57 = vld [vmem:[#allocation6 + $0x3c0] ss:$152 sps:$4 sm:$0xff]  }
 0x185   : > { %1761 = vmatprep.subr.bf16.mxu0 %v10161_v59  ;;  %1797 = vmatpush1.bf16.msra.mxu1 %v10210_v6  ;;  %v10234_v59 = vld [vmem:[#allocation6 + $0x4f0] ss:$152 sps:$4 sm:$0xff]   ;;  %v10254_v6 = vld [vmem:[#allocation6 + $0xc14] ss:$152 sps:$4 sm:$0xff]  }
 0x186   : > { %1798 = vmatprep.subr.bf16.mxu1 %v10215_v7  ;;  %v10252_v7 = vld [vmem:[#allocation6 + $0xc10] ss:$152 sps:$4 sm:$0xff]  }
 0x188   : > { %1762 = vmatpush1.bf16.msra.mxu0 %v10159_v61  ;;  %v10237_v61 = vld [vmem:[#allocation6 + $0x620] ss:$152 sps:$4 sm:$0xff]  }
 0x189   : > { %1799 = vmatpush1.bf16.msra.mxu1 %v10213_v8  ;;  %2330 = vmatprep.subr.bf16.mxu0 %v10224_v50  ;;  %v10257_v8 = vld [vmem:[#allocation6 + $0xd44] ss:$152 sps:$4 sm:$0xff]   ;;  %v10302_v50 = vld [vmem:[#allocation6 + $0x634] ss:$152 sps:$4 sm:$0xff]  }
 0x18a   : > { %1800 = vmatprep.subr.bf16.mxu1 %v10218_v9  ;;  %v10255_v9 = vld [vmem:[#allocation6 + $0xd40] ss:$152 sps:$4 sm:$0xff]  }
 0x18b   : > { %1764 = vmatmul.mubr.bf16.vlgmr.msra.gmra.mrb[8].mxu0 %v11933_v30 }
 0x18c   : > { %2331 = vmatpush1.bf16.msra.mxu0 %v10222_v49  ;;  %v10294_v49 = vld [vmem:[#allocation6 + $0x500] ss:$152 sps:$4 sm:$0xff]  }
 0x18d   : > { %1801 = vmatpush1.bf16.msra.mxu1 %v10216_v10  ;;  %2332 = vmatprep.subr.bf16.mxu0 %v10227_v51  ;;  %v10260_v10 = vld [vmem:[#allocation6 + $0xe74] ss:$152 sps:$4 sm:$0xff]  }
 0x18e   : > { %1802 = vmatprep.subr.bf16.mxu1 %v10221_v11  ;;  %v10258_v11 = vld [vmem:[#allocation6 + $0xe70] ss:$152 sps:$4 sm:$0xff]  }
 0x190   : > { %2333 = vmatpush1.bf16.msra.mxu0 %v10225_v52  ;;  %v11979_v52 = vld [vmem:[#allocation8] ss:$8 sm:$0x3] }
 0x191   : > { %1803 = vmatpush1.bf16.msra.mxu1 %v10219_v12  ;;  %2334 = vmatprep.subr.bf16.mxu0 %v10230_v53  ;;  %v10263_v12 = vld [vmem:[#allocation6 + $0xfa4] ss:$152 sps:$4 sm:$0xff]   ;;  %v10300_v53 = vld [vmem:[#allocation6 + $0x630] ss:$152 sps:$4 sm:$0xff]  }
 0x194   : > { %1805 = vmatmul.mubr.bf16.vlgmr.msra.gmra.mrb[8].mxu1 %v11933_v30  ;;  %2335 = vmatpush1.bf16.msra.mxu0 %v10228_v54  ;;  %v10308_v54 = vld [vmem:[#allocation6 + $0x764] ss:$152 sps:$4 sm:$0xff]  }
 0x195   : > { %2336 = vmatprep.subr.bf16.mxu0 %v10233_v56 }
 0x198   : > { %2337 = vmatpush1.bf16.msra.mxu0 %v10231_v57  ;;  %v10306_v57 = vld [vmem:[#allocation6 + $0x760] ss:$152 sps:$4 sm:$0xff]  }
 0x199   : > { %2338 = vmatprep.subr.bf16.mxu0 %v10236_v58 }
 0x19c   : > { %2339 = vmatpush1.bf16.msra.mxu0 %v10234_v59  ;;  %v10314_v59 = vld [vmem:[#allocation6 + $0x894] ss:$152 sps:$4 sm:$0xff]  }
 0x19d   : > { %2340 = vmatprep.subr.bf16.mxu0 %v10239_v60 }
 0x1a0   : > { %2341 = vmatpush1.bf16.msra.mxu0 %v10237_v61 }
 0x1a1   : > { %2342 = vmatprep.subr.bf16.mxu0 %v10242_v62 }
 0x1a4   : > { %2343 = vmatpush1.bf16.msra.mxu0 %v10240_v63  ;;  %v10312_v63 = vld [vmem:[#allocation6 + $0x890] ss:$152 sps:$4 sm:$0xff]  }
 0x1a5   : > { %2344 = vmatprep.subr.bf16.mxu0 %v10245_v0 }
 0x1a8   : > { %2345 = vmatpush1.bf16.msra.mxu0 %v10243_v1  ;;  %v10320_v1 = vld [vmem:[#allocation6 + $0x9c4] ss:$152 sps:$4 sm:$0xff]  }
 0x1a9   : > { %2346 = vmatprep.subr.bf16.mxu0 %v10248_v2  ;;  %v10318_v2 = vld [vmem:[#allocation6 + $0x9c0] ss:$152 sps:$4 sm:$0xff]  }
 0x1ac   : > { %2347 = vmatpush1.bf16.msra.mxu0 %v10246_v3  ;;  %v10326_v3 = vld [vmem:[#allocation6 + $0xaf4] ss:$152 sps:$4 sm:$0xff]  }
 0x1ad   : > { %2348 = vmatprep.subr.bf16.mxu0 %v10251_v4  ;;  %v10324_v4 = vld [vmem:[#allocation6 + $0xaf0] ss:$152 sps:$4 sm:$0xff]  }
 0x1b0   : > { %2349 = vmatpush1.bf16.msra.mxu0 %v10249_v5  ;;  %v10332_v5 = vld [vmem:[#allocation6 + $0xc24] ss:$152 sps:$4 sm:$0xff]  }
 0x1b1   : > { %2350 = vmatprep.subr.bf16.mxu0 %v10254_v6  ;;  %v10330_v6 = vld [vmem:[#allocation6 + $0xc20] ss:$152 sps:$4 sm:$0xff]  }
 0x1b4   : > { %2351 = vmatpush1.bf16.msra.mxu0 %v10252_v7  ;;  %v10338_v7 = vld [vmem:[#allocation6 + $0xd54] ss:$152 sps:$4 sm:$0xff]  }
 0x1b5   : > { %2352 = vmatprep.subr.bf16.mxu0 %v10257_v8  ;;  %v10336_v8 = vld [vmem:[#allocation6 + $0xd50] ss:$152 sps:$4 sm:$0xff]  }
 0x1b8   : > { %2353 = vmatpush1.bf16.msra.mxu0 %v10255_v9  ;;  %v10344_v9 = vld [vmem:[#allocation6 + $0xe84] ss:$152 sps:$4 sm:$0xff]  }
 0x1b9   : > { %2354 = vmatprep.subr.bf16.mxu0 %v10260_v10  ;;  %v10342_v10 = vld [vmem:[#allocation6 + $0xe80] ss:$152 sps:$4 sm:$0xff]  }
 0x1bc   : > { %2355 = vmatpush1.bf16.msra.mxu0 %v10258_v11  ;;  %v10350_v11 = vld [vmem:[#allocation6 + $0xfb4] ss:$152 sps:$4 sm:$0xff]  }
 0x1bd   : > { %2356 = vmatprep.subr.bf16.mxu0 %v10263_v12  ;;  %v10348_v12 = vld [vmem:[#allocation6 + $0xfb0] ss:$152 sps:$4 sm:$0xff]  }
 0x1de   : > { %v1023_v13 = vpop.f32.mrb[0].mxu0 }
 0x1df   : > { %v1025_v15 = vpop.f32.mrb[1].mxu0 }
 0x1e0   : > { %v1027_v16 = vpop.f32.mrb[2].mxu0  ;;  %1877 = vmatprep.mubr.f32.mxu1 %v1025_v15  ;;  %v10266_v15 = vld [vmem:[#allocation6 + $0x10d4] ss:$152 sps:$4 sm:$0xff]  }
 0x1e1   : > { %v1028_v17 = vpop.f32.mrb[3].mxu0  ;;  %v10264_v16 = vld [vmem:[#allocation6 + $0x10d0] ss:$152 sps:$4 sm:$0xff]  }
 0x1e7   : > { %v11939_v18 = vpop.f32.mrb[0].mxu1 }
 0x1e8   : > { %v1066_v19 = vpop.f32.mrb[1].mxu1 }
 0x1e9   : > { %v1068_v20 = vpop.f32.mrb[2].mxu1 }
 0x1ea   : > { %v1069_v21 = vpop.f32.mrb[3].mxu1 }
 0x1eb   : > { %v10269_v21 = vld [vmem:[#allocation6 + $0x1204] ss:$152 sps:$4 sm:$0xff]  }
 0x21e   : > { %v11941_v22 = vpop.f32.mrb[4].mxu0 }
 0x21f   : > { %v11943_v23 = vpop.f32.mrb[5].mxu0 }
 0x220   : > { %v1109_v24 = vpop.f32.mrb[6].mxu0 }
 0x221   : > { %v1110_v25 = vpop.f32.mrb[7].mxu0  ;;  %v10267_v24 = vld [vmem:[#allocation6 + $0x1200] ss:$152 sps:$4 sm:$0xff]  }
 0x227   : > { %v11945_v26 = vpop.f32.mrb[4].mxu1 }
 0x228   : > { %v11947_v27 = vpop.f32.mrb[5].mxu1 }
 0x229   : > { %v1728_v28 = vpop.f32.mrb[6].mxu1 }
 0x22a   : > { %v1729_v29 = vpop.f32.mrb[7].mxu1 }
 0x25e   : > { %v1765_v31 = vpop.f32.mrb[8].mxu0 }
 0x25f   : > { %v1767_v32 = vpop.f32.mrb[9].mxu0 }
 0x260   : > { %v1769_v33 = vpop.f32.mrb[10].mxu0  ;;  %1813 = vmatprep.subr.mxu1 %v1767_v32 }
 0x261   : > { %v1770_v34 = vpop.f32.mrb[11].mxu0  ;;  %1814 = vmatpush1.xpose.msra.mxu1 %v1765_v31 }
 0x264   : > { %1878 = vmatmul.mubr.f32.vlgmr.msra.gmra.mrb[12].mxu1 %v1023_v13  ;;  %v10261_v13 = vld [vmem:[#allocation6 + $0xfa0] ss:$152 sps:$4 sm:$0xff]  }
 0x265   : > { %1962 = vmatprep.mubr.f32.mxu1 %v11607_v48  ;;  %2357 = vmatpush1.bf16.msra.mxu0 %v10261_v13  ;;  %v10356_v13 = vld [vmem:[#allocation6 + $0x10e4] ss:$152 sps:$4 sm:$0xff]  }
 0x266   : > { %2358 = vmatprep.subr.bf16.mxu0 %v10266_v15  ;;  %v10354_v15 = vld [vmem:[#allocation6 + $0x10e0] ss:$152 sps:$4 sm:$0xff]  }
 0x267   : > { %v1806_v35 = vpop.f32.mrb[8].mxu1 }
 0x268   : > { %v1808_v36 = vpop.f32.mrb[9].mxu1 }
 0x269   : > { %1898 = vmatprep.subr.mxu1 %v1808_v36  ;;  %v1810_v37 = vpop.f32.mrb[10].mxu1  ;;  %2359 = vmatpush1.bf16.msra.mxu0 %v10264_v16  ;;  %v10272_v36 = vld [vmem:[#allocation6 + $0x44] ss:$152 sps:$4 sm:$0xff]  }
 0x26a   : > { %1899 = vmatpush1.msra.mxu1 %v1806_v35  ;;  %v1811_v39 = vpop.f32.mrb[11].mxu1  ;;  %2360 = vmatprep.subr.bf16.mxu0 %v10269_v21  ;;  %v10270_v35 = vld [vmem:[#allocation6 + $0x40] ss:$152 sps:$4 sm:$0xff]   ;;  %v10275_v37 = vld [vmem:[#allocation6 + $0x3c] ss:$152 sps:$4 sm:$0xff]  }
 0x26b   : > { %1969 = vmatprep.subr.mxu1 %v1066_v19  ;;  %v10278_v39 = vld [vmem:[#allocation6 + $0x174] ss:$152 sps:$4 sm:$0xff]  }
 0x26c   : > { %v10281_v21 = vld [vmem:[#allocation6 + $0x16c] ss:$152 sps:$4 sm:$0xff]  }
 0x26d   : > { %2361 = vmatpush1.bf16.msra.mxu0 %v10267_v24  ;;  %v10279_v24 = vld [vmem:[#allocation6 + $0x168] ss:$152 sps:$4 sm:$0xff]  }
 0x26e   : > { %2821 = vmatprep.subr.bf16.mxu0 %v10272_v36  ;;  %v10315_v36 = vld [vmem:[#allocation6 + $0x888] ss:$152 sps:$4 sm:$0xff]  }
 0x337   : > { %v1879_v40 = vpop.f32.mrb[12].mxu1 }
 0x338   : > { %v1881_v41 = vpop.f32.mrb[13].mxu1  ;;  %v1884_v42 = vsel %vm1883_vm0, %v1879_v40, -inf }
 0x339   : > { %1885 = vmax.xlane.f32.xlu0 %v1884_v42  ;;  %v10284_v41 = vld [vmem:[#allocation6 + $0x2a4] ss:$152 sps:$4 sm:$0xff]   ;;  %v10282_v42 = vld [vmem:[#allocation6 + $0x2a0] ss:$152 sps:$4 sm:$0xff]  }
 0x3c6   : > { %v1886_v43 = vpop.xlane.xlu0 %1885 }
 0x3c7   : > { %v1887_v44 = vsub.f32 %v1879_v40, %v1886_v43  ;;  %v10276_v40 = vld [vmem:[#allocation6 + $0x170] ss:$152 sps:$4 sm:$0xff]   ;;  %v10290_v43 = vld [vmem:[#allocation6 + $0x3d4] ss:$152 sps:$4 sm:$0xff]  }
 0x3c9   : > { %v1888_v45 = vmul.f32 1.442695, %v1887_v44  ;;  %v2160_v44 = vlaneseq }
 0x3cb   : > { %10846 = vpow2.f32 %v1888_v45  ;;  %v10288_v45 = vld [vmem:[#allocation6 + $0x3d0] ss:$152 sps:$4 sm:$0xff]  }
 0x3d5   : > { %v11950_v46 = vpop.eup %10846 }
 0x3d6   : > { %v1890_v47 = vsel %vm1883_vm0, %v11950_v46, 0.0 }
 0x3d7   : > { %1891 = vadd.xlane.f32.xlu0 %v1890_v47  ;;  %v11974_v47 = vshrl.u32 %v2160_v44, 7  ;;  %v10341_v44 = vld [vmem:[#allocation6 + $0xd4c] ss:$152 sps:$4 sm:$0xff]  }
 0x3d9   : > { %v11977_v51 = vsub.s32 0, %v11974_v47 }
 0x3db   : > { %v2163_v56 = vrot.slane %v11979_v52, %v11977_v51 }
 0x464   : > { %v1892_v17 = vpop.xlane.xlu0 %1891 }
 0x465   : > { %10848 = vrcp.f32 %v1892_v17 }
 0x46f   : > { %v10849_v19 = vpop.eup %10848 }
 0x470   : > { %v1894_v20 = vmul.f32 %v10849_v19, %v11950_v46  ;;  %v10296_v46 = vld [vmem:[#allocation6 + $0x504] ss:$152 sps:$4 sm:$0xff]   ;;  %v10273_v19 = vld [vmem:[#allocation6 + $0x38] ss:$152 sps:$4 sm:$0xff]  }
 0x472   : > { %9024 = vmatmul.mubr.msk.f32.vlgmr.msra.gmra.mrb[14].mxu1 %vm1883_vm0, %v1894_v20 }
 0x473   : > { %1970 = vmatpush1.xpose.msra.mxu1 %v11939_v18  ;;  %2033 = vmatprep.mubr.f32.mxu1 %v11947_v27 }
 0x474   : > { %2053 = vmatprep.subr.mxu1 %v11943_v23 }
 0x476   : > { %2034 = vmatmul.mubr.f32.vlgmr.msra.gmra.mrb[16].mxu1 %v11945_v26 }
 0x477   : > { %2054 = vmatpush1.msra.mxu1 %v11941_v22  ;;  %2117 = vmatprep.mubr.f32.mxu1 %v11607_v48 }
 0x478   : > { %2780 = vmatprep.subr.bf16.mxu1 %v10275_v37  ;;  %v10323_v37 = vld [vmem:[#allocation6 + $0x9bc] ss:$152 sps:$4 sm:$0xff]  }
 0x545   : > { %v1964_v25 = vpop.f32.mrb[14].mxu1 }
 0x546   : > { %v1966_v28 = vpop.f32.mrb[15].mxu1  ;;  %v11965_v31 = vpack.c.bf16 %v1964_v25, %v1964_v25  ;;  %v10287_v25 = vld [vmem:[#allocation6 + $0x29c] ss:$152 sps:$4 sm:$0xff]  }
 0x547   : > { %v11963_v29 = vpack.c.bf16 %v1966_v28, %v1966_v28  ;;  %v10285_v28 = vld [vmem:[#allocation6 + $0x298] ss:$152 sps:$4 sm:$0xff]  }
 0x549   : > { %v2035_v18 = vpop.f32.mrb[16].mxu1  ;;  %2362 = vmatprep.mubr.bf16.mxu0 %v11963_v29 }
 0x54a   : > { %v2037_v23 = vpop.f32.mrb[17].mxu1  ;;  %2363 = vmatmul.mubr.bf16.vlgmr.msra.gmra.mrb[12].mxu0 %v11965_v31  ;;  %v2039_v22 = vsel %vm1883_vm0, %v2035_v18, -inf }
 0x54b   : > { %2040 = vmax.xlane.f32.xlu1 %v2039_v22  ;;  %2822 = vmatpush1.bf16.msra.mxu0 %v10270_v35  ;;  %v10291_v23 = vld [vmem:[#allocation6 + $0x3c8] ss:$152 sps:$4 sm:$0xff]   ;;  %v10299_v22 = vld [vmem:[#allocation6 + $0x4fc] ss:$152 sps:$4 sm:$0xff]   ;;  %v10317_v35 = vld [vmem:[#allocation6 + $0x88c] ss:$152 sps:$4 sm:$0xff]  }
 0x54c   : > { %2823 = vmatprep.subr.bf16.mxu0 %v10278_v39  ;;  %v10321_v39 = vld [vmem:[#allocation6 + $0x9b8] ss:$152 sps:$4 sm:$0xff]  }
 0x54f   : > { %2824 = vmatpush1.bf16.msra.mxu0 %v10276_v40  ;;  %v10329_v40 = vld [vmem:[#allocation6 + $0xaec] ss:$152 sps:$4 sm:$0xff]  }
 0x550   : > { %2825 = vmatprep.subr.bf16.mxu0 %v10284_v41  ;;  %v10327_v41 = vld [vmem:[#allocation6 + $0xae8] ss:$152 sps:$4 sm:$0xff]  }
 0x553   : > { %2826 = vmatpush1.bf16.msra.mxu0 %v10282_v42  ;;  %v10335_v42 = vld [vmem:[#allocation6 + $0xc1c] ss:$152 sps:$4 sm:$0xff]  }
 0x554   : > { %2827 = vmatprep.subr.bf16.mxu0 %v10290_v43  ;;  %v10333_v43 = vld [vmem:[#allocation6 + $0xc18] ss:$152 sps:$4 sm:$0xff]  }
 0x557   : > { %2828 = vmatpush1.bf16.msra.mxu0 %v10288_v45  ;;  %v10339_v45 = vld [vmem:[#allocation6 + $0xd48] ss:$152 sps:$4 sm:$0xff]  }
 0x558   : > { %2829 = vmatprep.subr.bf16.mxu0 %v10296_v46  ;;  %v10347_v46 = vld [vmem:[#allocation6 + $0xe7c] ss:$152 sps:$4 sm:$0xff]  }
 0x55b   : > { %2830 = vmatpush1.bf16.msra.mxu0 %v10294_v49  ;;  %v10345_v49 = vld [vmem:[#allocation6 + $0xe78] ss:$152 sps:$4 sm:$0xff]  }
 0x55c   : > { %2831 = vmatprep.subr.bf16.mxu0 %v10302_v50  ;;  %v10353_v50 = vld [vmem:[#allocation6 + $0xfac] ss:$152 sps:$4 sm:$0xff]  }
 0x55f   : > { %2832 = vmatpush1.bf16.msra.mxu0 %v10300_v53  ;;  %v10351_v53 = vld [vmem:[#allocation6 + $0xfa8] ss:$152 sps:$4 sm:$0xff]  }
 0x560   : > { %2833 = vmatprep.subr.bf16.mxu0 %v10308_v54  ;;  %v10359_v54 = vld [vmem:[#allocation6 + $0x10dc] ss:$152 sps:$4 sm:$0xff]  }
 0x563   : > { %2834 = vmatpush1.bf16.msra.mxu0 %v10306_v57  ;;  %v10362_v57 = vld [vmem:[#allocation6 + $0x1214] ss:$152 sps:$4 sm:$0xff]  }
 0x564   : > { %2835 = vmatprep.subr.bf16.mxu0 %v10314_v59  ;;  %v10365_v59 = vld [vmem:[#allocation6 + $0x120c] ss:$152 sps:$4 sm:$0xff]  }
 0x567   : > { %2836 = vmatpush1.bf16.msra.mxu0 %v10312_v63  ;;  %v10368_v63 = vld [vmem:[#allocation6 + $0x54] ss:$152 sps:$4 sm:$0xff]  }
 0x568   : > { %2837 = vmatprep.subr.bf16.mxu0 %v10320_v1 }
 0x56b   : > { %2838 = vmatpush1.bf16.msra.mxu0 %v10318_v2 }
 0x56c   : > { %2839 = vmatprep.subr.bf16.mxu0 %v10326_v3 }
 0x56f   : > { %2840 = vmatpush1.bf16.msra.mxu0 %v10324_v4 }
 0x570   : > { %2841 = vmatprep.subr.bf16.mxu0 %v10332_v5  ;;  %v10366_v5 = vld [vmem:[#allocation6 + $0x50] ss:$152 sps:$4 sm:$0xff]  }
 0x573   : > { %2842 = vmatpush1.bf16.msra.mxu0 %v10330_v6 }
 0x574   : > { %2843 = vmatprep.subr.bf16.mxu0 %v10338_v7  ;;  %v10371_v7 = vld [vmem:[#allocation6 + $0x184] ss:$152 sps:$4 sm:$0xff]  }
 0x577   : > { %2844 = vmatpush1.bf16.msra.mxu0 %v10336_v8 }
 0x578   : > { %2845 = vmatprep.subr.bf16.mxu0 %v10344_v9  ;;  %v10374_v9 = vld [vmem:[#allocation6 + $0x2b4] ss:$152 sps:$4 sm:$0xff]  }
 0x57b   : > { %2846 = vmatpush1.bf16.msra.mxu0 %v10342_v10  ;;  %v10372_v10 = vld [vmem:[#allocation6 + $0x2b0] ss:$152 sps:$4 sm:$0xff]  }
 0x57c   : > { %2847 = vmatprep.subr.bf16.mxu0 %v10350_v11  ;;  %v10377_v11 = vld [vmem:[#allocation6 + $0x3e4] ss:$152 sps:$4 sm:$0xff]  }
 0x57f   : > { %2848 = vmatpush1.bf16.msra.mxu0 %v10348_v12  ;;  %v10380_v12 = vld [vmem:[#allocation6 + $0x514] ss:$152 sps:$4 sm:$0xff]  }
 0x580   : > { %2849 = vmatprep.subr.bf16.mxu0 %v10356_v13  ;;  %v10378_v13 = vld [vmem:[#allocation6 + $0x510] ss:$152 sps:$4 sm:$0xff]  }
 0x583   : > { %2850 = vmatpush1.bf16.msra.mxu0 %v10354_v15  ;;  %v10383_v15 = vld [vmem:[#allocation6 + $0x644] ss:$152 sps:$4 sm:$0xff]  }
 0x584   : > { %2851 = vmatprep.subr.bf16.mxu0 %v10362_v57 }
 0x5d8   : > { %v2041_v26 = vpop.xlane.xlu1 %2040 }
 0x5d9   : > { %v2042_v27 = vsub.f32 %v2035_v18, %v2041_v26  ;;  %v10293_v18 = vld [vmem:[#allocation6 + $0x3cc] ss:$152 sps:$4 sm:$0xff]   ;;  %v10297_v26 = vld [vmem:[#allocation6 + $0x4f8] ss:$152 sps:$4 sm:$0xff]  }
 0x5db   : > { %v2043_v32 = vmul.f32 1.442695, %v2042_v27  ;;  %v10305_v27 = vld [vmem:[#allocation6 + $0x62c] ss:$152 sps:$4 sm:$0xff]  }
 0x5dd   : > { %10850 = vpow2.f32 %v2043_v32  ;;  %v10303_v32 = vld [vmem:[#allocation6 + $0x628] ss:$152 sps:$4 sm:$0xff]  }
 0x5e7   : > { %v11970_v33 = vpop.eup %10850 }
 0x5e8   : > { %v2045_v34 = vsel %vm1883_vm0, %v11970_v33, 0.0 }
 0x5e9   : > { %2046 = vadd.xlane.f32.xlu1 %v2045_v34  ;;  %v10309_v34 = vld [vmem:[#allocation6 + $0x758] ss:$152 sps:$4 sm:$0xff]  }
 0x61d   : > { %v2364_v58 = vpop.f32.mrb[12].mxu0 }
 0x61e   : > { %v11983_v60 = vadd.f32 %v2364_v58, %v2163_v56  ;;  %v11985_v61 = vpop.f32.mrb[13].mxu0  ;;  %v10357_v56 = vld [vmem:[#allocation6 + $0x10d8] ss:$152 sps:$4 sm:$0xff]  }
 0x61f   : > { %v2368_v62 = vpop.f32.mrb[14].mxu0  ;;  %v10360_v58 = vld [vmem:[#allocation6 + $0x1210] ss:$152 sps:$4 sm:$0xff]  }
 0x620   : > { %v2369_v0 = vpop.f32.mrb[15].mxu0  ;;  %v10363_v62 = vld [vmem:[#allocation6 + $0x1208] ss:$152 sps:$4 sm:$0xff]   ;;  %2852 = vmatpush1.bf16.msra.mxu0 %v10360_v58 }
 0x621   : > { %3670 = vmatprep.subr.bf16.mxu0 %v10368_v63  ;;  %v11990_v0 = vsub.s32 1, %v11974_v47 }
 0x623   : > { %v2167_v1 = vrot.slane %v11979_v52, %v11990_v0  ;;  %v10369_v52 = vld [vmem:[#allocation6 + $0x180] ss:$152 sps:$4 sm:$0xff]  }
 0x625   : > { %v2367_v8 = vadd.f32 %v11985_v61, %v2167_v1  ;;  %v10375_v61 = vld [vmem:[#allocation6 + $0x3e0] ss:$152 sps:$4 sm:$0xff]  }
 0x676   : > { %v2047_v16 = vpop.xlane.xlu1 %2046 }
 0x677   : > { %10852 = vrcp.f32 %v2047_v16  ;;  %v10381_v16 = vld [vmem:[#allocation6 + $0x640] ss:$152 sps:$4 sm:$0xff]  }
 0x681   : > { %v10853_v17 = vpop.eup %10852 }
 0x682   : > { %v2049_v20 = vmul.f32 %v10853_v17, %v11970_v33  ;;  %v10311_v33 = vld [vmem:[#allocation6 + $0x75c] ss:$152 sps:$4 sm:$0xff]  }
 0x683   : > { %v10386_v17 = vld [vmem:[#allocation6 + $0x774] ss:$152 sps:$4 sm:$0xff]  }
 0x684   : > { %9025 = vmatmul.mubr.msk.f32.vlgmr.msra.gmra.mrb[18].mxu1 %vm1883_vm0, %v2049_v20  ;;  %v10389_v20 = vld [vmem:[#allocation6 + $0x8a4] ss:$152 sps:$4 sm:$0xff]  }
 0x685   : > { %2781 = vmatpush1.bf16.msra.mxu1 %v10273_v19  ;;  %v10384_v19 = vld [vmem:[#allocation6 + $0x770] ss:$152 sps:$4 sm:$0xff]  }
 0x686   : > { %2782 = vmatprep.subr.bf16.mxu1 %v10281_v21  ;;  %v10387_v21 = vld [vmem:[#allocation6 + $0x8a0] ss:$152 sps:$4 sm:$0xff]  }
 0x689   : > { %2783 = vmatpush1.bf16.msra.mxu1 %v10279_v24  ;;  %v10392_v24 = vld [vmem:[#allocation6 + $0x9d4] ss:$152 sps:$4 sm:$0xff]  }
 0x68a   : > { %2784 = vmatprep.subr.bf16.mxu1 %v10287_v25  ;;  %v10390_v25 = vld [vmem:[#allocation6 + $0x9d0] ss:$152 sps:$4 sm:$0xff]  }
 0x68d   : > { %2785 = vmatpush1.bf16.msra.mxu1 %v10285_v28  ;;  %v10395_v28 = vld [vmem:[#allocation6 + $0xb04] ss:$152 sps:$4 sm:$0xff]  }
 0x68e   : > { %2786 = vmatprep.subr.bf16.mxu1 %v10293_v18  ;;  %v10393_v18 = vld [vmem:[#allocation6 + $0xb00] ss:$152 sps:$4 sm:$0xff]  }
 0x691   : > { %2787 = vmatpush1.bf16.msra.mxu1 %v10291_v23  ;;  %v10398_v23 = vld [vmem:[#allocation6 + $0xc34] ss:$152 sps:$4 sm:$0xff]  }
 0x692   : > { %2788 = vmatprep.subr.bf16.mxu1 %v10299_v22  ;;  %v10396_v22 = vld [vmem:[#allocation6 + $0xc30] ss:$152 sps:$4 sm:$0xff]  }
 0x695   : > { %2789 = vmatpush1.bf16.msra.mxu1 %v10297_v26  ;;  %v10401_v26 = vld [vmem:[#allocation6 + $0xd64] ss:$152 sps:$4 sm:$0xff]  }
 0x696   : > { %2790 = vmatprep.subr.bf16.mxu1 %v10305_v27  ;;  %v10399_v27 = vld [vmem:[#allocation6 + $0xd60] ss:$152 sps:$4 sm:$0xff]  }
 0x699   : > { %2791 = vmatpush1.bf16.msra.mxu1 %v10303_v32  ;;  %v10404_v32 = vld [vmem:[#allocation6 + $0xe94] ss:$152 sps:$4 sm:$0xff]  }
 0x69a   : > { %2792 = vmatprep.subr.bf16.mxu1 %v10311_v33  ;;  %v10402_v33 = vld [vmem:[#allocation6 + $0xe90] ss:$152 sps:$4 sm:$0xff]  }
 0x69d   : > { %2793 = vmatpush1.bf16.msra.mxu1 %v10309_v34  ;;  %v10407_v34 = vld [vmem:[#allocation6 + $0xfc4] ss:$152 sps:$4 sm:$0xff]  }
 0x69e   : > { %2794 = vmatprep.subr.bf16.mxu1 %v10317_v35  ;;  %v10405_v35 = vld [vmem:[#allocation6 + $0xfc0] ss:$152 sps:$4 sm:$0xff]  }
 0x6a1   : > { %2795 = vmatpush1.bf16.msra.mxu1 %v10315_v36  ;;  %v10410_v36 = vld [vmem:[#allocation6 + $0x10f4] ss:$152 sps:$4 sm:$0xff]  }
 0x6a2   : > { %2796 = vmatprep.subr.bf16.mxu1 %v10323_v37  ;;  %v10408_v37 = vld [vmem:[#allocation6 + $0x10f0] ss:$152 sps:$4 sm:$0xff]  }
 0x6a5   : > { %2797 = vmatpush1.bf16.msra.mxu1 %v10321_v39  ;;  %v10413_v39 = vld [vmem:[#allocation6 + $0x1224] ss:$152 sps:$4 sm:$0xff]  }
 0x6a6   : > { %2798 = vmatprep.subr.bf16.mxu1 %v10329_v40  ;;  %v10411_v40 = vld [vmem:[#allocation6 + $0x1220] ss:$152 sps:$4 sm:$0xff]  }
 0x6a9   : > { %2799 = vmatpush1.bf16.msra.mxu1 %v10327_v41  ;;  %v2438_v41 = vld [vmem:[#allocation8 + $0x1] ss:$8 sm:$0xf] }
 0x6aa   : > { %2800 = vmatprep.subr.bf16.mxu1 %v10335_v42  ;;  %v12006_v42 = vsub.s32 3, %v11974_v47 }
 0x6ad   : > { %2801 = vmatpush1.bf16.msra.mxu1 %v10333_v43  ;;  %v2447_v43 = vrot.slane %v2438_v41, %v11990_v0 }
 0x6ae   : > { %2802 = vmatprep.subr.bf16.mxu1 %v10341_v44  ;;  %v2443_v44 = vrot.slane %v2438_v41, %v11977_v51 }
 0x6b1   : > { %2803 = vmatpush1.bf16.msra.mxu1 %v10339_v45  ;;  %v12011_v45 = vsub.s32 2, %v11974_v47 }
 0x6b2   : > { %2804 = vmatprep.subr.bf16.mxu1 %v10347_v46 }
 0x6b5   : > { %2805 = vmatpush1.bf16.msra.mxu1 %v10345_v49 }
 0x6b6   : > { %2806 = vmatprep.subr.bf16.mxu1 %v10353_v50  ;;  %v2455_v50 = vrot.slane %v2438_v41, %v12006_v42 }
 0x6b9   : > { %2807 = vmatpush1.bf16.msra.mxu1 %v10351_v53 }
 0x6ba   : > { %2808 = vmatprep.subr.bf16.mxu1 %v10359_v54 }
 0x6bd   : > { %2809 = vmatpush1.bf16.msra.mxu1 %v10357_v56 }
 0x6be   : > { %2810 = vmatprep.subr.bf16.mxu1 %v10365_v59 }
 0x6c1   : > { %2811 = vmatpush1.bf16.msra.mxu1 %v10363_v62  ;;  %v2451_v62 = vrot.slane %v2438_v41, %v12011_v45  ;;  %v10434_v41 = vld [vmem:[#allocation6 + $0x76c] ss:$152 sps:$4 sm:$0xff]  }
 0x757   : > { %v2119_v2 = vpop.f32.mrb[18].mxu1 }
 0x758   : > { %v2121_v3 = vpop.f32.mrb[19].mxu1  ;;  %v11996_v6 = vpack.c.bf16 %v2119_v2, %v2119_v2 }
 0x759   : > { %v11994_v4 = vpack.c.bf16 %v2121_v3, %v2121_v3 }
 0x75b   : > { %2812 = vmatprep.mubr.bf16.mxu1 %v11994_v4  ;;  %2853 = vmatprep.mubr.bf16.mxu0 %v11994_v4 }
 0x75c   : > { %2813 = vmatmul.mubr.bf16.vlgmr.msra.gmra.mrb[20].mxu1 %v11996_v6  ;;  %2854 = vmatmul.mubr.bf16.vlgmr.msra.gmra.mrb[16].mxu0 %v11996_v6 }
 0x75d   : > { %3671 = vmatpush1.bf16.msra.mxu0 %v10366_v5  ;;  %2926 = vmatprep.mubr.f32.mxu1 %v2367_v8 }
 0x75e   : > { %3702 = vmatprep.mubr.bf16.mxu0 %v11963_v29  ;;  %3672 = vmatprep.subr.bf16.mxu0 %v10371_v7 }
 0x761   : > { %3673 = vmatpush1.bf16.msra.mxu0 %v10369_v52 }
 0x762   : > { %3674 = vmatprep.subr.bf16.mxu0 %v10374_v9 }
 0x765   : > { %3675 = vmatpush1.bf16.msra.mxu0 %v10372_v10 }
 0x766   : > { %3676 = vmatprep.subr.bf16.mxu0 %v10377_v11 }
 0x769   : > { %3677 = vmatpush1.bf16.msra.mxu0 %v10375_v61 }
 0x76a   : > { %3678 = vmatprep.subr.bf16.mxu0 %v10380_v12 }
 0x76d   : > { %3679 = vmatpush1.bf16.msra.mxu0 %v10378_v13 }
 0x76e   : > { %3680 = vmatprep.subr.bf16.mxu0 %v10383_v15  ;;  %v10416_v15 = vld [vmem:[#allocation6 + $0x4c] ss:$152 sps:$4 sm:$0xff]  }
 0x771   : > { %3681 = vmatpush1.bf16.msra.mxu0 %v10381_v16 }
 0x772   : > { %3682 = vmatprep.subr.bf16.mxu0 %v10386_v17 }
 0x775   : > { %3683 = vmatpush1.bf16.msra.mxu0 %v10384_v19  ;;  %v10414_v19 = vld [vmem:[#allocation6 + $0x48] ss:$152 sps:$4 sm:$0xff]  }
 0x776   : > { %3684 = vmatprep.subr.bf16.mxu0 %v10389_v20 }
 0x779   : > { %3685 = vmatpush1.bf16.msra.mxu0 %v10387_v21  ;;  %v10419_v21 = vld [vmem:[#allocation6 + $0x17c] ss:$152 sps:$4 sm:$0xff]  }
 0x77a   : > { %3686 = vmatprep.subr.bf16.mxu0 %v10392_v24  ;;  %v10417_v24 = vld [vmem:[#allocation6 + $0x178] ss:$152 sps:$4 sm:$0xff]  }
 0x77d   : > { %3687 = vmatpush1.bf16.msra.mxu0 %v10390_v25  ;;  %v10422_v25 = vld [vmem:[#allocation6 + $0x2ac] ss:$152 sps:$4 sm:$0xff]  }
 0x77e   : > { %3688 = vmatprep.subr.bf16.mxu0 %v10395_v28  ;;  %v10420_v28 = vld [vmem:[#allocation6 + $0x2a8] ss:$152 sps:$4 sm:$0xff]  }
 0x781   : > { %3689 = vmatpush1.bf16.msra.mxu0 %v10393_v18  ;;  %v10425_v18 = vld [vmem:[#allocation6 + $0x3dc] ss:$152 sps:$4 sm:$0xff]  }
 0x782   : > { %3690 = vmatprep.subr.bf16.mxu0 %v10398_v23  ;;  %v10510_v23 = vld [vmem:[#allocation6 + $0x60] ss:$152 sps:$4 sm:$0xff]  }
 0x785   : > { %3691 = vmatpush1.bf16.msra.mxu0 %v10396_v22  ;;  %v10512_v22 = vld [vmem:[#allocation6 + $0x64] ss:$152 sps:$4 sm:$0xff]  }
 0x786   : > { %3692 = vmatprep.subr.bf16.mxu0 %v10401_v26  ;;  %v10515_v26 = vld [vmem:[#allocation6 + $0x194] ss:$152 sps:$4 sm:$0xff]  }
 0x789   : > { %3693 = vmatpush1.bf16.msra.mxu0 %v10399_v27  ;;  %v10423_v27 = vld [vmem:[#allocation6 + $0x3d8] ss:$152 sps:$4 sm:$0xff]  }
 0x78a   : > { %3694 = vmatprep.subr.bf16.mxu0 %v10404_v32  ;;  %v10513_v32 = vld [vmem:[#allocation6 + $0x190] ss:$152 sps:$4 sm:$0xff]  }
 0x78d   : > { %3695 = vmatpush1.bf16.msra.mxu0 %v10402_v33  ;;  %v10428_v33 = vld [vmem:[#allocation6 + $0x50c] ss:$152 sps:$4 sm:$0xff]  }
 0x78e   : > { %3696 = vmatprep.subr.bf16.mxu0 %v10407_v34  ;;  %v10518_v34 = vld [vmem:[#allocation6 + $0x2c4] ss:$152 sps:$4 sm:$0xff]  }
 0x791   : > { %3697 = vmatpush1.bf16.msra.mxu0 %v10405_v35  ;;  %v10516_v35 = vld [vmem:[#allocation6 + $0x2c0] ss:$152 sps:$4 sm:$0xff]  }
 0x792   : > { %3698 = vmatprep.subr.bf16.mxu0 %v10410_v36  ;;  %v10431_v36 = vld [vmem:[#allocation6 + $0x63c] ss:$152 sps:$4 sm:$0xff]  }
 0x795   : > { %3699 = vmatpush1.bf16.msra.mxu0 %v10408_v37  ;;  %v10521_v37 = vld [vmem:[#allocation6 + $0x3f4] ss:$152 sps:$4 sm:$0xff]  }
 0x796   : > { %3700 = vmatprep.subr.bf16.mxu0 %v10413_v39  ;;  %v10429_v39 = vld [vmem:[#allocation6 + $0x638] ss:$152 sps:$4 sm:$0xff]  }
 0x799   : > { %3701 = vmatpush1.bf16.msra.mxu0 %v10411_v40  ;;  %v10519_v40 = vld [vmem:[#allocation6 + $0x3f0] ss:$152 sps:$4 sm:$0xff]  }
 0x79a   : > { %4114 = vmatprep.subr.bf16.mxu0 %v10512_v22  ;;  %v10459_v22 = vld [vmem:[#allocation6 + $0x1218] ss:$152 sps:$4 sm:$0xff]  }
 0x79c   : > { %3703 = vmatmul.mubr.bf16.vlgmr.msra.gmra.mrb[20].mxu0 %v11965_v31 }
 0x79d   : > { %4115 = vmatpush1.bf16.msra.mxu0 %v10510_v23  ;;  %v10551_v23 = vld [vmem:[#allocation6 + $0xfd4] ss:$152 sps:$4 sm:$0xff]  }
 0x79e   : > { %4116 = vmatprep.subr.bf16.mxu0 %v10515_v26  ;;  %v10549_v26 = vld [vmem:[#allocation6 + $0xfd0] ss:$152 sps:$4 sm:$0xff]  }
 0x7a1   : > { %4117 = vmatpush1.bf16.msra.mxu0 %v10513_v32  ;;  %v10554_v32 = vld [vmem:[#allocation6 + $0x1104] ss:$152 sps:$4 sm:$0xff]  }
 0x7a2   : > { %4118 = vmatprep.subr.bf16.mxu0 %v10518_v34  ;;  %v10467_v34 = vld [vmem:[#allocation6 + $0x18c] ss:$152 sps:$4 sm:$0xff]  }
 0x7a5   : > { %4119 = vmatpush1.bf16.msra.mxu0 %v10516_v35  ;;  %v10465_v35 = vld [vmem:[#allocation6 + $0x188] ss:$152 sps:$4 sm:$0xff]  }
 0x7a6   : > { %4120 = vmatprep.subr.bf16.mxu0 %v10521_v37  ;;  %v10468_v37 = vld [vmem:[#allocation6 + $0x2b8] ss:$152 sps:$4 sm:$0xff]  }
 0x7a9   : > { %4121 = vmatpush1.bf16.msra.mxu0 %v10519_v40  ;;  %v10471_v40 = vld [vmem:[#allocation6 + $0x3e8] ss:$152 sps:$4 sm:$0xff]  }
 0x82f   : > { %v2814_v46 = vpop.f32.mrb[20].mxu1  ;;  %v2855_v49 = vpop.f32.mrb[16].mxu0 }
 0x830   : > { %v2816_v53 = vpop.f32.mrb[21].mxu1  ;;  %v2857_v54 = vpop.f32.mrb[17].mxu0  ;;  %v2815_v59 = vadd.f32 %v2814_v46, %v2443_v44  ;;  %v2856_v47 = vadd.f32 %v2855_v49, %v2451_v62  ;;  %v10432_v44 = vld [vmem:[#allocation6 + $0x768] ss:$152 sps:$4 sm:$0xff]   ;;  %v10437_v49 = vld [vmem:[#allocation6 + $0x89c] ss:$152 sps:$4 sm:$0xff]  }
 0x831   : > { %v2817_v56 = vadd.f32 %v2816_v53, %v2447_v43  ;;  %v2818_v57 = vpop.f32.mrb[22].mxu1  ;;  %v2859_v58 = vpop.f32.mrb[18].mxu0  ;;  %v2858_v2 = vadd.f32 %v2857_v54, %v2455_v50  ;;  %v10524_v43 = vld [vmem:[#allocation6 + $0x524] ss:$152 sps:$4 sm:$0xff]   ;;  %v10522_v46 = vld [vmem:[#allocation6 + $0x520] ss:$152 sps:$4 sm:$0xff]  }
 0x832   : > { %v2819_v63 = vpop.f32.mrb[23].mxu1  ;;  %v2860_v1 = vpop.f32.mrb[19].mxu0  ;;  %4122 = vmatprep.subr.bf16.mxu0 %v10524_v43  ;;  %v10527_v50 = vld [vmem:[#allocation6 + $0x654] ss:$152 sps:$4 sm:$0xff]   ;;  %v10435_v53 = vld [vmem:[#allocation6 + $0x898] ss:$152 sps:$4 sm:$0xff]  }
 0x833   : > { %2862 = vmatprep.subr.mxu1 %v2817_v56  ;;  %4123 = vmatpush1.bf16.msra.mxu0 %v10522_v46  ;;  %v10525_v54 = vld [vmem:[#allocation6 + $0x650] ss:$152 sps:$4 sm:$0xff]   ;;  %v10440_v56 = vld [vmem:[#allocation6 + $0x9cc] ss:$152 sps:$4 sm:$0xff]   ;;  %v10443_v62 = vld [vmem:[#allocation6 + $0xafc] ss:$152 sps:$4 sm:$0xff]  }
 0x834   : > { %2863 = vmatpush1.xpose.msra.mxu1 %v2815_v59  ;;  %4124 = vmatprep.subr.bf16.mxu0 %v10527_v50  ;;  %v10530_v57 = vld [vmem:[#allocation6 + $0x784] ss:$152 sps:$4 sm:$0xff]   ;;  %v10438_v58 = vld [vmem:[#allocation6 + $0x9c8] ss:$152 sps:$4 sm:$0xff]   ;;  %v10533_v63 = vld [vmem:[#allocation6 + $0x8b4] ss:$152 sps:$4 sm:$0xff]  }
 0x835   : > { %2946 = vmatprep.subr.mxu1 %v2858_v2  ;;  %v10528_v59 = vld [vmem:[#allocation6 + $0x780] ss:$152 sps:$4 sm:$0xff]   ;;  %v10531_v2 = vld [vmem:[#allocation6 + $0x8b0] ss:$152 sps:$4 sm:$0xff]   ;;  %v10557_v46 = vld [vmem:[#allocation6 + $0x1234] ss:$152 sps:$4 sm:$0xff]  }
 0x836   : > { %v10441_v1 = vld [vmem:[#allocation6 + $0xaf8] ss:$152 sps:$4 sm:$0xff]  }
 0x837   : > { %2927 = vmatmul.mubr.f32.vlgmr.msra.gmra.mrb[24].mxu1 %v11983_v60  ;;  %4125 = vmatpush1.bf16.msra.mxu0 %v10525_v54  ;;  %v10474_v43 = vld [vmem:[#allocation6 + $0x518] ss:$152 sps:$4 sm:$0xff]   ;;  %v10483_v54 = vld [vmem:[#allocation6 + $0x8a8] ss:$152 sps:$4 sm:$0xff]  }
 0x838   : > { %2947 = vmatpush1.msra.mxu1 %v2856_v47  ;;  %3010 = vmatprep.mubr.f32.mxu1 %v11607_v48  ;;  %v10446_v47 = vld [vmem:[#allocation6 + $0xc2c] ss:$152 sps:$4 sm:$0xff]   ;;  %v10480_v50 = vld [vmem:[#allocation6 + $0x778] ss:$152 sps:$4 sm:$0xff]  }
 0x839   : > { %3222 = vmatprep.subr.bf16.mxu1 %v10416_v15  ;;  %4126 = vmatprep.subr.bf16.mxu0 %v10530_v57  ;;  %v10540_v15 = vld [vmem:[#allocation6 + $0xc40] ss:$152 sps:$4 sm:$0xff]  }
 0x83a   : > { %v10486_v57 = vld [vmem:[#allocation6 + $0x9d8] ss:$152 sps:$4 sm:$0xff]  }
 0x83b   : > { %4127 = vmatpush1.bf16.msra.mxu0 %v10528_v59  ;;  %v10489_v59 = vld [vmem:[#allocation6 + $0xb08] ss:$152 sps:$4 sm:$0xff]  }
 0x83c   : > { %4128 = vmatprep.subr.bf16.mxu0 %v10533_v63  ;;  %v10492_v63 = vld [vmem:[#allocation6 + $0xc38] ss:$152 sps:$4 sm:$0xff]  }
 0x83f   : > { %4129 = vmatpush1.bf16.msra.mxu0 %v10531_v2  ;;  %v10495_v2 = vld [vmem:[#allocation6 + $0xd68] ss:$152 sps:$4 sm:$0xff]  }
 0x86f   : > { %v12017_v3 = vpop.f32.mrb[20].mxu0 }
 0x870   : > { %v12019_v5 = vpop.f32.mrb[21].mxu0 }
 0x871   : > { %v3708_v7 = vpop.f32.mrb[22].mxu0 }
 0x872   : > { %v3709_v8 = vpop.f32.mrb[23].mxu0  ;;  %v10536_v7 = vld [vmem:[#allocation6 + $0x9e4] ss:$152 sps:$4 sm:$0xff]  }
 0x873   : > { %v10444_v8 = vld [vmem:[#allocation6 + $0xc28] ss:$152 sps:$4 sm:$0xff]   ;;  %4130 = vmatprep.subr.bf16.mxu0 %v10536_v7  ;;  %v10498_v7 = vld [vmem:[#allocation6 + $0xe98] ss:$152 sps:$4 sm:$0xff]  }
 0x90a   : > { %v2928_v52 = vpop.f32.mrb[24].mxu1 }
 0x90b   : > { %v2930_v9 = vpop.f32.mrb[25].mxu1  ;;  %v2932_v10 = vsel %vm1883_vm0, %v2928_v52, -inf }
 0x90c   : > { %2933 = vmax.xlane.f32.xlu0 %v2932_v10  ;;  %v10449_v9 = vld [vmem:[#allocation6 + $0xd5c] ss:$152 sps:$4 sm:$0xff]  }
 0x90d   : > { %v10539_v10 = vld [vmem:[#allocation6 + $0xb14] ss:$152 sps:$4 sm:$0xff]  }
 0x999   : > { %v2934_v11 = vpop.xlane.xlu0 %2933 }
 0x99a   : > { %v2935_v61 = vsub.f32 %v2928_v52, %v2934_v11  ;;  %v10534_v52 = vld [vmem:[#allocation6 + $0x9e0] ss:$152 sps:$4 sm:$0xff]  }
 0x99b   : > { %v10447_v11 = vld [vmem:[#allocation6 + $0xd58] ss:$152 sps:$4 sm:$0xff]   ;;  %4131 = vmatpush1.bf16.msra.mxu0 %v10534_v52  ;;  %v10501_v52 = vld [vmem:[#allocation6 + $0xfc8] ss:$152 sps:$4 sm:$0xff]  }
 0x99c   : > { %v2936_v12 = vmul.f32 1.442695, %v2935_v61  ;;  %v10537_v61 = vld [vmem:[#allocation6 + $0xb10] ss:$152 sps:$4 sm:$0xff]   ;;  %4132 = vmatprep.subr.bf16.mxu0 %v10539_v10 }
 0x99d   : > { %v3328_v10 = vld [vmem:[#allocation8 + $0x3] ss:$8 sm:$0xf] }
 0x99e   : > { %10854 = vpow2.f32 %v2936_v12  ;;  %v10452_v12 = vld [vmem:[#allocation6 + $0xe8c] ss:$152 sps:$4 sm:$0xff]  }
 0x99f   : > { %4133 = vmatpush1.bf16.msra.mxu0 %v10537_v61  ;;  %v10509_v61 = vld [vmem:[#allocation6 + $0x122c] ss:$152 sps:$4 sm:$0xff]  }
 0x9a8   : > { %v10855_v13 = vpop.eup %10854 }
 0x9a9   : > { %v2938_v60 = vsel %vm1883_vm0, %v10855_v13, 0.0 }
 0x9aa   : > { %2939 = vadd.xlane.f32.xlu1 %v2938_v60  ;;  %v10450_v60 = vld [vmem:[#allocation6 + $0xe88] ss:$152 sps:$4 sm:$0xff]  }
 0xa37   : > { %v2940_v16 = vpop.xlane.xlu1 %2939 }
 0xa38   : > { %10856 = vrcp.f32 %v2940_v16  ;;  %v10455_v16 = vld [vmem:[#allocation6 + $0xfbc] ss:$152 sps:$4 sm:$0xff]  }
 0xa42   : > { %v10857_v17 = vpop.eup %10856 }
 0xa43   : > { %v2942_v20 = vmul.f32 %v10857_v17, %v10855_v13  ;;  %v10542_v13 = vld [vmem:[#allocation6 + $0xc44] ss:$152 sps:$4 sm:$0xff]   ;;  %v10545_v17 = vld [vmem:[#allocation6 + $0xd74] ss:$152 sps:$4 sm:$0xff]  }
 0xa44   : > { %4134 = vmatprep.subr.bf16.mxu0 %v10542_v13  ;;  %v10507_v13 = vld [vmem:[#allocation6 + $0x1228] ss:$152 sps:$4 sm:$0xff]  }
 0xa45   : > { %9122 = vmatmul.mubr.msk.f32.vlgmr.msra.gmra.mrb[26].mxu1 %vm1883_vm0, %v2942_v20  ;;  %4135 = vmatpush1.bf16.msra.mxu0 %v10540_v15  ;;  %v10543_v20 = vld [vmem:[#allocation6 + $0xd70] ss:$152 sps:$4 sm:$0xff]   ;;  %v3333_v15 = vrot.slane %v3328_v10, %v11977_v51 }
 0xa46   : > { %3223 = vmatpush1.bf16.msra.mxu1 %v10414_v19  ;;  %3254 = vmatprep.mubr.bf16.mxu1 %v11994_v4  ;;  %v10426_v4 = vld [vmem:[#allocation6 + $0x508] ss:$152 sps:$4 sm:$0xff]   ;;  %v10453_v19 = vld [vmem:[#allocation6 + $0xfb8] ss:$152 sps:$4 sm:$0xff]  }
 0xa47   : > { %3224 = vmatprep.subr.bf16.mxu1 %v10419_v21  ;;  %v10458_v21 = vld [vmem:[#allocation6 + $0x10ec] ss:$152 sps:$4 sm:$0xff]   ;;  %4136 = vmatprep.subr.bf16.mxu0 %v10545_v17 }
 0xa49   : > { %4137 = vmatpush1.bf16.msra.mxu0 %v10543_v20 }
 0xa4a   : > { %3225 = vmatpush1.bf16.msra.mxu1 %v10417_v24  ;;  %v10548_v24 = vld [vmem:[#allocation6 + $0xea4] ss:$152 sps:$4 sm:$0xff]  }
 0xa4b   : > { %3226 = vmatprep.subr.bf16.mxu1 %v10422_v25  ;;  %v10456_v25 = vld [vmem:[#allocation6 + $0x10e8] ss:$152 sps:$4 sm:$0xff]   ;;  %4138 = vmatprep.subr.bf16.mxu0 %v10548_v24 }
 0xa4c   : > { %v3050_v24 = vld [vmem:[#allocation8 + $0x2] ss:$8 sm:$0x3] }
 0xa4e   : > { %3227 = vmatpush1.bf16.msra.mxu1 %v10420_v28  ;;  %v10546_v28 = vld [vmem:[#allocation6 + $0xea0] ss:$152 sps:$4 sm:$0xff]  }
 0xa4f   : > { %3228 = vmatprep.subr.bf16.mxu1 %v10425_v18  ;;  %v10461_v18 = vld [vmem:[#allocation6 + $0x121c] ss:$152 sps:$4 sm:$0xff]   ;;  %4139 = vmatpush1.bf16.msra.mxu0 %v10546_v28 }
 0xa50   : > { %4140 = vmatprep.subr.bf16.mxu0 %v10551_v23 }
 0xa52   : > { %3229 = vmatpush1.bf16.msra.mxu1 %v10423_v27  ;;  %v10464_v27 = vld [vmem:[#allocation6 + $0x5c] ss:$152 sps:$4 sm:$0xff]  }
 0xa53   : > { %3230 = vmatprep.subr.bf16.mxu1 %v10428_v33  ;;  %v10462_v33 = vld [vmem:[#allocation6 + $0x58] ss:$152 sps:$4 sm:$0xff]   ;;  %4141 = vmatpush1.bf16.msra.mxu0 %v10549_v26  ;;  %v3345_v26 = vrot.slane %v3328_v10, %v12006_v42 }
 0xa54   : > { %4142 = vmatprep.subr.bf16.mxu0 %v10554_v32 }
 0xa56   : > { %3231 = vmatpush1.bf16.msra.mxu1 %v10426_v4  ;;  %v10552_v4 = vld [vmem:[#allocation6 + $0x1100] ss:$152 sps:$4 sm:$0xff]  }
 0xa57   : > { %3232 = vmatprep.subr.bf16.mxu1 %v10431_v36  ;;  %v10470_v36 = vld [vmem:[#allocation6 + $0x2bc] ss:$152 sps:$4 sm:$0xff]   ;;  %4143 = vmatpush1.bf16.msra.mxu0 %v10552_v4 }
 0xa58   : > { %4144 = vmatprep.subr.bf16.mxu0 %v10557_v46 }
 0xa5a   : > { %3233 = vmatpush1.bf16.msra.mxu1 %v10429_v39  ;;  %v10473_v39 = vld [vmem:[#allocation6 + $0x3ec] ss:$152 sps:$4 sm:$0xff]  }
 0xa5b   : > { %3234 = vmatprep.subr.bf16.mxu1 %v10434_v41  ;;  %v10476_v41 = vld [vmem:[#allocation6 + $0x51c] ss:$152 sps:$4 sm:$0xff]  }
 0xa5e   : > { %3235 = vmatpush1.bf16.msra.mxu1 %v10432_v44  ;;  %v10479_v44 = vld [vmem:[#allocation6 + $0x64c] ss:$152 sps:$4 sm:$0xff]  }
 0xa5f   : > { %3236 = vmatprep.subr.bf16.mxu1 %v10437_v49  ;;  %v10555_v49 = vld [vmem:[#allocation6 + $0x1230] ss:$152 sps:$4 sm:$0xff]  }
 0xa60   : > { %4145 = vmatpush1.bf16.msra.mxu0 %v10555_v49 }
 0xa62   : > { %3237 = vmatpush1.bf16.msra.mxu1 %v10435_v53  ;;  %v10485_v53 = vld [vmem:[#allocation6 + $0x8ac] ss:$152 sps:$4 sm:$0xff]  }
 0xa63   : > { %3238 = vmatprep.subr.bf16.mxu1 %v10440_v56  ;;  %v10488_v56 = vld [vmem:[#allocation6 + $0x9dc] ss:$152 sps:$4 sm:$0xff]  }
 0xa66   : > { %3239 = vmatpush1.bf16.msra.mxu1 %v10438_v58  ;;  %v10491_v58 = vld [vmem:[#allocation6 + $0xb0c] ss:$152 sps:$4 sm:$0xff]  }
 0xa67   : > { %3240 = vmatprep.subr.bf16.mxu1 %v10443_v62  ;;  %v10494_v62 = vld [vmem:[#allocation6 + $0xc3c] ss:$152 sps:$4 sm:$0xff]  }
 0xa6a   : > { %3241 = vmatpush1.bf16.msra.mxu1 %v10441_v1  ;;  %v10497_v1 = vld [vmem:[#allocation6 + $0xd6c] ss:$152 sps:$4 sm:$0xff]  }
 0xa6b   : > { %3242 = vmatprep.subr.bf16.mxu1 %v10446_v47  ;;  %v10500_v47 = vld [vmem:[#allocation6 + $0xe9c] ss:$152 sps:$4 sm:$0xff]  }
 0xa6e   : > { %3243 = vmatpush1.bf16.msra.mxu1 %v10444_v8  ;;  %v10503_v8 = vld [vmem:[#allocation6 + $0xfcc] ss:$152 sps:$4 sm:$0xff]  }
 0xa6f   : > { %3244 = vmatprep.subr.bf16.mxu1 %v10449_v9  ;;  %v10506_v9 = vld [vmem:[#allocation6 + $0x10fc] ss:$152 sps:$4 sm:$0xff]  }
 0xa72   : > { %3245 = vmatpush1.bf16.msra.mxu1 %v10447_v11  ;;  %v10504_v11 = vld [vmem:[#allocation6 + $0x10f8] ss:$152 sps:$4 sm:$0xff]  }
 0xa73   : > { %3246 = vmatprep.subr.bf16.mxu1 %v10452_v12  ;;  %v3337_v12 = vrot.slane %v3328_v10, %v11990_v0 }
 0xa76   : > { %3247 = vmatpush1.bf16.msra.mxu1 %v10450_v60  ;;  %v3707_v60 = vadd.f32 %v12019_v5, %v3337_v12  ;;  %v3059_v5 = vrot.slane %v3050_v24, %v11990_v0  ;;  %v10632_v12 = vld [vmem:[#allocation6 + $0x9f4] ss:$152 sps:$4 sm:$0xff]  }
 0xa77   : > { %3248 = vmatprep.subr.bf16.mxu1 %v10455_v16  ;;  %v3705_v16 = vadd.f32 %v12017_v3, %v3333_v15  ;;  %v10633_v15 = vld [vmem:[#allocation6 + $0xb20] ss:$152 sps:$4 sm:$0xff]  }
 0xa7a   : > { %3249 = vmatpush1.bf16.msra.mxu1 %v10453_v19 }
 0xa7b   : > { %3250 = vmatprep.subr.bf16.mxu1 %v10458_v21 }
 0xa7e   : > { %3251 = vmatpush1.bf16.msra.mxu1 %v10456_v25  ;;  %v3055_v25 = vrot.slane %v3050_v24, %v11977_v51  ;;  %v10642_v24 = vld [vmem:[#allocation6 + $0xeb0] ss:$152 sps:$4 sm:$0xff]  }
 0xa7f   : > { %3252 = vmatprep.subr.bf16.mxu1 %v10461_v18 }
 0xa82   : > { %3253 = vmatpush1.bf16.msra.mxu1 %v10459_v22 }
 0xa83   : > { %3711 = vmatprep.subr.bf16.mxu1 %v10464_v27  ;;  %v3341_v27 = vrot.slane %v3328_v10, %v12011_v45  ;;  %v10624_v10 = vld [vmem:[#allocation6 + $0x790] ss:$152 sps:$4 sm:$0xff]  }
 0xa85   : > { %3255 = vmatmul.mubr.bf16.vlgmr.msra.gmra.mrb[28].mxu1 %v11996_v6  ;;  %v10477_v6 = vld [vmem:[#allocation6 + $0x648] ss:$152 sps:$4 sm:$0xff]  }
 0xa86   : > { %3712 = vmatpush1.bf16.msra.mxu1 %v10462_v33  ;;  %3743 = vmatprep.mubr.bf16.mxu1 %v11963_v29  ;;  %v10482_v29 = vld [vmem:[#allocation6 + $0x77c] ss:$152 sps:$4 sm:$0xff]  }
 0xa87   : > { %3713 = vmatprep.subr.bf16.mxu1 %v10467_v34 }
 0xa8a   : > { %3714 = vmatpush1.bf16.msra.mxu1 %v10465_v35 }
 0xa8b   : > { %3715 = vmatprep.subr.bf16.mxu1 %v10470_v36 }
 0xa8e   : > { %3716 = vmatpush1.bf16.msra.mxu1 %v10468_v37 }
 0xa8f   : > { %3717 = vmatprep.subr.bf16.mxu1 %v10473_v39 }
 0xa92   : > { %3718 = vmatpush1.bf16.msra.mxu1 %v10471_v40 }
 0xa93   : > { %3719 = vmatprep.subr.bf16.mxu1 %v10476_v41 }
 0xa96   : > { %3720 = vmatpush1.bf16.msra.mxu1 %v10474_v43 }
 0xa97   : > { %3721 = vmatprep.subr.bf16.mxu1 %v10479_v44 }
 0xa9a   : > { %3722 = vmatpush1.bf16.msra.mxu1 %v10477_v6 }
 0xa9b   : > { %3723 = vmatprep.subr.bf16.mxu1 %v10482_v29 }
 0xa9e   : > { %3724 = vmatpush1.bf16.msra.mxu1 %v10480_v50 }
 0xa9f   : > { %3725 = vmatprep.subr.bf16.mxu1 %v10485_v53 }
 0xaa2   : > { %3726 = vmatpush1.bf16.msra.mxu1 %v10483_v54  ;;  %v10560_v54 = vld [vmem:[#allocation6 + $0x6c] ss:$152 sps:$4 sm:$0xff]  }
 0xaa3   : > { %3727 = vmatprep.subr.bf16.mxu1 %v10488_v56  ;;  %v10606_v56 = vld [vmem:[#allocation6 + $0x70] ss:$152 sps:$4 sm:$0xff]  }
 0xaa6   : > { %3728 = vmatpush1.bf16.msra.mxu1 %v10486_v57  ;;  %v10608_v57 = vld [vmem:[#allocation6 + $0x74] ss:$152 sps:$4 sm:$0xff]  }
 0xaa7   : > { %3729 = vmatprep.subr.bf16.mxu1 %v10491_v58  ;;  %v10611_v58 = vld [vmem:[#allocation6 + $0x1a4] ss:$152 sps:$4 sm:$0xff]   ;;  %4603 = vmatprep.subr.bf16.mxu0 %v10608_v57  ;;  %v10573_v57 = vld [vmem:[#allocation6 + $0x658] ss:$152 sps:$4 sm:$0xff]  }
 0xaaa   : > { %3730 = vmatpush1.bf16.msra.mxu1 %v10489_v59  ;;  %v10609_v59 = vld [vmem:[#allocation6 + $0x1a0] ss:$152 sps:$4 sm:$0xff]  }
 0xaab   : > { %3731 = vmatprep.subr.bf16.mxu1 %v10494_v62  ;;  %v10614_v62 = vld [vmem:[#allocation6 + $0x2d4] ss:$152 sps:$4 sm:$0xff]  }
 0xaae   : > { %3732 = vmatpush1.bf16.msra.mxu1 %v10492_v63  ;;  %v10612_v63 = vld [vmem:[#allocation6 + $0x2d0] ss:$152 sps:$4 sm:$0xff]  }
 0xaaf   : > { %3733 = vmatprep.subr.bf16.mxu1 %v10497_v1  ;;  %v10617_v1 = vld [vmem:[#allocation6 + $0x404] ss:$152 sps:$4 sm:$0xff]  }
 0xab2   : > { %3734 = vmatpush1.bf16.msra.mxu1 %v10495_v2  ;;  %v10615_v2 = vld [vmem:[#allocation6 + $0x400] ss:$152 sps:$4 sm:$0xff]  }
 0xab3   : > { %3735 = vmatprep.subr.bf16.mxu1 %v10500_v47  ;;  %v10620_v47 = vld [vmem:[#allocation6 + $0x534] ss:$152 sps:$4 sm:$0xff]  }
 0xab6   : > { %3736 = vmatpush1.bf16.msra.mxu1 %v10498_v7  ;;  %v10618_v7 = vld [vmem:[#allocation6 + $0x530] ss:$152 sps:$4 sm:$0xff]  }
 0xab7   : > { %3737 = vmatprep.subr.bf16.mxu1 %v10503_v8  ;;  %v10623_v8 = vld [vmem:[#allocation6 + $0x664] ss:$152 sps:$4 sm:$0xff]  }
 0xaba   : > { %3738 = vmatpush1.bf16.msra.mxu1 %v10501_v52  ;;  %v10621_v52 = vld [vmem:[#allocation6 + $0x660] ss:$152 sps:$4 sm:$0xff]  }
 0xabb   : > { %3739 = vmatprep.subr.bf16.mxu1 %v10506_v9  ;;  %v10626_v9 = vld [vmem:[#allocation6 + $0x794] ss:$152 sps:$4 sm:$0xff]  }
 0xabe   : > { %3740 = vmatpush1.bf16.msra.mxu1 %v10504_v11  ;;  %v10629_v11 = vld [vmem:[#allocation6 + $0x8c4] ss:$152 sps:$4 sm:$0xff]  }
 0xabf   : > { %3741 = vmatprep.subr.bf16.mxu1 %v10509_v61  ;;  %v10627_v61 = vld [vmem:[#allocation6 + $0x8c0] ss:$152 sps:$4 sm:$0xff]  }
 0xac2   : > { %3742 = vmatpush1.bf16.msra.mxu1 %v10507_v13  ;;  %v10630_v13 = vld [vmem:[#allocation6 + $0x9f0] ss:$152 sps:$4 sm:$0xff]  }
 0xac3   : > { %3752 = vmatprep.subr.mxu1 %v3707_v60  ;;  %v10635_v60 = vld [vmem:[#allocation6 + $0xb24] ss:$152 sps:$4 sm:$0xff]  }
 0xac5   : > { %3744 = vmatmul.mubr.bf16.vlgmr.msra.gmra.mrb[32].mxu1 %v11965_v31 }
 0xacb   : > { %3753 = vmatpush1.xpose.msra.mxu1 %v3705_v16  ;;  %v10638_v16 = vld [vmem:[#allocation6 + $0xc54] ss:$152 sps:$4 sm:$0xff]  }
 0xb18   : > { %v3012_v17 = vpop.f32.mrb[26].mxu1 }
 0xb19   : > { %v3014_v19 = vpop.f32.mrb[27].mxu1  ;;  %v3939_v21 = vpack.c.bf16 %v3012_v17, %v3012_v17  ;;  %v10636_v17 = vld [vmem:[#allocation6 + $0xc50] ss:$152 sps:$4 sm:$0xff]  }
 0xb1a   : > { %v3940_v20 = vpack.c.bf16 %v3014_v19, %v3014_v19  ;;  %v10641_v19 = vld [vmem:[#allocation6 + $0xd84] ss:$152 sps:$4 sm:$0xff]  }
 0xb1c   : > { %4146 = vmatprep.mubr.bf16.mxu0 %v3940_v20  ;;  %v10639_v20 = vld [vmem:[#allocation6 + $0xd80] ss:$152 sps:$4 sm:$0xff]  }
 0xb1d   : > { %4147 = vmatmul.mubr.bf16.vlgmr.msra.gmra.mrb[24].mxu0 %v3939_v21  ;;  %v10644_v21 = vld [vmem:[#allocation6 + $0xeb4] ss:$152 sps:$4 sm:$0xff]  }
 0xb1e   : > { %4635 = vmatprep.mubr.bf16.mxu0 %v11913_v14  ;;  %4604 = vmatpush1.bf16.msra.mxu0 %v10606_v56  ;;  %v10666_v56 = vld [vmem:[#allocation6 + $0x540] ss:$152 sps:$4 sm:$0xff]  }
 0xb1f   : > { %4605 = vmatprep.subr.bf16.mxu0 %v10611_v58  ;;  %v10671_v58 = vld [vmem:[#allocation6 + $0x674] ss:$152 sps:$4 sm:$0xff]  }
 0xb22   : > { %4606 = vmatpush1.bf16.msra.mxu0 %v10609_v59  ;;  %v10578_v59 = vld [vmem:[#allocation6 + $0x78c] ss:$152 sps:$4 sm:$0xff]  }
 0xb23   : > { %4607 = vmatprep.subr.bf16.mxu0 %v10614_v62  ;;  %v10669_v62 = vld [vmem:[#allocation6 + $0x670] ss:$152 sps:$4 sm:$0xff]  }
 0xb26   : > { %4608 = vmatpush1.bf16.msra.mxu0 %v10612_v63  ;;  %v10576_v63 = vld [vmem:[#allocation6 + $0x788] ss:$152 sps:$4 sm:$0xff]  }
 0xb27   : > { %4609 = vmatprep.subr.bf16.mxu0 %v10617_v1  ;;  %v10674_v1 = vld [vmem:[#allocation6 + $0x7a4] ss:$152 sps:$4 sm:$0xff]  }
 0xb2a   : > { %4610 = vmatpush1.bf16.msra.mxu0 %v10615_v2  ;;  %v10581_v2 = vld [vmem:[#allocation6 + $0x8bc] ss:$152 sps:$4 sm:$0xff]  }
 0xb2b   : > { %4611 = vmatprep.subr.bf16.mxu0 %v10620_v47  ;;  %v10672_v47 = vld [vmem:[#allocation6 + $0x7a0] ss:$152 sps:$4 sm:$0xff]  }
 0xb2e   : > { %4612 = vmatpush1.bf16.msra.mxu0 %v10618_v7  ;;  %v10579_v7 = vld [vmem:[#allocation6 + $0x8b8] ss:$152 sps:$4 sm:$0xff]  }
 0xb2f   : > { %4613 = vmatprep.subr.bf16.mxu0 %v10623_v8  ;;  %v10677_v8 = vld [vmem:[#allocation6 + $0x8d4] ss:$152 sps:$4 sm:$0xff]  }
 0xb32   : > { %4614 = vmatpush1.bf16.msra.mxu0 %v10621_v52  ;;  %v10584_v52 = vld [vmem:[#allocation6 + $0x9ec] ss:$152 sps:$4 sm:$0xff]  }
 0xb33   : > { %4615 = vmatprep.subr.bf16.mxu0 %v10626_v9  ;;  %v10675_v9 = vld [vmem:[#allocation6 + $0x8d0] ss:$152 sps:$4 sm:$0xff]  }
 0xb36   : > { %4616 = vmatpush1.bf16.msra.mxu0 %v10624_v10  ;;  %v10582_v10 = vld [vmem:[#allocation6 + $0x9e8] ss:$152 sps:$4 sm:$0xff]  }
 0xb37   : > { %4617 = vmatprep.subr.bf16.mxu0 %v10629_v11  ;;  %v10680_v11 = vld [vmem:[#allocation6 + $0xa04] ss:$152 sps:$4 sm:$0xff]  }
 0xb3a   : > { %4618 = vmatpush1.bf16.msra.mxu0 %v10627_v61  ;;  %v10587_v61 = vld [vmem:[#allocation6 + $0xb1c] ss:$152 sps:$4 sm:$0xff]  }
 0xb3b   : > { %4619 = vmatprep.subr.bf16.mxu0 %v10632_v12  ;;  %v10678_v12 = vld [vmem:[#allocation6 + $0xa00] ss:$152 sps:$4 sm:$0xff]  }
 0xb3e   : > { %4620 = vmatpush1.bf16.msra.mxu0 %v10630_v13  ;;  %v10585_v13 = vld [vmem:[#allocation6 + $0xb18] ss:$152 sps:$4 sm:$0xff]  }
 0xb3f   : > { %4621 = vmatprep.subr.bf16.mxu0 %v10635_v60  ;;  %v10683_v60 = vld [vmem:[#allocation6 + $0xb34] ss:$152 sps:$4 sm:$0xff]  }
 0xb42   : > { %4622 = vmatpush1.bf16.msra.mxu0 %v10633_v15  ;;  %v10590_v15 = vld [vmem:[#allocation6 + $0xc4c] ss:$152 sps:$4 sm:$0xff]  }
 0xb43   : > { %4623 = vmatprep.subr.bf16.mxu0 %v10638_v16  ;;  %v10681_v16 = vld [vmem:[#allocation6 + $0xb30] ss:$152 sps:$4 sm:$0xff]  }
 0xb46   : > { %4624 = vmatpush1.bf16.msra.mxu0 %v10636_v17  ;;  %v10588_v17 = vld [vmem:[#allocation6 + $0xc48] ss:$152 sps:$4 sm:$0xff]  }
 0xb47   : > { %4625 = vmatprep.subr.bf16.mxu0 %v10641_v19  ;;  %v10686_v19 = vld [vmem:[#allocation6 + $0xc64] ss:$152 sps:$4 sm:$0xff]  }
 0xb4a   : > { %4626 = vmatpush1.bf16.msra.mxu0 %v10639_v20  ;;  %v10593_v20 = vld [vmem:[#allocation6 + $0xd7c] ss:$152 sps:$4 sm:$0xff]  }
 0xb4b   : > { %4627 = vmatprep.subr.bf16.mxu0 %v10644_v21  ;;  %v10684_v21 = vld [vmem:[#allocation6 + $0xc60] ss:$152 sps:$4 sm:$0xff]  }
 0xb4e   : > { %4628 = vmatpush1.bf16.msra.mxu0 %v10642_v24  ;;  %v10591_v24 = vld [vmem:[#allocation6 + $0xd78] ss:$152 sps:$4 sm:$0xff]  }
 0xb58   : > { %v3256_v28 = vpop.f32.mrb[28].mxu1 }
 0xb59   : > { %v3258_v18 = vpop.f32.mrb[29].mxu1  ;;  %v3257_v22 = vadd.f32 %v3256_v28, %v3055_v25  ;;  %v10645_v28 = vld [vmem:[#allocation6 + $0xfe0] ss:$152 sps:$4 sm:$0xff]  }
 0xb5a   : > { %v3259_v23 = vadd.f32 %v3258_v18, %v3059_v5  ;;  %v3260_v31 = vpop.f32.mrb[30].mxu1  ;;  %v10647_v5 = vld [vmem:[#allocation6 + $0xfe4] ss:$152 sps:$4 sm:$0xff]   ;;  %v10650_v18 = vld [vmem:[#allocation6 + $0x1114] ss:$152 sps:$4 sm:$0xff]  }
 0xb5b   : > { %v3261_v3 = vpop.f32.mrb[31].mxu1  ;;  %4629 = vmatprep.subr.bf16.mxu0 %v10647_v5  ;;  %v10653_v31 = vld [vmem:[#allocation6 + $0x1244] ss:$152 sps:$4 sm:$0xff]   ;;  %v10689_v5 = vld [vmem:[#allocation6 + $0xd94] ss:$152 sps:$4 sm:$0xff]  }
 0xb5c   : > { %3816 = vmatprep.mubr.f32.mxu1 %v3259_v23  ;;  %4630 = vmatpush1.bf16.msra.mxu0 %v10645_v28  ;;  %v10648_v23 = vld [vmem:[#allocation6 + $0x1110] ss:$152 sps:$4 sm:$0xff]  }
 0xb5d   : > { %3817 = vmatmul.mubr.f32.vlgmr.msra.gmra.mrb[36].mxu1 %v3257_v22  ;;  %4631 = vmatprep.subr.bf16.mxu0 %v10650_v18  ;;  %v10651_v22 = vld [vmem:[#allocation6 + $0x1240] ss:$152 sps:$4 sm:$0xff]   ;;  %v10687_v28 = vld [vmem:[#allocation6 + $0xd90] ss:$152 sps:$4 sm:$0xff]  }
 0xb5e   : > { %3900 = vmatprep.mubr.f32.mxu1 %v11607_v48  ;;  %v10594_v18 = vld [vmem:[#allocation6 + $0xea8] ss:$152 sps:$4 sm:$0xff]  }
 0xb60   : > { %4632 = vmatpush1.bf16.msra.mxu0 %v10648_v23  ;;  %v10692_v23 = vld [vmem:[#allocation6 + $0xec4] ss:$152 sps:$4 sm:$0xff]  }
 0xb61   : > { %4633 = vmatprep.subr.bf16.mxu0 %v10653_v31  ;;  %v10599_v31 = vld [vmem:[#allocation6 + $0xfdc] ss:$152 sps:$4 sm:$0xff]  }
 0xb64   : > { %4634 = vmatpush1.bf16.msra.mxu0 %v10651_v22  ;;  %v10690_v22 = vld [vmem:[#allocation6 + $0xec0] ss:$152 sps:$4 sm:$0xff]  }
 0xb67   : > { %4636 = vmatmul.mubr.bf16.vlgmr.msra.gmra.mrb[28].mxu0 %v11917_v55 }
 0xb98   : > { %v3745_v32 = vpop.f32.mrb[32].mxu1 }
 0xb99   : > { %v3747_v33 = vpop.f32.mrb[33].mxu1  ;;  %v3746_v35 = vadd.f32 %v3745_v32, %v3341_v27  ;;  %v10563_v32 = vld [vmem:[#allocation6 + $0x19c] ss:$152 sps:$4 sm:$0xff]  }
 0xb9a   : > { %v3748_v34 = vadd.f32 %v3747_v33, %v3345_v26  ;;  %v3749_v4 = vpop.f32.mrb[34].mxu1  ;;  %v10558_v26 = vld [vmem:[#allocation6 + $0x68] ss:$152 sps:$4 sm:$0xff]   ;;  %v10656_v33 = vld [vmem:[#allocation6 + $0x84] ss:$152 sps:$4 sm:$0xff]  }
 0xb9b   : > { %v3750_v36 = vpop.f32.mrb[35].mxu1  ;;  %v10561_v4 = vld [vmem:[#allocation6 + $0x198] ss:$152 sps:$4 sm:$0xff]   ;;  %5252 = vmatprep.subr.bf16.mxu0 %v10656_v33  ;;  %v10600_v33 = vld [vmem:[#allocation6 + $0x1108] ss:$152 sps:$4 sm:$0xff]  }
 0xb9c   : > { %3836 = vmatprep.subr.mxu1 %v3748_v34  ;;  %v10654_v34 = vld [vmem:[#allocation6 + $0x80] ss:$152 sps:$4 sm:$0xff]   ;;  %v10566_v36 = vld [vmem:[#allocation6 + $0x2cc] ss:$152 sps:$4 sm:$0xff]  }
 0xb9d   : > { %3837 = vmatpush1.msra.mxu1 %v3746_v35  ;;  %v10659_v35 = vld [vmem:[#allocation6 + $0x1b4] ss:$152 sps:$4 sm:$0xff]   ;;  %5253 = vmatpush1.bf16.msra.mxu0 %v10654_v34  ;;  %v10698_v34 = vld [vmem:[#allocation6 + $0x1124] ss:$152 sps:$4 sm:$0xff]  }
 0xb9e   : > { %4562 = vmatprep.subr.bf16.mxu1 %v10560_v54  ;;  %5254 = vmatprep.subr.bf16.mxu0 %v10659_v35  ;;  %v10575_v54 = vld [vmem:[#allocation6 + $0x65c] ss:$152 sps:$4 sm:$0xff]   ;;  %v3942_v35 = vld [vmem:[#allocation8 + $0x4] ss:$8 sm:$0x3] }
 0xbf0   : > { %v12038_v37 = vpop.f32.mrb[24].mxu0 }
 0xbf1   : > { %v12040_v39 = vpop.f32.mrb[25].mxu0 }
 0xbf2   : > { %v4152_v40 = vpop.f32.mrb[26].mxu0 }
 0xbf3   : > { %v4153_v41 = vpop.f32.mrb[27].mxu0  ;;  %v10657_v40 = vld [vmem:[#allocation6 + $0x1b0] ss:$152 sps:$4 sm:$0xff]  }
 0xbf4   : > { %v10564_v41 = vld [vmem:[#allocation6 + $0x2c8] ss:$152 sps:$4 sm:$0xff]   ;;  %5255 = vmatpush1.bf16.msra.mxu0 %v10657_v40  ;;  %v10603_v40 = vld [vmem:[#allocation6 + $0x1238] ss:$152 sps:$4 sm:$0xff]  }
 0xc30   : > { %v3818_v43 = vpop.f32.mrb[36].mxu1 }
 0xc31   : > { %v3820_v44 = vpop.f32.mrb[37].mxu1  ;;  %v3822_v6 = vsel %vm1883_vm0, %v3818_v43, -inf }
 0xc32   : > { %3823 = vmax.xlane.f32.xlu0 %v3822_v6  ;;  %v10569_v44 = vld [vmem:[#allocation6 + $0x3fc] ss:$152 sps:$4 sm:$0xff]   ;;  %v10660_v6 = vld [vmem:[#allocation6 + $0x2e0] ss:$152 sps:$4 sm:$0xff]  }
 0xcbf   : > { %v3824_v29 = vpop.xlane.xlu0 %3823 }
 0xcc0   : > { %v3825_v46 = vsub.f32 %v3818_v43, %v3824_v29  ;;  %v10662_v43 = vld [vmem:[#allocation6 + $0x2e4] ss:$152 sps:$4 sm:$0xff]   ;;  %v10567_v29 = vld [vmem:[#allocation6 + $0x3f8] ss:$152 sps:$4 sm:$0xff]  }
 0xcc1   : > { %5256 = vmatprep.subr.bf16.mxu0 %v10662_v43 }
 0xcc2   : > { %v3826_v49 = vmul.f32 1.442695, %v3825_v46  ;;  %v10572_v46 = vld [vmem:[#allocation6 + $0x52c] ss:$152 sps:$4 sm:$0xff]   ;;  %5257 = vmatpush1.bf16.msra.mxu0 %v10660_v6  ;;  %v10699_v6 = vld [vmem:[#allocation6 + $0x1250] ss:$152 sps:$4 sm:$0xff]  }
 0xcc4   : > { %10858 = vpow2.f32 %v3826_v49  ;;  %v10663_v49 = vld [vmem:[#allocation6 + $0x410] ss:$152 sps:$4 sm:$0xff]  }
 0xcce   : > { %v12043_v50 = vpop.eup %10858 }
 0xccf   : > { %v3828_v53 = vsel %vm1883_vm0, %v12043_v50, 0.0 }
 0xcd0   : > { %3829 = vadd.xlane.f32.xlu1 %v3828_v53  ;;  %v10668_v53 = vld [vmem:[#allocation6 + $0x544] ss:$152 sps:$4 sm:$0xff]  }
 0xd5d   : > { %v3830_v25 = vpop.xlane.xlu1 %3829 }
 0xd5e   : > { %10860 = vrcp.f32 %v3830_v25  ;;  %v10596_v25 = vld [vmem:[#allocation6 + $0xeac] ss:$152 sps:$4 sm:$0xff]  }
 0xd68   : > { %v10861_v3 = vpop.eup %10860 }
 0xd69   : > { %v3832_v27 = vmul.f32 %v10861_v3, %v12043_v50  ;;  %v10570_v50 = vld [vmem:[#allocation6 + $0x528] ss:$152 sps:$4 sm:$0xff]   ;;  %v10597_v3 = vld [vmem:[#allocation6 + $0xfd8] ss:$152 sps:$4 sm:$0xff]  }
 0xd6b   : > { %9219 = vmatmul.mubr.msk.f32.vlgmr.msra.gmra.mrb[38].mxu1 %vm1883_vm0, %v3832_v27  ;;  %v10602_v27 = vld [vmem:[#allocation6 + $0x110c] ss:$152 sps:$4 sm:$0xff]  }
 0xd6c   : > { %4563 = vmatpush1.bf16.msra.mxu1 %v10558_v26  ;;  %4594 = vmatprep.mubr.bf16.mxu1 %v11913_v14  ;;  %v10665_v14 = vld [vmem:[#allocation6 + $0x414] ss:$152 sps:$4 sm:$0xff]  }
 0xd6d   : > { %4564 = vmatprep.subr.bf16.mxu1 %v10563_v32  ;;  %5258 = vmatprep.subr.bf16.mxu0 %v10665_v14  ;;  %v10695_v26 = vld [vmem:[#allocation6 + $0xff4] ss:$152 sps:$4 sm:$0xff]   ;;  %v10693_v32 = vld [vmem:[#allocation6 + $0xff0] ss:$152 sps:$4 sm:$0xff]  }
 0xd6e   : > { %5259 = vmatpush1.bf16.msra.mxu0 %v10663_v49 }
 0xd6f   : > { %5260 = vmatprep.subr.bf16.mxu0 %v10668_v53 }
 0xd70   : > { %4565 = vmatpush1.bf16.msra.mxu1 %v10561_v4  ;;  %v10605_v4 = vld [vmem:[#allocation6 + $0x123c] ss:$152 sps:$4 sm:$0xff]  }
 0xd71   : > { %4566 = vmatprep.subr.bf16.mxu1 %v10566_v36  ;;  %v10696_v36 = vld [vmem:[#allocation6 + $0x1120] ss:$152 sps:$4 sm:$0xff]  }
 0xd72   : > { %5261 = vmatpush1.bf16.msra.mxu0 %v10666_v56 }
 0xd73   : > { %5262 = vmatprep.subr.bf16.mxu0 %v10671_v58 }
 0xd74   : > { %4567 = vmatpush1.bf16.msra.mxu1 %v10564_v41  ;;  %v3951_v41 = vrot.slane %v3942_v35, %v11990_v0 }
 0xd75   : > { %4568 = vmatprep.subr.bf16.mxu1 %v10569_v44  ;;  %v10701_v44 = vld [vmem:[#allocation6 + $0x1254] ss:$152 sps:$4 sm:$0xff]  }
 0xd76   : > { %5263 = vmatpush1.bf16.msra.mxu0 %v10669_v62  ;;  %v4151_v43 = vadd.f32 %v12040_v39, %v3951_v41  ;;  %v10728_v41 = vld [vmem:[#allocation6 + $0x9fc] ss:$152 sps:$4 sm:$0xff]  }
 0xd77   : > { %5264 = vmatprep.subr.bf16.mxu0 %v10674_v1  ;;  %v3947_v1 = vrot.slane %v3942_v35, %v11977_v51  ;;  %v10722_v35 = vld [vmem:[#allocation6 + $0x79c] ss:$152 sps:$4 sm:$0xff]  }
 0xd78   : > { %4569 = vmatpush1.bf16.msra.mxu1 %v10567_v29 }
 0xd79   : > { %4570 = vmatprep.subr.bf16.mxu1 %v10572_v46 }
 0xd7a   : > { %5265 = vmatpush1.bf16.msra.mxu0 %v10672_v47 }
 0xd7b   : > { %5266 = vmatprep.subr.bf16.mxu0 %v10677_v8 }
 0xd7c   : > { %4571 = vmatpush1.bf16.msra.mxu1 %v10570_v50  ;;  %v4637_v50 = vpop.f32.mrb[28].mxu0 }
 0xd7d   : > { %4572 = vmatprep.subr.bf16.mxu1 %v10575_v54  ;;  %v4639_v53 = vpop.f32.mrb[29].mxu0 }
 0xd7e   : > { %5267 = vmatpush1.bf16.msra.mxu0 %v10675_v9  ;;  %v4641_v54 = vpop.f32.mrb[30].mxu0 }
 0xd7f   : > { %5268 = vmatprep.subr.bf16.mxu0 %v10680_v11  ;;  %v4642_v56 = vpop.f32.mrb[31].mxu0  ;;  %v10743_v54 = vld [vmem:[#allocation6 + $0xfec] ss:$152 sps:$4 sm:$0xff]  }
 0xd80   : > { %4573 = vmatpush1.bf16.msra.mxu1 %v10573_v57  ;;  %v4220_v57 = vld [vmem:[#allocation8 + $0x5] ss:$8 sm:$0xf]  ;;  %v10741_v56 = vld [vmem:[#allocation6 + $0xfe8] ss:$152 sps:$4 sm:$0xff]  }
 0xd81   : > { %4574 = vmatprep.subr.bf16.mxu1 %v10578_v59  ;;  %v4229_v39 = vrot.slane %v4220_v57, %v11990_v0  ;;  %v4225_v58 = vrot.slane %v4220_v57, %v11977_v51 }
 0xd82   : > { %5269 = vmatpush1.bf16.msra.mxu0 %v10678_v12 }
 0xd83   : > { %5270 = vmatprep.subr.bf16.mxu0 %v10683_v60 }
 0xd84   : > { %4575 = vmatpush1.bf16.msra.mxu1 %v10576_v63  ;;  %v4233_v63 = vrot.slane %v4220_v57, %v12011_v45 }
 0xd85   : > { %4576 = vmatprep.subr.bf16.mxu1 %v10581_v2 }
 0xd86   : > { %5271 = vmatpush1.bf16.msra.mxu0 %v10681_v16  ;;  %v4638_v9 = vadd.f32 %v4637_v50, %v4233_v63  ;;  %v10740_v50 = vld [vmem:[#allocation6 + $0xebc] ss:$152 sps:$4 sm:$0xff]   ;;  %v10753_v63 = vld [vmem:[#allocation6 + $0x90] ss:$152 sps:$4 sm:$0xff]  }
 0xd87   : > { %5272 = vmatprep.subr.bf16.mxu0 %v10686_v19 }
 0xd88   : > { %4577 = vmatpush1.bf16.msra.mxu1 %v10579_v7 }
 0xd89   : > { %4578 = vmatprep.subr.bf16.mxu1 %v10584_v52 }
 0xd8a   : > { %5273 = vmatpush1.bf16.msra.mxu0 %v10684_v21 }
 0xd8b   : > { %5274 = vmatprep.subr.bf16.mxu0 %v10689_v5 }
 0xd8c   : > { %4579 = vmatpush1.bf16.msra.mxu1 %v10582_v10  ;;  %v4149_v10 = vadd.f32 %v12038_v37, %v3947_v1  ;;  %v10755_v1 = vld [vmem:[#allocation6 + $0x94] ss:$152 sps:$4 sm:$0xff]  }
 0xd8d   : > { %4580 = vmatprep.subr.bf16.mxu1 %v10587_v61 }
 0xd8e   : > { %5275 = vmatpush1.bf16.msra.mxu0 %v10687_v28  ;;  %v10702_v28 = vld [vmem:[#allocation6 + $0x78] ss:$152 sps:$4 sm:$0xff]  }
 0xd8f   : > { %5276 = vmatprep.subr.bf16.mxu0 %v10692_v23  ;;  %v10707_v23 = vld [vmem:[#allocation6 + $0x1ac] ss:$152 sps:$4 sm:$0xff]  }
 0xd90   : > { %4581 = vmatpush1.bf16.msra.mxu1 %v10585_v13 }
 0xd91   : > { %4582 = vmatprep.subr.bf16.mxu1 %v10590_v15 }
 0xd92   : > { %5277 = vmatpush1.bf16.msra.mxu0 %v10690_v22  ;;  %v10710_v22 = vld [vmem:[#allocation6 + $0x2dc] ss:$152 sps:$4 sm:$0xff]  }
 0xd93   : > { %5278 = vmatprep.subr.bf16.mxu0 %v10695_v26  ;;  %v10713_v26 = vld [vmem:[#allocation6 + $0x40c] ss:$152 sps:$4 sm:$0xff]  }
 0xd94   : > { %4583 = vmatpush1.bf16.msra.mxu1 %v10588_v17 }
 0xd95   : > { %4584 = vmatprep.subr.bf16.mxu1 %v10593_v20 }
 0xd96   : > { %5279 = vmatpush1.bf16.msra.mxu0 %v10693_v32  ;;  %v10716_v32 = vld [vmem:[#allocation6 + $0x53c] ss:$152 sps:$4 sm:$0xff]  }
 0xd97   : > { %5280 = vmatprep.subr.bf16.mxu0 %v10698_v34  ;;  %v10719_v34 = vld [vmem:[#allocation6 + $0x66c] ss:$152 sps:$4 sm:$0xff]  }
 0xd98   : > { %4585 = vmatpush1.bf16.msra.mxu1 %v10591_v24  ;;  %v10704_v24 = vld [vmem:[#allocation6 + $0x7c] ss:$152 sps:$4 sm:$0xff]  }
 0xd99   : > { %4586 = vmatprep.subr.bf16.mxu1 %v10596_v25 }
 0xd9a   : > { %5281 = vmatpush1.bf16.msra.mxu0 %v10696_v36  ;;  %v10725_v36 = vld [vmem:[#allocation6 + $0x8cc] ss:$152 sps:$4 sm:$0xff]  }
 0xd9b   : > { %5282 = vmatprep.subr.bf16.mxu0 %v10701_v44  ;;  %v10731_v44 = vld [vmem:[#allocation6 + $0xb2c] ss:$152 sps:$4 sm:$0xff]  }
 0xd9c   : > { %4587 = vmatpush1.bf16.msra.mxu1 %v10594_v18 }
 0xd9d   : > { %4588 = vmatprep.subr.bf16.mxu1 %v10599_v31  ;;  %v10705_v31 = vld [vmem:[#allocation6 + $0x1a8] ss:$152 sps:$4 sm:$0xff]  }
 0xd9e   : > { %5283 = vmatpush1.bf16.msra.mxu0 %v10699_v6  ;;  %v10729_v6 = vld [vmem:[#allocation6 + $0xb28] ss:$152 sps:$4 sm:$0xff]  }
 0xd9f   : > { %5743 = vmatprep.subr.bf16.mxu0 %v10755_v1  ;;  %v10842_v1 = vld [vmem:[#allocation6 + $0x125c] ss:$152 sps:$4 sm:$0xff]  }
 0xda0   : > { %4589 = vmatpush1.bf16.msra.mxu1 %v10597_v3  ;;  %v10708_v3 = vld [vmem:[#allocation6 + $0x2d8] ss:$152 sps:$4 sm:$0xff]  }
 0xda1   : > { %4590 = vmatprep.subr.bf16.mxu1 %v10602_v27  ;;  %v10711_v27 = vld [vmem:[#allocation6 + $0x408] ss:$152 sps:$4 sm:$0xff]  }
 0xda4   : > { %4591 = vmatpush1.bf16.msra.mxu1 %v10600_v33  ;;  %v10714_v33 = vld [vmem:[#allocation6 + $0x538] ss:$152 sps:$4 sm:$0xff]  }
 0xda5   : > { %4592 = vmatprep.subr.bf16.mxu1 %v10605_v4  ;;  %v10717_v4 = vld [vmem:[#allocation6 + $0x668] ss:$152 sps:$4 sm:$0xff]  }
 0xda8   : > { %4593 = vmatpush1.bf16.msra.mxu1 %v10603_v40  ;;  %v10723_v40 = vld [vmem:[#allocation6 + $0x8c8] ss:$152 sps:$4 sm:$0xff]  }
 0xdab   : > { %4595 = vmatmul.mubr.bf16.vlgmr.msra.gmra.mrb[40].mxu1 %v11917_v55  ;;  %v4237_v55 = vrot.slane %v4220_v57, %v12006_v42  ;;  %v10746_v57 = vld [vmem:[#allocation6 + $0x111c] ss:$152 sps:$4 sm:$0xff]  }
 0xdac   : > { %4708 = vmatprep.mubr.f32.mxu1 %v4151_v43  ;;  %v10726_v43 = vld [vmem:[#allocation6 + $0x9f8] ss:$152 sps:$4 sm:$0xff]  }
 0xdad   : > { %v4640_v7 = vadd.f32 %v4639_v53, %v4237_v55  ;;  %v10738_v53 = vld [vmem:[#allocation6 + $0xeb8] ss:$152 sps:$4 sm:$0xff]   ;;  %v10749_v55 = vld [vmem:[#allocation6 + $0x124c] ss:$152 sps:$4 sm:$0xff]  }
 0xe3e   : > { %v3902_v29 = vpop.f32.mrb[38].mxu1 }
 0xe3f   : > { %v3904_v14 = vpop.f32.mrb[39].mxu1  ;;  %v5077_v49 = vpack.c.bf16 %v3902_v29, %v3902_v29  ;;  %v10734_v29 = vld [vmem:[#allocation6 + $0xc5c] ss:$152 sps:$4 sm:$0xff]  }
 0xe40   : > { %v5078_v46 = vpack.c.bf16 %v3904_v14, %v3904_v14  ;;  %v10732_v14 = vld [vmem:[#allocation6 + $0xc58] ss:$152 sps:$4 sm:$0xff]  }
 0xe42   : > { %5284 = vmatprep.mubr.bf16.mxu0 %v5078_v46  ;;  %v10737_v46 = vld [vmem:[#allocation6 + $0xd8c] ss:$152 sps:$4 sm:$0xff]  }
 0xe43   : > { %5285 = vmatmul.mubr.bf16.vlgmr.msra.gmra.mrb[32].mxu0 %v5077_v49  ;;  %v10735_v49 = vld [vmem:[#allocation6 + $0xd88] ss:$152 sps:$4 sm:$0xff]  }
 0xe44   : > { %5744 = vmatpush1.bf16.msra.mxu0 %v10753_v63  ;;  %v10837_v63 = vld [vmem:[#allocation6 + $0x1130] ss:$152 sps:$4 sm:$0xff]  }
 0xe7e   : > { %v4596_v59 = vpop.f32.mrb[40].mxu1 }
 0xe7f   : > { %v4598_v62 = vpop.f32.mrb[41].mxu1  ;;  %v4597_v8 = vadd.f32 %v4596_v59, %v4225_v58  ;;  %v10747_v58 = vld [vmem:[#allocation6 + $0x1248] ss:$152 sps:$4 sm:$0xff]  }
 0xe80   : > { %v4599_v2 = vadd.f32 %v4598_v62, %v4229_v39  ;;  %v4600_v47 = vpop.f32.mrb[42].mxu1  ;;  %v10744_v39 = vld [vmem:[#allocation6 + $0x1118] ss:$152 sps:$4 sm:$0xff]   ;;  %v10750_v59 = vld [vmem:[#allocation6 + $0x88] ss:$152 sps:$4 sm:$0xff]  }
 0xe81   : > { %v4601_v52 = vpop.f32.mrb[43].mxu1  ;;  %v10752_v62 = vld [vmem:[#allocation6 + $0x8c] ss:$152 sps:$4 sm:$0xff]  }
 0xe82   : > { %4644 = vmatprep.subr.mxu1 %v4599_v2  ;;  %v10758_v2 = vld [vmem:[#allocation6 + $0x1bc] ss:$152 sps:$4 sm:$0xff]   ;;  %v10764_v52 = vld [vmem:[#allocation6 + $0x2ec] ss:$152 sps:$4 sm:$0xff]  }
 0xe83   : > { %4645 = vmatpush1.xpose.msra.mxu1 %v4597_v8  ;;  %v10761_v47 = vld [vmem:[#allocation6 + $0x1c4] ss:$152 sps:$4 sm:$0xff]   ;;  %v10759_v8 = vld [vmem:[#allocation6 + $0x1c0] ss:$152 sps:$4 sm:$0xff]  }
 0xe84   : > { %4728 = vmatprep.subr.mxu1 %v4640_v7  ;;  %v10756_v7 = vld [vmem:[#allocation6 + $0x1b8] ss:$152 sps:$4 sm:$0xff]   ;;  %5745 = vmatprep.subr.bf16.mxu0 %v10761_v47 }
 0xe85   : > { %5746 = vmatpush1.bf16.msra.mxu0 %v10759_v8  ;;  %v10840_v47 = vld [vmem:[#allocation6 + $0x1258] ss:$152 sps:$4 sm:$0xff]  }
 0xe86   : > { %4709 = vmatmul.mubr.f32.vlgmr.msra.gmra.mrb[44].mxu1 %v4149_v10  ;;  %v10762_v10 = vld [vmem:[#allocation6 + $0x2e8] ss:$152 sps:$4 sm:$0xff]  }
 0xe87   : > { %4729 = vmatpush1.msra.mxu1 %v4638_v9  ;;  %4792 = vmatprep.mubr.f32.mxu1 %v11607_v48  ;;  %v10767_v9 = vld [vmem:[#allocation6 + $0x2f4] ss:$152 sps:$4 sm:$0xff]  }
 0xe88   : > { %5004 = vmatprep.subr.bf16.mxu1 %v10704_v24  ;;  %5747 = vmatprep.subr.bf16.mxu0 %v10767_v9  ;;  %v10780_v24 = vld [vmem:[#allocation6 + $0x678] ss:$152 sps:$4 sm:$0xff]   ;;  %v4832_v9 = vld [vmem:[#allocation8 + $0x6] ss:$8 sm:$0x3] }
 0xf16   : > { %v12061_v11 = vpop.f32.mrb[32].mxu0 }
 0xf17   : > { %v12063_v61 = vpop.f32.mrb[33].mxu0 }
 0xf18   : > { %v5290_v12 = vpop.f32.mrb[34].mxu0 }
 0xf19   : > { %v5291_v13 = vpop.f32.mrb[35].mxu0  ;;  %v10770_v12 = vld [vmem:[#allocation6 + $0x41c] ss:$152 sps:$4 sm:$0xff]  }
 0xf1a   : > { %v10773_v13 = vld [vmem:[#allocation6 + $0x424] ss:$152 sps:$4 sm:$0xff]  }
 0xf59   : > { %v4710_v60 = vpop.f32.mrb[44].mxu1 }
 0xf5a   : > { %v4712_v15 = vpop.f32.mrb[45].mxu1  ;;  %v4714_v16 = vsel %vm1883_vm0, %v4710_v60, -inf }
 0xf5b   : > { %4715 = vmax.xlane.f32.xlu0 %v4714_v16  ;;  %v10771_v15 = vld [vmem:[#allocation6 + $0x420] ss:$152 sps:$4 sm:$0xff]   ;;  %v10776_v16 = vld [vmem:[#allocation6 + $0x54c] ss:$152 sps:$4 sm:$0xff]  }
 0xfe8   : > { %v4716_v17 = vpop.xlane.xlu0 %4715 }
 0xfe9   : > { %v4717_v19 = vsub.f32 %v4710_v60, %v4716_v17  ;;  %v10768_v60 = vld [vmem:[#allocation6 + $0x418] ss:$152 sps:$4 sm:$0xff]   ;;  %v10779_v17 = vld [vmem:[#allocation6 + $0x554] ss:$152 sps:$4 sm:$0xff]  }
 0xfeb   : > { %v4718_v20 = vmul.f32 1.442695, %v4717_v19  ;;  %v10774_v19 = vld [vmem:[#allocation6 + $0x548] ss:$152 sps:$4 sm:$0xff]  }
 0xfed   : > { %10862 = vpow2.f32 %v4718_v20  ;;  %v10777_v20 = vld [vmem:[#allocation6 + $0x550] ss:$152 sps:$4 sm:$0xff]  }
 0xff7   : > { %v10863_v37 = vpop.eup %10862 }
 0xff8   : > { %v4720_v21 = vsel %vm1883_vm0, %v10863_v37, 0.0 }
 0xff9   : > { %4721 = vadd.xlane.f32.xlu1 %v4720_v21  ;;  %v10785_v21 = vld [vmem:[#allocation6 + $0x684] ss:$152 sps:$4 sm:$0xff]  }
0x1086   : > { %v4722_v5 = vpop.xlane.xlu1 %4721 }
0x1087   : > { %10864 = vrcp.f32 %v4722_v5  ;;  %v10783_v5 = vld [vmem:[#allocation6 + $0x680] ss:$152 sps:$4 sm:$0xff]  }
0x1091   : > { %v10865_v25 = vpop.eup %10864 }
0x1092   : > { %v4724_v18 = vmul.f32 %v10865_v25, %v10863_v37  ;;  %v10782_v37 = vld [vmem:[#allocation6 + $0x67c] ss:$152 sps:$4 sm:$0xff]   ;;  %v10788_v25 = vld [vmem:[#allocation6 + $0x7ac] ss:$152 sps:$4 sm:$0xff]  }
0x1094   : > { %9316 = vmatmul.mubr.msk.f32.vlgmr.msra.gmra.mrb[46].mxu1 %vm1883_vm0, %v4724_v18  ;;  %v10786_v18 = vld [vmem:[#allocation6 + $0x7a8] ss:$152 sps:$4 sm:$0xff]  }
0x1095   : > { %5005 = vmatpush1.bf16.msra.mxu1 %v10702_v28  ;;  %5036 = vmatprep.mubr.bf16.mxu1 %v11925_v38  ;;  %v10720_v38 = vld [vmem:[#allocation6 + $0x798] ss:$152 sps:$4 sm:$0xff]   ;;  %v10791_v28 = vld [vmem:[#allocation6 + $0x7b4] ss:$152 sps:$4 sm:$0xff]  }
0x1096   : > { %5006 = vmatprep.subr.bf16.mxu1 %v10707_v23  ;;  %v10789_v23 = vld [vmem:[#allocation6 + $0x7b0] ss:$152 sps:$4 sm:$0xff]  }
0x1099   : > { %5007 = vmatpush1.bf16.msra.mxu1 %v10705_v31  ;;  %v10794_v31 = vld [vmem:[#allocation6 + $0x8dc] ss:$152 sps:$4 sm:$0xff]  }
0x109a   : > { %5008 = vmatprep.subr.bf16.mxu1 %v10710_v22  ;;  %v10797_v22 = vld [vmem:[#allocation6 + $0x8e4] ss:$152 sps:$4 sm:$0xff]  }
0x109d   : > { %5009 = vmatpush1.bf16.msra.mxu1 %v10708_v3  ;;  %v10792_v3 = vld [vmem:[#allocation6 + $0x8d8] ss:$152 sps:$4 sm:$0xff]  }
0x109e   : > { %5010 = vmatprep.subr.bf16.mxu1 %v10713_v26  ;;  %v10795_v26 = vld [vmem:[#allocation6 + $0x8e0] ss:$152 sps:$4 sm:$0xff]  }
0x10a1   : > { %5011 = vmatpush1.bf16.msra.mxu1 %v10711_v27  ;;  %v10800_v27 = vld [vmem:[#allocation6 + $0xa0c] ss:$152 sps:$4 sm:$0xff]  }
0x10a2   : > { %5012 = vmatprep.subr.bf16.mxu1 %v10716_v32  ;;  %v10803_v32 = vld [vmem:[#allocation6 + $0xa14] ss:$152 sps:$4 sm:$0xff]  }
0x10a5   : > { %5013 = vmatpush1.bf16.msra.mxu1 %v10714_v33  ;;  %v10798_v33 = vld [vmem:[#allocation6 + $0xa08] ss:$152 sps:$4 sm:$0xff]  }
0x10a6   : > { %5014 = vmatprep.subr.bf16.mxu1 %v10719_v34  ;;  %v10801_v34 = vld [vmem:[#allocation6 + $0xa10] ss:$152 sps:$4 sm:$0xff]  }
0x10a9   : > { %5015 = vmatpush1.bf16.msra.mxu1 %v10717_v4  ;;  %v10806_v4 = vld [vmem:[#allocation6 + $0xb3c] ss:$152 sps:$4 sm:$0xff]  }
0x10aa   : > { %5016 = vmatprep.subr.bf16.mxu1 %v10722_v35  ;;  %v10809_v35 = vld [vmem:[#allocation6 + $0xb44] ss:$152 sps:$4 sm:$0xff]  }
0x10ad   : > { %5017 = vmatpush1.bf16.msra.mxu1 %v10720_v38  ;;  %v10804_v38 = vld [vmem:[#allocation6 + $0xb38] ss:$152 sps:$4 sm:$0xff]  }
0x10ae   : > { %5018 = vmatprep.subr.bf16.mxu1 %v10725_v36  ;;  %v10807_v36 = vld [vmem:[#allocation6 + $0xb40] ss:$152 sps:$4 sm:$0xff]  }
0x10b1   : > { %5019 = vmatpush1.bf16.msra.mxu1 %v10723_v40  ;;  %v10812_v40 = vld [vmem:[#allocation6 + $0xc6c] ss:$152 sps:$4 sm:$0xff]  }
0x10b2   : > { %5020 = vmatprep.subr.bf16.mxu1 %v10728_v41  ;;  %v10815_v41 = vld [vmem:[#allocation6 + $0xc74] ss:$152 sps:$4 sm:$0xff]  }
0x10b5   : > { %5021 = vmatpush1.bf16.msra.mxu1 %v10726_v43  ;;  %v10810_v43 = vld [vmem:[#allocation6 + $0xc68] ss:$152 sps:$4 sm:$0xff]  }
0x10b6   : > { %5022 = vmatprep.subr.bf16.mxu1 %v10731_v44  ;;  %v10813_v44 = vld [vmem:[#allocation6 + $0xc70] ss:$152 sps:$4 sm:$0xff]  }
0x10b9   : > { %5023 = vmatpush1.bf16.msra.mxu1 %v10729_v6  ;;  %v10818_v6 = vld [vmem:[#allocation6 + $0xd9c] ss:$152 sps:$4 sm:$0xff]  }
0x10ba   : > { %5024 = vmatprep.subr.bf16.mxu1 %v10734_v29  ;;  %v10821_v29 = vld [vmem:[#allocation6 + $0xda4] ss:$152 sps:$4 sm:$0xff]  }
0x10bd   : > { %5025 = vmatpush1.bf16.msra.mxu1 %v10732_v14  ;;  %v10816_v14 = vld [vmem:[#allocation6 + $0xd98] ss:$152 sps:$4 sm:$0xff]  }
0x10be   : > { %5026 = vmatprep.subr.bf16.mxu1 %v10737_v46  ;;  %v10819_v46 = vld [vmem:[#allocation6 + $0xda0] ss:$152 sps:$4 sm:$0xff]  }
0x10c1   : > { %5027 = vmatpush1.bf16.msra.mxu1 %v10735_v49  ;;  %v10824_v49 = vld [vmem:[#allocation6 + $0xecc] ss:$152 sps:$4 sm:$0xff]  }
0x10c2   : > { %5028 = vmatprep.subr.bf16.mxu1 %v10740_v50  ;;  %v10827_v50 = vld [vmem:[#allocation6 + $0xed4] ss:$152 sps:$4 sm:$0xff]  }
0x10c5   : > { %5029 = vmatpush1.bf16.msra.mxu1 %v10738_v53  ;;  %v10822_v53 = vld [vmem:[#allocation6 + $0xec8] ss:$152 sps:$4 sm:$0xff]  }
0x10c6   : > { %5030 = vmatprep.subr.bf16.mxu1 %v10743_v54  ;;  %v10825_v54 = vld [vmem:[#allocation6 + $0xed0] ss:$152 sps:$4 sm:$0xff]  }
0x10c9   : > { %5031 = vmatpush1.bf16.msra.mxu1 %v10741_v56  ;;  %v10830_v56 = vld [vmem:[#allocation6 + $0xffc] ss:$152 sps:$4 sm:$0xff]  }
0x10ca   : > { %5032 = vmatprep.subr.bf16.mxu1 %v10746_v57  ;;  %v10833_v57 = vld [vmem:[#allocation6 + $0x1004] ss:$152 sps:$4 sm:$0xff]  }
0x10cd   : > { %5033 = vmatpush1.bf16.msra.mxu1 %v10744_v39  ;;  %v10828_v39 = vld [vmem:[#allocation6 + $0xff8] ss:$152 sps:$4 sm:$0xff]  }
0x10ce   : > { %5034 = vmatprep.subr.bf16.mxu1 %v10749_v55  ;;  %v10831_v55 = vld [vmem:[#allocation6 + $0x1000] ss:$152 sps:$4 sm:$0xff]  }
0x10d1   : > { %5035 = vmatpush1.bf16.msra.mxu1 %v10747_v58  ;;  %v10836_v58 = vld [vmem:[#allocation6 + $0x112c] ss:$152 sps:$4 sm:$0xff]  }
0x10d2   : > { %5702 = vmatprep.subr.bf16.mxu1 %v10752_v62  ;;  %v10834_v62 = vld [vmem:[#allocation6 + $0x1128] ss:$152 sps:$4 sm:$0xff]  }
0x10d4   : > { %5037 = vmatmul.mubr.bf16.vlgmr.msra.gmra.mrb[48].mxu1 %v11933_v30  ;;  %v10765_v30 = vld [vmem:[#allocation6 + $0x2f0] ss:$152 sps:$4 sm:$0xff]  }
0x10d5   : > { %5703 = vmatpush1.bf16.msra.mxu1 %v10750_v59  ;;  %5748 = vmatpush1.bf16.msra.mxu0 %v10765_v30  ;;  %v10839_v59 = vld [vmem:[#allocation6 + $0x1134] ss:$152 sps:$4 sm:$0xff]   ;;  %v4841_v30 = vrot.slane %v4832_v9, %v11990_v0 }
0x10d6   : > { %5704 = vmatprep.subr.bf16.mxu1 %v10758_v2  ;;  %5749 = vmatprep.subr.bf16.mxu0 %v10773_v13  ;;  %v10845_v2 = vld [vmem:[#allocation6 + $0x1264] ss:$152 sps:$4 sm:$0xff]  }
0x10d9   : > { %5705 = vmatpush1.bf16.msra.mxu1 %v10756_v7  ;;  %5750 = vmatpush1.bf16.msra.mxu0 %v10771_v15  ;;  %v10843_v7 = vld [vmem:[#allocation6 + $0x1260] ss:$152 sps:$4 sm:$0xff]  }
0x10da   : > { %5706 = vmatprep.subr.bf16.mxu1 %v10764_v52  ;;  %5751 = vmatprep.subr.bf16.mxu0 %v10779_v17 }
0x10dd   : > { %5707 = vmatpush1.bf16.msra.mxu1 %v10762_v10  ;;  %5752 = vmatpush1.bf16.msra.mxu0 %v10777_v20  ;;  %v4837_v10 = vrot.slane %v4832_v9, %v11977_v51 }
0x10de   : > { %5708 = vmatprep.subr.bf16.mxu1 %v10770_v12  ;;  %5753 = vmatprep.subr.bf16.mxu0 %v10785_v21  ;;  %v5080_v12 = vld [vmem:[#allocation8 + $0x7] ss:$8 sm:$0x3] }
0x10e1   : > { %5709 = vmatpush1.bf16.msra.mxu1 %v10768_v60  ;;  %5754 = vmatpush1.bf16.msra.mxu0 %v10783_v5  ;;  %v5360_v5 = vld [vmem:[#allocation8 + $0x20] ss:$8 sm:$0xf] }
0x10e2   : > { %5710 = vmatprep.subr.bf16.mxu1 %v10776_v16  ;;  %5755 = vmatprep.subr.bf16.mxu0 %v10791_v28  ;;  %v5089_v16 = vrot.slane %v5080_v12, %v11990_v0  ;;  %v5365_v28 = vrot.slane %v5360_v5, %v11977_v51 }
0x10e5   : > { %5711 = vmatpush1.bf16.msra.mxu1 %v10774_v19  ;;  %5756 = vmatpush1.bf16.msra.mxu0 %v10789_v23 }
0x10e6   : > { %5712 = vmatprep.subr.bf16.mxu1 %v10782_v37  ;;  %5757 = vmatprep.subr.bf16.mxu0 %v10797_v22 }
0x10e9   : > { %5713 = vmatpush1.bf16.msra.mxu1 %v10780_v24  ;;  %5758 = vmatpush1.bf16.msra.mxu0 %v10795_v26  ;;  %v5289_v24 = vadd.f32 %v12063_v61, %v5089_v16  ;;  %v5085_v26 = vrot.slane %v5080_v12, %v11977_v51 }
0x10ea   : > { %5714 = vmatprep.subr.bf16.mxu1 %v10788_v25  ;;  %5759 = vmatprep.subr.bf16.mxu0 %v10803_v32  ;;  %v5369_v25 = vrot.slane %v5360_v5, %v11990_v0 }
0x10eb   : > { %v5287_v0 = vadd.f32 %v12061_v11, %v5085_v26 }
0x10ed   : > { %5715 = vmatpush1.bf16.msra.mxu1 %v10786_v18  ;;  %5760 = vmatpush1.bf16.msra.mxu0 %v10801_v34  ;;  %v5373_v34 = vrot.slane %v5360_v5, %v12011_v45 }
0x10ee   : > { %5716 = vmatprep.subr.bf16.mxu1 %v10794_v31  ;;  %5761 = vmatprep.subr.bf16.mxu0 %v10809_v35  ;;  %v5377_v31 = vrot.slane %v5360_v5, %v12006_v42 }
0x10f1   : > { %5717 = vmatpush1.bf16.msra.mxu1 %v10792_v3  ;;  %5762 = vmatpush1.bf16.msra.mxu0 %v10807_v36 }
0x10f2   : > { %5718 = vmatprep.subr.bf16.mxu1 %v10800_v27  ;;  %5763 = vmatprep.subr.bf16.mxu0 %v10815_v41 }
0x10f5   : > { %5719 = vmatpush1.bf16.msra.mxu1 %v10798_v33  ;;  %5764 = vmatpush1.bf16.msra.mxu0 %v10813_v44 }
0x10f6   : > { %5720 = vmatprep.subr.bf16.mxu1 %v10806_v4  ;;  %5765 = vmatprep.subr.bf16.mxu0 %v10821_v29 }
0x10f9   : > { %5721 = vmatpush1.bf16.msra.mxu1 %v10804_v38  ;;  %5766 = vmatpush1.bf16.msra.mxu0 %v10819_v46 }
0x10fa   : > { %5722 = vmatprep.subr.bf16.mxu1 %v10812_v40  ;;  %5767 = vmatprep.subr.bf16.mxu0 %v10827_v50 }
0x10fd   : > { %5723 = vmatpush1.bf16.msra.mxu1 %v10810_v43  ;;  %5768 = vmatpush1.bf16.msra.mxu0 %v10825_v54 }
0x10fe   : > { %5724 = vmatprep.subr.bf16.mxu1 %v10818_v6  ;;  %5769 = vmatprep.subr.bf16.mxu0 %v10833_v57 }
0x1101   : > { %5725 = vmatpush1.bf16.msra.mxu1 %v10816_v14  ;;  %5770 = vmatpush1.bf16.msra.mxu0 %v10831_v55 }
0x1102   : > { %5726 = vmatprep.subr.bf16.mxu1 %v10824_v49  ;;  %5771 = vmatprep.subr.bf16.mxu0 %v10839_v59 }
0x1105   : > { %5727 = vmatpush1.bf16.msra.mxu1 %v10822_v53  ;;  %5772 = vmatpush1.bf16.msra.mxu0 %v10837_v63 }
0x1106   : > { %5728 = vmatprep.subr.bf16.mxu1 %v10830_v56  ;;  %5773 = vmatprep.subr.bf16.mxu0 %v10845_v2 }
0x1109   : > { %5729 = vmatpush1.bf16.msra.mxu1 %v10828_v39  ;;  %5774 = vmatpush1.bf16.msra.mxu0 %v10843_v7 }
0x110a   : > { %5730 = vmatprep.subr.bf16.mxu1 %v10836_v58 }
0x110d   : > { %5731 = vmatpush1.bf16.msra.mxu1 %v10834_v62 }
0x110e   : > { %5732 = vmatprep.subr.bf16.mxu1 %v10842_v1 }
0x1111   : > { %5733 = vmatpush1.bf16.msra.mxu1 %v10840_v47 }
0x1167   : > { %v4794_v8 = vpop.f32.mrb[46].mxu1 }
0x1168   : > { %5939 = vst [vmem:[#allocation2] sm:$0xff] %v4794_v8  ;;  %v4796_v52 = vpop.f32.mrb[47].mxu1 }
0x1169   : > { %5940 = vst [vmem:[#allocation2 + $0x8] sm:$0xff] %v4796_v52 }
0x11a7   : > { %v5038_v13 = vpop.f32.mrb[48].mxu1 }
0x11a8   : > { %v5039_v60 = vadd.f32 %v5038_v13, %v4837_v10  ;;  %v5040_v15 = vpop.f32.mrb[49].mxu1 }
0x11a9   : > { %v5041_v17 = vadd.f32 %v5040_v15, %v4841_v30  ;;  %v5042_v19 = vpop.f32.mrb[50].mxu1 }
0x11aa   : > { %v5043_v20 = vpop.f32.mrb[51].mxu1  ;;  %v5357_v21 = vpack.c.bf16 %v5039_v60, %v5039_v60 }
0x11ab   : > { %v5358_v37 = vpack.c.bf16 %v5041_v17, %v5041_v17 }
0x11ad   : > { %5734 = vmatprep.mubr.bf16.mxu1 %v5358_v37  ;;  %5775 = vmatprep.mubr.bf16.mxu0 %v5358_v37 }
0x11ae   : > { %5735 = vmatmul.mubr.bf16.vlgmr.msra.gmra.mrb[52].mxu1 %v5357_v21  ;;  %5776 = vmatmul.mubr.bf16.vlgmr.msra.gmra.mrb[36].mxu0 %v5357_v21 }
0x11af   : > { %5848 = vmatprep.mubr.f32.mxu1 %v5289_v24 }
0x1281   : > { %v5736_v18 = vpop.f32.mrb[52].mxu1  ;;  %v5777_v23 = vpop.f32.mrb[36].mxu0 }
0x1282   : > { %v5738_v22 = vpop.f32.mrb[53].mxu1  ;;  %v5779_v3 = vpop.f32.mrb[37].mxu0  ;;  %v5737_v33 = vadd.f32 %v5736_v18, %v5365_v28  ;;  %v5778_v36 = vadd.f32 %v5777_v23, %v5373_v34 }
0x1283   : > { %v5739_v27 = vadd.f32 %v5738_v22, %v5369_v25  ;;  %v5740_v61 = vpop.f32.mrb[54].mxu1  ;;  %v5781_v32 = vpop.f32.mrb[38].mxu0  ;;  %v5780_v38 = vadd.f32 %v5779_v3, %v5377_v31 }
0x1284   : > { %v5741_v4 = vpop.f32.mrb[55].mxu1  ;;  %v5782_v35 = vpop.f32.mrb[39].mxu0 }
0x1285   : > { %5784 = vmatprep.subr.mxu1 %v5739_v27 }
0x1286   : > { %5785 = vmatpush1.xpose.msra.mxu1 %v5737_v33 }
0x1287   : > { %5868 = vmatprep.subr.mxu1 %v5780_v38 }
0x1289   : > { %5849 = vmatmul.mubr.f32.vlgmr.msra.gmra.mrb[56].mxu1 %v5287_v0 }
0x128a   : > { %5869 = vmatpush1.msra.mxu1 %v5778_v36  ;;  %5932 = vmatprep.mubr.f32.mxu1 %v11607_v48 }
0x135c   : > { %v5850_v51 = vpop.f32.mrb[56].mxu1 }
0x135d   : > { %v5852_v42 = vpop.f32.mrb[57].mxu1  ;;  %v5854_v40 = vsel %vm1883_vm0, %v5850_v51, -inf }
0x135e   : > { %5855 = vmax.xlane.f32.xlu0 %v5854_v40 }
0x13eb   : > { %v5856_v41 = vpop.xlane.xlu0 %5855 }
0x13ec   : > { %v5857_v45 = vsub.f32 %v5850_v51, %v5856_v41 }
0x13ee   : > { %v5858_v43 = vmul.f32 1.442695, %v5857_v45 }
0x13f0   : > { %10866 = vpow2.f32 %v5858_v43 }
0x13fa   : > { %v10867_v44 = vpop.eup %10866 }
0x13fb   : > { %v5860_v6 = vsel %vm1883_vm0, %v10867_v44, 0.0 }
0x13fc   : > { %5861 = vadd.xlane.f32.xlu1 %v5860_v6 }
0x1489   : > { %v5862_v11 = vpop.xlane.xlu1 %5861 }
0x148a   : > { %10868 = vrcp.f32 %v5862_v11 }
0x1494   : > { %v10869_v29 = vpop.eup %10868 }
0x1495   : > { %v5864_v14 = vmul.f32 %v10869_v29, %v10867_v44 }
0x1497   : > { %9445 = vmatmul.mubr.msk.f32.vlgmr.msra.gmra.mrb[58].mxu1 %vm1883_vm0, %v5864_v14 }
0x156a   : > { %v5934_v48 = vpop.f32.mrb[58].mxu1 }
0x156b   : > { %5941 = vst [vmem:[#allocation2 + $0x10] sm:$0xff] %v5934_v48  ;;  %v5936_v46 = vpop.f32.mrb[59].mxu1 }
0x156c   : > { %5942 = vst [vmem:[#allocation2 + $0x18] sm:$0xff] %v5936_v46 }
0x156d PF: > { %v10870_v49 = vld [vmem:[%s11897_s14 + $0x4] ss:$36 sps:$4 sm:$0xff]   ;;  %v10872_v50 = vld [vmem:[%s11897_s14 + $0xc] ss:$36 sps:$4 sm:$0xff]   ;;  %v10878_v57 = vld [vmem:[%s11897_s14 + $0x54] ss:$36 sps:$4 sm:$0xff]  }
0x156e   : > { %6978 = vmatprep.subr.bf16.mxu0 %v10870_v49  ;;  %v10874_v53 = vld [vmem:[%s11897_s14] ss:$36 sps:$4 sm:$0xff]   ;;  %v10875_v54 = vld [vmem:[%s11897_s14 + $0x8] ss:$36 sps:$4 sm:$0xff]   ;;  %7060 = vmatprep.subr.bf16.mxu1 %v10872_v50  ;;  %v10881_v55 = vld [vmem:[%s11897_s14 + $0x50] ss:$36 sps:$4 sm:$0xff]  }
0x156f   : > { %v10876_v56 = vld [vmem:[%s11897_s14 + $0x4c] ss:$36 sps:$4 sm:$0xff]   ;;  %6979 = vmatpush1.bf16.msra.mxu0 %v10874_v53  ;;  %7061 = vmatpush1.bf16.msra.mxu1 %v10875_v54  ;;  %v10882_v58 = vld [vmem:[%s11897_s14 + $0x94] ss:$36 sps:$4 sm:$0xff]   ;;  %v10884_v59 = vld [vmem:[%s11897_s14 + $0x9c] ss:$36 sps:$4 sm:$0xff]  }
0x1570   : > { %v10880_v39 = vld [vmem:[%s11897_s14 + $0x48] ss:$36 sps:$4 sm:$0xff]   ;;  %6980 = vmatprep.subr.bf16.mxu0 %v10876_v56  ;;  %7062 = vmatprep.subr.bf16.mxu1 %v10878_v57  ;;  %v10886_v62 = vld [vmem:[%s11897_s14 + $0x90] ss:$36 sps:$4 sm:$0xff]   ;;  %v10887_v63 = vld [vmem:[%s11897_s14 + $0x98] ss:$36 sps:$4 sm:$0xff]  }
0x1571   : > { %v10888_v1 = vld [vmem:[%s11897_s14 + $0xdc] ss:$36 sps:$4 sm:$0xff]   ;;  %v10890_v2 = vld [vmem:[%s11897_s14 + $0xe4] ss:$36 sps:$4 sm:$0xff]   ;;  %v10896_v52 = vld [vmem:[%s11897_s14 + $0x12c] ss:$36 sps:$4 sm:$0xff]  }
0x1572   : > { %v10892_v47 = vld [vmem:[%s11897_s14 + $0xd8] ss:$36 sps:$4 sm:$0xff]   ;;  %v10893_v7 = vld [vmem:[%s11897_s14 + $0xe0] ss:$36 sps:$4 sm:$0xff]   ;;  %v10899_v10 = vld [vmem:[%s11897_s14 + $0x128] ss:$36 sps:$4 sm:$0xff]  }
0x1573   : > { %6981 = vmatpush1.bf16.msra.mxu0 %v10880_v39  ;;  %7063 = vmatpush1.bf16.msra.mxu1 %v10881_v55  ;;  %v10894_v8 = vld [vmem:[%s11897_s14 + $0x124] ss:$36 sps:$4 sm:$0xff]   ;;  %v10900_v30 = vld [vmem:[%s11897_s14 + $0x16c] ss:$36 sps:$4 sm:$0xff]   ;;  %v10902_v12 = vld [vmem:[%s11897_s14 + $0x174] ss:$36 sps:$4 sm:$0xff]  }
0x1574   : > { %6982 = vmatprep.subr.bf16.mxu0 %v10882_v58  ;;  %7064 = vmatprep.subr.bf16.mxu1 %v10884_v59  ;;  %v10898_v9 = vld [vmem:[%s11897_s14 + $0x120] ss:$36 sps:$4 sm:$0xff]   ;;  %v10904_v13 = vld [vmem:[%s11897_s14 + $0x168] ss:$36 sps:$4 sm:$0xff]   ;;  %v10905_v60 = vld [vmem:[%s11897_s14 + $0x170] ss:$36 sps:$4 sm:$0xff]  }
0x1575   : > { %v10906_v15 = vld [vmem:[%s11897_s14 + $0x1b4] ss:$36 sps:$4 sm:$0xff]   ;;  %v10908_v16 = vld [vmem:[%s11897_s14 + $0x1bc] ss:$36 sps:$4 sm:$0xff]   ;;  %v10914_v37 = vld [vmem:[%s11897_s14 + $0x204] ss:$36 sps:$4 sm:$0xff]  }
0x1576   : > { %v10910_v17 = vld [vmem:[%s11897_s14 + $0x1b0] ss:$36 sps:$4 sm:$0xff]   ;;  %v10911_v19 = vld [vmem:[%s11897_s14 + $0x1b8] ss:$36 sps:$4 sm:$0xff]   ;;  %v10917_v24 = vld [vmem:[%s11897_s14 + $0x200] ss:$36 sps:$4 sm:$0xff]  }
0x1577   : > { %6983 = vmatpush1.bf16.msra.mxu0 %v10886_v62  ;;  %7065 = vmatpush1.bf16.msra.mxu1 %v10887_v63  ;;  %v10912_v20 = vld [vmem:[%s11897_s14 + $0x1fc] ss:$36 sps:$4 sm:$0xff]   ;;  %v10918_v5 = vld [vmem:[%s11897_s14 + $0x244] ss:$36 sps:$4 sm:$0xff]   ;;  %v10920_v25 = vld [vmem:[%s11897_s14 + $0x24c] ss:$36 sps:$4 sm:$0xff]  }
0x1578   : > { %6984 = vmatprep.subr.bf16.mxu0 %v10888_v1  ;;  %7066 = vmatprep.subr.bf16.mxu1 %v10890_v2  ;;  %v10916_v21 = vld [vmem:[%s11897_s14 + $0x1f8] ss:$36 sps:$4 sm:$0xff]   ;;  %v10922_v28 = vld [vmem:[%s11897_s14 + $0x240] ss:$36 sps:$4 sm:$0xff]   ;;  %v10923_v18 = vld [vmem:[%s11897_s14 + $0x248] ss:$36 sps:$4 sm:$0xff]  }
0x1579   : > { %v10924_v23 = vld [vmem:[%s11897_s14 + $0x28c] ss:$36 sps:$4 sm:$0xff]   ;;  %v10926_v31 = vld [vmem:[%s11897_s14 + $0x294] ss:$36 sps:$4 sm:$0xff]   ;;  %v10932_v27 = vld [vmem:[%s11897_s14 + $0x2dc] ss:$36 sps:$4 sm:$0xff]  }
0x157a   : > { %v10928_v22 = vld [vmem:[%s11897_s14 + $0x288] ss:$36 sps:$4 sm:$0xff]   ;;  %v10929_v3 = vld [vmem:[%s11897_s14 + $0x290] ss:$36 sps:$4 sm:$0xff]   ;;  %v10935_v32 = vld [vmem:[%s11897_s14 + $0x2d8] ss:$36 sps:$4 sm:$0xff]  }
0x157b   : > { %6985 = vmatpush1.bf16.msra.mxu0 %v10892_v47  ;;  %7067 = vmatpush1.bf16.msra.mxu1 %v10893_v7  ;;  %v10930_v26 = vld [vmem:[%s11897_s14 + $0x2d4] ss:$36 sps:$4 sm:$0xff]   ;;  %v10936_v33 = vld [vmem:[%s11897_s14 + $0x31c] ss:$36 sps:$4 sm:$0xff]   ;;  %v10938_v34 = vld [vmem:[%s11897_s14 + $0x324] ss:$36 sps:$4 sm:$0xff]  }
0x157c   : > { %6986 = vmatprep.subr.bf16.mxu0 %v10894_v8  ;;  %7068 = vmatprep.subr.bf16.mxu1 %v10896_v52  ;;  %v10934_v61 = vld [vmem:[%s11897_s14 + $0x2d0] ss:$36 sps:$4 sm:$0xff]   ;;  %v5944_v4 = vld [vmem:[#allocation2 + $0x8] sm:$0xff]  ;;  %v10941_v0 = vld [vmem:[%s11897_s14 + $0x320] ss:$36 sps:$4 sm:$0xff]   ;;  %s11609_s10 = smov [#allocation14]  }
0x157d   : > { %v10940_v35 = vld [vmem:[%s11897_s14 + $0x318] ss:$36 sps:$4 sm:$0xff]   ;;  %v6314_v38 = vpack.c.bf16 %v5944_v4, %v5944_v4  ;;  %v10942_v36 = vld [vmem:[%s11897_s14 + $0x364] ss:$36 sps:$4 sm:$0xff]   ;;  %v10944_v51 = vld [vmem:[%s11897_s14 + $0x36c] ss:$36 sps:$4 sm:$0xff]  }
0x157e   : > { %v10946_v42 = vld [vmem:[%s11897_s14 + $0x360] ss:$36 sps:$4 sm:$0xff]   ;;  %v10947_v40 = vld [vmem:[%s11897_s14 + $0x368] ss:$36 sps:$4 sm:$0xff]   ;;  %v10950_v45 = vld [vmem:[%s11897_s14 + $0x3b4] ss:$36 sps:$4 sm:$0xff]  }
0x157f   : > { %6987 = vmatpush1.bf16.msra.mxu0 %v10898_v9  ;;  %7069 = vmatpush1.bf16.msra.mxu1 %v10899_v10  ;;  %v10948_v41 = vld [vmem:[%s11897_s14 + $0x3ac] ss:$36 sps:$4 sm:$0xff]   ;;  %v10954_v6 = vld [vmem:[%s11897_s14 + $0x3f4] ss:$36 sps:$4 sm:$0xff]   ;;  %v10956_v11 = vld [vmem:[%s11897_s14 + $0x3fc] ss:$36 sps:$4 sm:$0xff]  }
0x1580   : > { %6988 = vmatprep.subr.bf16.mxu0 %v10900_v30  ;;  %7070 = vmatprep.subr.bf16.mxu1 %v10902_v12  ;;  %v10952_v43 = vld [vmem:[%s11897_s14 + $0x3a8] ss:$36 sps:$4 sm:$0xff]   ;;  %v10953_v44 = vld [vmem:[%s11897_s14 + $0x3b0] ss:$36 sps:$4 sm:$0xff]   ;;  %v10959_v14 = vld [vmem:[%s11897_s14 + $0x3f8] ss:$36 sps:$4 sm:$0xff]  }
0x1581   : > { %7010 = vmatprep.mubr.bf16.mxu0 %v6314_v38  ;;  %7092 = vmatprep.mubr.bf16.mxu1 %v6314_v38  ;;  %v10958_v29 = vld [vmem:[%s11897_s14 + $0x3f0] ss:$36 sps:$4 sm:$0xff]   ;;  %v10960_v48 = vld [vmem:[%s11897_s14 + $0x43c] ss:$36 sps:$4 sm:$0xff]   ;;  %v10962_v46 = vld [vmem:[%s11897_s14 + $0x444] ss:$36 sps:$4 sm:$0xff]  }
0x1582   : > { %v10964_v49 = vld [vmem:[%s11897_s14 + $0x438] ss:$36 sps:$4 sm:$0xff]   ;;  %v10965_v50 = vld [vmem:[%s11897_s14 + $0x440] ss:$36 sps:$4 sm:$0xff]   ;;  %v5943_v53 = vld [vmem:[#allocation2] sm:$0xff]  ;;  %s8688_s27 = sshll.u32 %s11609_s10, 4  ;;  %s8689_s27 = int_to_ptr.vmem [resolvable:$true] %s8688_s27 }
0x1583   : > { %6989 = vmatpush1.bf16.msra.mxu0 %v10904_v13  ;;  %7071 = vmatpush1.bf16.msra.mxu1 %v10905_v60  ;;  %v10968_v54 = vld [vmem:[%s11897_s14 + $0x484] ss:$36 sps:$4 sm:$0xff]   ;;  %v10971_v56 = vld [vmem:[%s11897_s14 + $0x48c] ss:$36 sps:$4 sm:$0xff]   ;;  %v6313_v57 = vpack.c.bf16 %v5943_v53, %v5943_v53  ;;  %v10977_v59 = vld [vmem:[%s11897_s14 + $0x4d4] ss:$36 sps:$4 sm:$0xff]   ;;  %p11522_p11 = scmp.lt.s32.totalorder %s8689_s27, %s8689_s27 }
0x1584   : > { %6990 = vmatprep.subr.bf16.mxu0 %v10906_v15  ;;  %7072 = vmatprep.subr.bf16.mxu1 %v10908_v16  ;;  %v10966_v39 = vld [vmem:[%s11897_s14 + $0x480] ss:$36 sps:$4 sm:$0xff]   ;;  %v10969_v55 = vld [vmem:[%s11897_s14 + $0x488] ss:$36 sps:$4 sm:$0xff]   ;;  %v10975_v63 = vld [vmem:[%s11897_s14 + $0x4d0] ss:$36 sps:$4 sm:$0xff]  }
0x1585   : > { %v10974_v58 = vld [vmem:[%s11897_s14 + $0x4cc] ss:$36 sps:$4 sm:$0xff]   ;;  %v10980_v1 = vld [vmem:[%s11897_s14 + $0x514] ss:$36 sps:$4 sm:$0xff]   ;;  %v10983_v2 = vld [vmem:[%s11897_s14 + $0x51c] ss:$36 sps:$4 sm:$0xff]  }
0x1586   : > { %v10972_v62 = vld [vmem:[%s11897_s14 + $0x4c8] ss:$36 sps:$4 sm:$0xff]   ;;  %v10978_v47 = vld [vmem:[%s11897_s14 + $0x510] ss:$36 sps:$4 sm:$0xff]   ;;  %v10981_v7 = vld [vmem:[%s11897_s14 + $0x518] ss:$36 sps:$4 sm:$0xff]  }
0x1587   : > { %6991 = vmatpush1.bf16.msra.mxu0 %v10910_v17  ;;  %7073 = vmatpush1.bf16.msra.mxu1 %v10911_v19  ;;  %v10986_v8 = vld [vmem:[%s11897_s14 + $0x55c] ss:$36 sps:$4 sm:$0xff]   ;;  %v10989_v52 = vld [vmem:[%s11897_s14 + $0x564] ss:$36 sps:$4 sm:$0xff]   ;;  %v10995_v12 = vld [vmem:[%s11897_s14 + $0x5ac] ss:$36 sps:$4 sm:$0xff]  }
0x1588   : > { %6992 = vmatprep.subr.bf16.mxu0 %v10912_v20  ;;  %7074 = vmatprep.subr.bf16.mxu1 %v10914_v37  ;;  %v10984_v9 = vld [vmem:[%s11897_s14 + $0x558] ss:$36 sps:$4 sm:$0xff]   ;;  %v10987_v10 = vld [vmem:[%s11897_s14 + $0x560] ss:$36 sps:$4 sm:$0xff]   ;;  %v10993_v60 = vld [vmem:[%s11897_s14 + $0x5a8] ss:$36 sps:$4 sm:$0xff]  }
0x1589   : > { %v10992_v30 = vld [vmem:[%s11897_s14 + $0x5a4] ss:$36 sps:$4 sm:$0xff]   ;;  %v10998_v15 = vld [vmem:[%s11897_s14 + $0x5ec] ss:$36 sps:$4 sm:$0xff]   ;;  %v11001_v16 = vld [vmem:[%s11897_s14 + $0x5f4] ss:$36 sps:$4 sm:$0xff]  }
0x158a   : > { %v10990_v13 = vld [vmem:[%s11897_s14 + $0x5a0] ss:$36 sps:$4 sm:$0xff]   ;;  %v10996_v17 = vld [vmem:[%s11897_s14 + $0x5e8] ss:$36 sps:$4 sm:$0xff]   ;;  %v10999_v19 = vld [vmem:[%s11897_s14 + $0x5f0] ss:$36 sps:$4 sm:$0xff]  }
0x158b   : > { %6993 = vmatpush1.bf16.msra.mxu0 %v10916_v21  ;;  %7075 = vmatpush1.bf16.msra.mxu1 %v10917_v24  ;;  %v11004_v20 = vld [vmem:[%s11897_s14 + $0x634] ss:$36 sps:$4 sm:$0xff]   ;;  %v11007_v37 = vld [vmem:[%s11897_s14 + $0x63c] ss:$36 sps:$4 sm:$0xff]   ;;  %v5946_v21 = vld [vmem:[#allocation2 + $0x18] sm:$0xff]  ;;  %p9886_p1 = scmp.eq.s32.totalorder %s11669_s28, 1 }
0x158c   : > { %6994 = vmatprep.subr.bf16.mxu0 %v10918_v5  ;;  %7076 = vmatprep.subr.bf16.mxu1 %v10920_v25  ;;  %v11002_v24 = vld [vmem:[%s11897_s14 + $0x630] ss:$36 sps:$4 sm:$0xff]   ;;  %v11005_v5 = vld [vmem:[%s11897_s14 + $0x638] ss:$36 sps:$4 sm:$0xff]   ;;  %v6316_v25 = vpack.c.bf16 %v5946_v21, %v5946_v21  ;;  %s11515_s13 = scalar_lea.vmem %s8689_s27, 512 }
0x158d   : > { %v11028_v4 = vld [vmem:[%s11897_s14 + $0x754] ss:$36 sps:$4 sm:$0xff]   ;;  %v11058_v53 = vld [vmem:[%s11897_s14 + $0x8bc] ss:$36 sps:$4 sm:$0xff]   ;;  %p11516_p6 = scmp.ne.s32.totalorder %s8689_s27, %s11515_s13  ;;  %p11523_p4 = scmp.lt.s32.totalorder %s11515_s13, %s11515_s13 }
0x158e   : > { %v11026_v38 = vld [vmem:[%s11897_s14 + $0x750] ss:$36 sps:$4 sm:$0xff]   ;;  %v11092_v21 = vld [vmem:[%s11897_s14 + $0x178] ss:$36 sps:$4 sm:$0xff]  }
0x158f   : > { %6995 = vmatpush1.bf16.msra.mxu0 %v10922_v28  ;;  %7077 = vmatpush1.bf16.msra.mxu1 %v10923_v18  ;;  %v11010_v28 = vld [vmem:[%s11897_s14 + $0x67c] ss:$36 sps:$4 sm:$0xff]   ;;  %v11013_v18 = vld [vmem:[%s11897_s14 + $0x684] ss:$36 sps:$4 sm:$0xff]   ;;  %p11517_p7 = pnand %p11516_p6, %p9886_p1  ;;  %p11524_p9 = por %p11523_p4, %p11522_p11 }
0x1590   : > { %6996 = vmatprep.subr.bf16.mxu0 %v10924_v23  ;;  %7078 = vmatprep.subr.bf16.mxu1 %v10926_v31  ;;  %v11008_v23 = vld [vmem:[%s11897_s14 + $0x678] ss:$36 sps:$4 sm:$0xff]   ;;  %v11011_v31 = vld [vmem:[%s11897_s14 + $0x680] ss:$36 sps:$4 sm:$0xff]  }
0x1591   : > { %p11518_p2 = pneg %p11517_p7 }
0x1593   : > { %6997 = vmatpush1.bf16.msra.mxu0 %v10928_v22  ;;  %7079 = vmatpush1.bf16.msra.mxu1 %v10929_v3  ;;  %v11016_v22 = vld [vmem:[%s11897_s14 + $0x6c4] ss:$36 sps:$4 sm:$0xff]   ;;  %v11019_v3 = vld [vmem:[%s11897_s14 + $0x6cc] ss:$36 sps:$4 sm:$0xff]   ;;  %p11525_p0 = pnand %p11524_p9, %p11518_p2 }
0x1594   : > { %6998 = vmatprep.subr.bf16.mxu0 %v10930_v26  ;;  %7080 = vmatprep.subr.bf16.mxu1 %v10932_v27  ;;  %v11014_v26 = vld [vmem:[%s11897_s14 + $0x6c0] ss:$36 sps:$4 sm:$0xff]   ;;  %v11017_v27 = vld [vmem:[%s11897_s14 + $0x6c8] ss:$36 sps:$4 sm:$0xff]  }
0x1597   : > { %6999 = vmatpush1.bf16.msra.mxu0 %v10934_v61  ;;  %7081 = vmatpush1.bf16.msra.mxu1 %v10935_v32  ;;  %v11022_v61 = vld [vmem:[%s11897_s14 + $0x70c] ss:$36 sps:$4 sm:$0xff]   ;;  %v11025_v32 = vld [vmem:[%s11897_s14 + $0x714] ss:$36 sps:$4 sm:$0xff]  }
0x1598   : > { %7000 = vmatprep.subr.bf16.mxu0 %v10936_v33  ;;  %7082 = vmatprep.subr.bf16.mxu1 %v10938_v34  ;;  %v11020_v33 = vld [vmem:[%s11897_s14 + $0x708] ss:$36 sps:$4 sm:$0xff]   ;;  %v11023_v34 = vld [vmem:[%s11897_s14 + $0x710] ss:$36 sps:$4 sm:$0xff]  }
0x159b   : > { %7001 = vmatpush1.bf16.msra.mxu0 %v10940_v35  ;;  %7083 = vmatpush1.bf16.msra.mxu1 %v10941_v0  ;;  %v11031_v35 = vld [vmem:[%s11897_s14 + $0x75c] ss:$36 sps:$4 sm:$0xff]  }
0x159c   : > { %7002 = vmatprep.subr.bf16.mxu0 %v10942_v36  ;;  %7084 = vmatprep.subr.bf16.mxu1 %v10944_v51  ;;  %v11029_v0 = vld [vmem:[%s11897_s14 + $0x758] ss:$36 sps:$4 sm:$0xff]   ;;  %v11037_v51 = vld [vmem:[%s11897_s14 + $0x7a4] ss:$36 sps:$4 sm:$0xff]  }
0x159d   : > { %v11034_v36 = vld [vmem:[%s11897_s14 + $0x79c] ss:$36 sps:$4 sm:$0xff]  }
0x159f   : > { %7003 = vmatpush1.bf16.msra.mxu0 %v10946_v42  ;;  %7085 = vmatpush1.bf16.msra.mxu1 %v10947_v40  ;;  %v11032_v42 = vld [vmem:[%s11897_s14 + $0x798] ss:$36 sps:$4 sm:$0xff]   ;;  %v11035_v40 = vld [vmem:[%s11897_s14 + $0x7a0] ss:$36 sps:$4 sm:$0xff]  }
0x15a0   : > { %7004 = vmatprep.subr.bf16.mxu0 %v10948_v41  ;;  %7086 = vmatprep.subr.bf16.mxu1 %v10950_v45  ;;  %v11040_v41 = vld [vmem:[%s11897_s14 + $0x7e4] ss:$36 sps:$4 sm:$0xff]   ;;  %v11043_v45 = vld [vmem:[%s11897_s14 + $0x7ec] ss:$36 sps:$4 sm:$0xff]  }
0x15a3   : > { %7005 = vmatpush1.bf16.msra.mxu0 %v10952_v43  ;;  %7087 = vmatpush1.bf16.msra.mxu1 %v10953_v44  ;;  %v11038_v43 = vld [vmem:[%s11897_s14 + $0x7e0] ss:$36 sps:$4 sm:$0xff]   ;;  %v11041_v44 = vld [vmem:[%s11897_s14 + $0x7e8] ss:$36 sps:$4 sm:$0xff]  }
0x15a4   : > { %7006 = vmatprep.subr.bf16.mxu0 %v10954_v6  ;;  %7088 = vmatprep.subr.bf16.mxu1 %v10956_v11  ;;  %v11046_v6 = vld [vmem:[%s11897_s14 + $0x82c] ss:$36 sps:$4 sm:$0xff]   ;;  %v11049_v11 = vld [vmem:[%s11897_s14 + $0x834] ss:$36 sps:$4 sm:$0xff]  }
0x15a7   : > { %7007 = vmatpush1.bf16.msra.mxu0 %v10958_v29  ;;  %7089 = vmatpush1.bf16.msra.mxu1 %v10959_v14  ;;  %v11044_v29 = vld [vmem:[%s11897_s14 + $0x828] ss:$36 sps:$4 sm:$0xff]   ;;  %v11047_v14 = vld [vmem:[%s11897_s14 + $0x830] ss:$36 sps:$4 sm:$0xff]  }
0x15a8   : > { %7008 = vmatprep.subr.bf16.mxu0 %v10960_v48  ;;  %7090 = vmatprep.subr.bf16.mxu1 %v10962_v46  ;;  %v11052_v48 = vld [vmem:[%s11897_s14 + $0x874] ss:$36 sps:$4 sm:$0xff]   ;;  %v11055_v46 = vld [vmem:[%s11897_s14 + $0x87c] ss:$36 sps:$4 sm:$0xff]  }
0x15ab   : > { %7009 = vmatpush1.bf16.msra.mxu0 %v10964_v49  ;;  %7091 = vmatpush1.bf16.msra.mxu1 %v10965_v50  ;;  %v11050_v49 = vld [vmem:[%s11897_s14 + $0x870] ss:$36 sps:$4 sm:$0xff]   ;;  %v11053_v50 = vld [vmem:[%s11897_s14 + $0x878] ss:$36 sps:$4 sm:$0xff]  }
0x15ac   : > { %7019 = vmatprep.subr.bf16.mxu0 %v10968_v54  ;;  %7101 = vmatprep.subr.bf16.mxu1 %v10971_v56  ;;  %v11061_v54 = vld [vmem:[%s11897_s14 + $0x8c4] ss:$36 sps:$4 sm:$0xff]   ;;  %v11056_v56 = vld [vmem:[%s11897_s14 + $0x8b8] ss:$36 sps:$4 sm:$0xff]  }
0x15ae   : > { %7011 = vmatmul.mubr.bf16.vlgmr.msra.gmra.mrb[0].mxu0 %v6313_v57  ;;  %7093 = vmatmul.mubr.bf16.vlgmr.msra.gmra.mrb[0].mxu1 %v6313_v57  ;;  %v11059_v57 = vld [vmem:[%s11897_s14 + $0x8c0] ss:$36 sps:$4 sm:$0xff]  }
0x15af   : > { %7020 = vmatpush1.bf16.msra.mxu0 %v10966_v39  ;;  %7102 = vmatpush1.bf16.msra.mxu1 %v10969_v55  ;;  %v12212_v39 = vld [vmem:[#allocation2 + $0x10] sm:$0xff]  ;;  %v11064_v55 = vld [vmem:[%s11897_s14 + $0x14] ss:$36 sps:$4 sm:$0xff]  }
0x15b0   : > { %7021 = vmatprep.subr.bf16.mxu0 %v10974_v58  ;;  %7103 = vmatprep.subr.bf16.mxu1 %v10977_v59  ;;  %v11067_v58 = vld [vmem:[%s11897_s14 + $0x494] ss:$36 sps:$4 sm:$0xff]  }
0x15b1   : > { %7051 = vmatprep.mubr.bf16.mxu0 %v6316_v25  ;;  %7133 = vmatprep.mubr.bf16.mxu1 %v6316_v25  ;;  %v11062_v59 = vld [vmem:[%s11897_s14 + $0x10] ss:$36 sps:$4 sm:$0xff]   ;;  %v11103_v25 = vld [vmem:[%s11897_s14 + $0x644] ss:$36 sps:$4 sm:$0xff]  }
0x15b3   : > { %7022 = vmatpush1.bf16.msra.mxu0 %v10972_v62  ;;  %7104 = vmatpush1.bf16.msra.mxu1 %v10975_v63  ;;  %v11065_v62 = vld [vmem:[%s11897_s14 + $0x490] ss:$36 sps:$4 sm:$0xff]   ;;  %v6315_v63 = vpack.c.bf16 %v12212_v39, %v12212_v39 }
0x15b4   : > { %7023 = vmatprep.subr.bf16.mxu0 %v10980_v1  ;;  %7105 = vmatprep.subr.bf16.mxu1 %v10983_v2  ;;  %v11070_v1 = vld [vmem:[%s11897_s14 + $0x5c] ss:$36 sps:$4 sm:$0xff]  }
0x15b5   : > { %v11073_v2 = vld [vmem:[%s11897_s14 + $0x4dc] ss:$36 sps:$4 sm:$0xff]  }
0x15b7   : > { %7024 = vmatpush1.bf16.msra.mxu0 %v10978_v47  ;;  %7106 = vmatpush1.bf16.msra.mxu1 %v10981_v7  ;;  %v11068_v47 = vld [vmem:[%s11897_s14 + $0x58] ss:$36 sps:$4 sm:$0xff]  }
0x15b8   : > { %7025 = vmatprep.subr.bf16.mxu0 %v10986_v8  ;;  %7107 = vmatprep.subr.bf16.mxu1 %v10989_v52  ;;  %v11071_v7 = vld [vmem:[%s11897_s14 + $0x4d8] ss:$36 sps:$4 sm:$0xff]   ;;  %v11076_v8 = vld [vmem:[%s11897_s14 + $0xa4] ss:$36 sps:$4 sm:$0xff]  }
0x15b9   : > { %v11079_v52 = vld [vmem:[%s11897_s14 + $0x524] ss:$36 sps:$4 sm:$0xff]  }
0x15bb   : > { %7026 = vmatpush1.bf16.msra.mxu0 %v10984_v9  ;;  %7108 = vmatpush1.bf16.msra.mxu1 %v10987_v10  ;;  %v11074_v9 = vld [vmem:[%s11897_s14 + $0xa0] ss:$36 sps:$4 sm:$0xff]  }
0x15bc   : > { %7027 = vmatprep.subr.bf16.mxu0 %v10992_v30  ;;  %7109 = vmatprep.subr.bf16.mxu1 %v10995_v12  ;;  %v11077_v10 = vld [vmem:[%s11897_s14 + $0x520] ss:$36 sps:$4 sm:$0xff]   ;;  %v11082_v30 = vld [vmem:[%s11897_s14 + $0xec] ss:$36 sps:$4 sm:$0xff]  }
0x15bd   : > { %v11085_v12 = vld [vmem:[%s11897_s14 + $0x56c] ss:$36 sps:$4 sm:$0xff]  }
0x15bf   : > { %7028 = vmatpush1.bf16.msra.mxu0 %v10990_v13  ;;  %7110 = vmatpush1.bf16.msra.mxu1 %v10993_v60  ;;  %v11080_v13 = vld [vmem:[%s11897_s14 + $0xe8] ss:$36 sps:$4 sm:$0xff]  }
0x15c0   : > { %7029 = vmatprep.subr.bf16.mxu0 %v10998_v15  ;;  %7111 = vmatprep.subr.bf16.mxu1 %v11001_v16  ;;  %v11083_v60 = vld [vmem:[%s11897_s14 + $0x568] ss:$36 sps:$4 sm:$0xff]   ;;  %v11088_v15 = vld [vmem:[%s11897_s14 + $0x134] ss:$36 sps:$4 sm:$0xff]  }
0x15c1   : > { %v11091_v16 = vld [vmem:[%s11897_s14 + $0x5b4] ss:$36 sps:$4 sm:$0xff]  }
0x15c3   : > { %7030 = vmatpush1.bf16.msra.mxu0 %v10996_v17  ;;  %7112 = vmatpush1.bf16.msra.mxu1 %v10999_v19  ;;  %v11086_v17 = vld [vmem:[%s11897_s14 + $0x130] ss:$36 sps:$4 sm:$0xff]  }
0x15c4   : > { %7031 = vmatprep.subr.bf16.mxu0 %v11004_v20  ;;  %7113 = vmatprep.subr.bf16.mxu1 %v11007_v37  ;;  %v11089_v19 = vld [vmem:[%s11897_s14 + $0x5b0] ss:$36 sps:$4 sm:$0xff]   ;;  %v11094_v20 = vld [vmem:[%s11897_s14 + $0x17c] ss:$36 sps:$4 sm:$0xff]  }
0x15c5   : > { %v11097_v37 = vld [vmem:[%s11897_s14 + $0x5fc] ss:$36 sps:$4 sm:$0xff]  }
0x15c7   : > { %7032 = vmatpush1.bf16.msra.mxu0 %v11002_v24  ;;  %7114 = vmatpush1.bf16.msra.mxu1 %v11005_v5  ;;  %v11095_v24 = vld [vmem:[%s11897_s14 + $0x5f8] ss:$36 sps:$4 sm:$0xff]   ;;  %v11100_v5 = vld [vmem:[%s11897_s14 + $0x1c4] ss:$36 sps:$4 sm:$0xff]  }
0x15c8   : > { %7033 = vmatprep.subr.bf16.mxu0 %v11010_v28  ;;  %7115 = vmatprep.subr.bf16.mxu1 %v11013_v18  ;;  %v11098_v28 = vld [vmem:[%s11897_s14 + $0x1c0] ss:$36 sps:$4 sm:$0xff]  }
0x15c9   : > { %v11101_v18 = vld [vmem:[%s11897_s14 + $0x640] ss:$36 sps:$4 sm:$0xff]  }
0x15cb   : > { %7034 = vmatpush1.bf16.msra.mxu0 %v11008_v23  ;;  %7116 = vmatpush1.bf16.msra.mxu1 %v11011_v31  ;;  %v11106_v23 = vld [vmem:[%s11897_s14 + $0x20c] ss:$36 sps:$4 sm:$0xff]  }
0x15cc   : > { %7035 = vmatprep.subr.bf16.mxu0 %v11016_v22  ;;  %7117 = vmatprep.subr.bf16.mxu1 %v11019_v3  ;;  %v11109_v31 = vld [vmem:[%s11897_s14 + $0x68c] ss:$36 sps:$4 sm:$0xff]  }
0x15cd   : > { %v11104_v22 = vld [vmem:[%s11897_s14 + $0x208] ss:$36 sps:$4 sm:$0xff]  }
0x15ce   : > { %v11107_v3 = vld [vmem:[%s11897_s14 + $0x688] ss:$36 sps:$4 sm:$0xff]  }
0x15cf   : > { %7036 = vmatpush1.bf16.msra.mxu0 %v11014_v26  ;;  %7118 = vmatpush1.bf16.msra.mxu1 %v11017_v27  ;;  %v11112_v26 = vld [vmem:[%s11897_s14 + $0x254] ss:$36 sps:$4 sm:$0xff]  }
0x15d0   : > { %7037 = vmatprep.subr.bf16.mxu0 %v11022_v61  ;;  %7119 = vmatprep.subr.bf16.mxu1 %v11025_v32  ;;  %v11115_v27 = vld [vmem:[%s11897_s14 + $0x6d4] ss:$36 sps:$4 sm:$0xff]  }
0x15d1   : > { %v11110_v61 = vld [vmem:[%s11897_s14 + $0x250] ss:$36 sps:$4 sm:$0xff]  }
0x15d2   : > { %v11113_v32 = vld [vmem:[%s11897_s14 + $0x6d0] ss:$36 sps:$4 sm:$0xff]  }
0x15d3   : > { %7038 = vmatpush1.bf16.msra.mxu0 %v11020_v33  ;;  %7120 = vmatpush1.bf16.msra.mxu1 %v11023_v34  ;;  %v11118_v33 = vld [vmem:[%s11897_s14 + $0x29c] ss:$36 sps:$4 sm:$0xff]  }
0x15d4   : > { %7039 = vmatprep.subr.bf16.mxu0 %v11028_v4  ;;  %7121 = vmatprep.subr.bf16.mxu1 %v11031_v35  ;;  %v11121_v34 = vld [vmem:[%s11897_s14 + $0x71c] ss:$36 sps:$4 sm:$0xff]  }
0x15d5   : > { %v11116_v4 = vld [vmem:[%s11897_s14 + $0x298] ss:$36 sps:$4 sm:$0xff]  }
0x15d6   : > { %v11119_v35 = vld [vmem:[%s11897_s14 + $0x718] ss:$36 sps:$4 sm:$0xff]  }
0x15d7   : > { %7040 = vmatpush1.bf16.msra.mxu0 %v11026_v38  ;;  %7122 = vmatpush1.bf16.msra.mxu1 %v11029_v0  ;;  %v11124_v38 = vld [vmem:[%s11897_s14 + $0x2e4] ss:$36 sps:$4 sm:$0xff]  }
0x15d8   : > { %7041 = vmatprep.subr.bf16.mxu0 %v11034_v36  ;;  %7123 = vmatprep.subr.bf16.mxu1 %v11037_v51  ;;  %v11127_v0 = vld [vmem:[%s11897_s14 + $0x764] ss:$36 sps:$4 sm:$0xff]  }
0x15d9   : > { %v11122_v36 = vld [vmem:[%s11897_s14 + $0x2e0] ss:$36 sps:$4 sm:$0xff]  }
0x15da   : > { %v11125_v51 = vld [vmem:[%s11897_s14 + $0x760] ss:$36 sps:$4 sm:$0xff]  }
0x15db   : > { %7042 = vmatpush1.bf16.msra.mxu0 %v11032_v42  ;;  %7124 = vmatpush1.bf16.msra.mxu1 %v11035_v40  ;;  %v11130_v42 = vld [vmem:[%s11897_s14 + $0x32c] ss:$36 sps:$4 sm:$0xff]  }
0x15dc   : > { %7043 = vmatprep.subr.bf16.mxu0 %v11040_v41  ;;  %7125 = vmatprep.subr.bf16.mxu1 %v11043_v45  ;;  %v11133_v40 = vld [vmem:[%s11897_s14 + $0x7ac] ss:$36 sps:$4 sm:$0xff]  }
0x15dd   : > { %v11128_v41 = vld [vmem:[%s11897_s14 + $0x328] ss:$36 sps:$4 sm:$0xff]  }
0x15de   : > { %v11131_v45 = vld [vmem:[%s11897_s14 + $0x7a8] ss:$36 sps:$4 sm:$0xff]  }
0x15df   : > { %7044 = vmatpush1.bf16.msra.mxu0 %v11038_v43  ;;  %7126 = vmatpush1.bf16.msra.mxu1 %v11041_v44  ;;  %v11136_v43 = vld [vmem:[%s11897_s14 + $0x374] ss:$36 sps:$4 sm:$0xff]  }
0x15e0   : > { %7045 = vmatprep.subr.bf16.mxu0 %v11046_v6  ;;  %7127 = vmatprep.subr.bf16.mxu1 %v11049_v11  ;;  %v11139_v44 = vld [vmem:[%s11897_s14 + $0x7f4] ss:$36 sps:$4 sm:$0xff]  }
0x15e1   : > { %v11134_v6 = vld [vmem:[%s11897_s14 + $0x370] ss:$36 sps:$4 sm:$0xff]  }
0x15e2   : > { %v11137_v11 = vld [vmem:[%s11897_s14 + $0x7f0] ss:$36 sps:$4 sm:$0xff]  }
0x15e3   : > { %7046 = vmatpush1.bf16.msra.mxu0 %v11044_v29  ;;  %7128 = vmatpush1.bf16.msra.mxu1 %v11047_v14  ;;  %v11142_v29 = vld [vmem:[%s11897_s14 + $0x3bc] ss:$36 sps:$4 sm:$0xff]  }
0x15e4   : > { %7047 = vmatprep.subr.bf16.mxu0 %v11052_v48  ;;  %7129 = vmatprep.subr.bf16.mxu1 %v11055_v46  ;;  %v11145_v14 = vld [vmem:[%s11897_s14 + $0x83c] ss:$36 sps:$4 sm:$0xff]  }
0x15e5   : > { %v11140_v48 = vld [vmem:[%s11897_s14 + $0x3b8] ss:$36 sps:$4 sm:$0xff]  }
0x15e6   : > { %v11143_v46 = vld [vmem:[%s11897_s14 + $0x838] ss:$36 sps:$4 sm:$0xff]  }
0x15e7   : > { %7048 = vmatpush1.bf16.msra.mxu0 %v11050_v49  ;;  %7130 = vmatpush1.bf16.msra.mxu1 %v11053_v50  ;;  %v11148_v49 = vld [vmem:[%s11897_s14 + $0x404] ss:$36 sps:$4 sm:$0xff]  }
0x15e8   : > { %7049 = vmatprep.subr.bf16.mxu0 %v11058_v53  ;;  %7131 = vmatprep.subr.bf16.mxu1 %v11061_v54  ;;  %v11151_v50 = vld [vmem:[%s11897_s14 + $0x884] ss:$36 sps:$4 sm:$0xff]  }
0x15e9   : > { %v11146_v53 = vld [vmem:[%s11897_s14 + $0x400] ss:$36 sps:$4 sm:$0xff]  }
0x15ea   : > { %v11149_v54 = vld [vmem:[%s11897_s14 + $0x880] ss:$36 sps:$4 sm:$0xff]  }
0x15eb   : > { %7050 = vmatpush1.bf16.msra.mxu0 %v11056_v56  ;;  %7132 = vmatpush1.bf16.msra.mxu1 %v11059_v57  ;;  %v11154_v56 = vld [vmem:[%s11897_s14 + $0x44c] ss:$36 sps:$4 sm:$0xff]  }
0x15ec   : > { %7807 = vmatprep.subr.bf16.mxu0 %v11064_v55  ;;  %7848 = vmatprep.subr.bf16.mxu1 %v11067_v58  ;;  %v11157_v57 = vld [vmem:[%s11897_s14 + $0x8cc] ss:$36 sps:$4 sm:$0xff]  }
0x15ed   : > { %v11152_v55 = vld [vmem:[%s11897_s14 + $0x448] ss:$36 sps:$4 sm:$0xff]  }
0x15ee   : > { %7052 = vmatmul.mubr.bf16.vlgmr.msra.gmra.mrb[0].mxu0 %v6315_v63  ;;  %7134 = vmatmul.mubr.bf16.vlgmr.msra.gmra.mrb[0].mxu1 %v6315_v63  ;;  %v11155_v58 = vld [vmem:[%s11897_s14 + $0x8c8] ss:$36 sps:$4 sm:$0xff]   ;;  %v6318_v63 = vlaneseq }
0x15ef   : > { %7808 = vmatpush1.bf16.msra.mxu0 %v11062_v59  ;;  %7849 = vmatpush1.bf16.msra.mxu1 %v11065_v62  ;;  %v11160_v59 = vld [vmem:[%s11897_s14 + $0x1c] ss:$36 sps:$4 sm:$0xff]  }
0x15f0   : > { %7809 = vmatprep.subr.bf16.mxu0 %v11070_v1  ;;  %7850 = vmatprep.subr.bf16.mxu1 %v11073_v2  ;;  %v11163_v62 = vld [vmem:[%s11897_s14 + $0x49c] ss:$36 sps:$4 sm:$0xff]   ;;  %v6319_v1 = vshrl.u32 %v6318_v63, 7 }
0x15f1   : > { %v11212_v63 = vld [vmem:[%s11897_s14 + $0x2a0] ss:$36 sps:$4 sm:$0xff]  }
0x15f2   : > { %v12282_v2 = vsub.s32 0, %v6319_v1 }
0x15f3   : > { %7810 = vmatpush1.bf16.msra.mxu0 %v11068_v47  ;;  %7851 = vmatpush1.bf16.msra.mxu1 %v11071_v7  ;;  %v12284_v47 = vsub.s32 2, %v6319_v1  ;;  %v6299_v7 = vld [vmem:[%s11905_s20] ss:$8 sm:$0xf] }
0x15f4   : > { %7811 = vmatprep.subr.bf16.mxu0 %v11076_v8  ;;  %7852 = vmatprep.subr.bf16.mxu1 %v11079_v52  ;;  %v12287_v8 = vsub.s32 1, %v6319_v1  ;;  %v12289_v52 = vsub.s32 3, %v6319_v1  ;;  %v11215_v1 = vld [vmem:[%s11897_s14 + $0x720] ss:$36 sps:$4 sm:$0xff]  }
0x15f7   : > { %7812 = vmatpush1.bf16.msra.mxu0 %v11074_v9  ;;  %7853 = vmatpush1.bf16.msra.mxu1 %v11077_v10  ;;  %v6321_v9 = vrot.slane %v6299_v7, %v12282_v2  ;;  %v6329_v10 = vrot.slane %v6299_v7, %v12284_v47 }
0x15f8   : > { %7813 = vmatprep.subr.bf16.mxu0 %v11082_v30  ;;  %7854 = vmatprep.subr.bf16.mxu1 %v11085_v12  ;;  %v6325_v30 = vrot.slane %v6299_v7, %v12287_v8  ;;  %v6333_v12 = vrot.slane %v6299_v7, %v12289_v52  ;;  %v11220_v7 = vld [vmem:[%s11897_s14 + $0x2ec] ss:$36 sps:$4 sm:$0xff]  }
0x15fb   : > { %7814 = vmatpush1.bf16.msra.mxu0 %v11080_v13  ;;  %7855 = vmatpush1.bf16.msra.mxu1 %v11083_v60 }
0x15fc   : > { %7815 = vmatprep.subr.bf16.mxu0 %v11088_v15  ;;  %7856 = vmatprep.subr.bf16.mxu1 %v11091_v16 }
0x15ff   : > { %7816 = vmatpush1.bf16.msra.mxu0 %v11086_v17  ;;  %7857 = vmatpush1.bf16.msra.mxu1 %v11089_v19 }
0x1600   : > { %7817 = vmatprep.subr.bf16.mxu0 %v11094_v20  ;;  %7858 = vmatprep.subr.bf16.mxu1 %v11097_v37 }
0x1603   : > { %7818 = vmatpush1.bf16.msra.mxu0 %v11092_v21  ;;  %7859 = vmatpush1.bf16.msra.mxu1 %v11095_v24 }
0x1604   : > { %7819 = vmatprep.subr.bf16.mxu0 %v11100_v5  ;;  %7860 = vmatprep.subr.bf16.mxu1 %v11103_v25 }
0x1607   : > { %7820 = vmatpush1.bf16.msra.mxu0 %v11098_v28  ;;  %7861 = vmatpush1.bf16.msra.mxu1 %v11101_v18 }
0x1608   : > { %7821 = vmatprep.subr.bf16.mxu0 %v11106_v23  ;;  %7862 = vmatprep.subr.bf16.mxu1 %v11109_v31  ;;  %v11158_v23 = vld [vmem:[%s11897_s14 + $0x18] ss:$36 sps:$4 sm:$0xff]  }
0x1609   : > { %v11161_v31 = vld [vmem:[%s11897_s14 + $0x498] ss:$36 sps:$4 sm:$0xff]  }
0x160b   : > { %7822 = vmatpush1.bf16.msra.mxu0 %v11104_v22  ;;  %7863 = vmatpush1.bf16.msra.mxu1 %v11107_v3 }
0x160c   : > { %7823 = vmatprep.subr.bf16.mxu0 %v11112_v26  ;;  %7864 = vmatprep.subr.bf16.mxu1 %v11115_v27  ;;  %v11166_v26 = vld [vmem:[%s11897_s14 + $0x64] ss:$36 sps:$4 sm:$0xff]  }
0x160d   : > { %v11169_v27 = vld [vmem:[%s11897_s14 + $0x4e4] ss:$36 sps:$4 sm:$0xff]  }
0x160f   : > { %7824 = vmatpush1.bf16.msra.mxu0 %v11110_v61  ;;  %7865 = vmatpush1.bf16.msra.mxu1 %v11113_v32  ;;  %v11164_v61 = vld [vmem:[%s11897_s14 + $0x60] ss:$36 sps:$4 sm:$0xff]  }
0x1610   : > { %7825 = vmatprep.subr.bf16.mxu0 %v11118_v33  ;;  %7866 = vmatprep.subr.bf16.mxu1 %v11121_v34  ;;  %v11167_v32 = vld [vmem:[%s11897_s14 + $0x4e0] ss:$36 sps:$4 sm:$0xff]   ;;  %v11172_v33 = vld [vmem:[%s11897_s14 + $0xac] ss:$36 sps:$4 sm:$0xff]  }
0x1611   : > { %v11175_v34 = vld [vmem:[%s11897_s14 + $0x52c] ss:$36 sps:$4 sm:$0xff]  }
0x1613   : > { %7826 = vmatpush1.bf16.msra.mxu0 %v11116_v4  ;;  %7867 = vmatpush1.bf16.msra.mxu1 %v11119_v35  ;;  %v11170_v4 = vld [vmem:[%s11897_s14 + $0xa8] ss:$36 sps:$4 sm:$0xff]  }
0x1614   : > { %7827 = vmatprep.subr.bf16.mxu0 %v11124_v38  ;;  %7868 = vmatprep.subr.bf16.mxu1 %v11127_v0  ;;  %v11173_v35 = vld [vmem:[%s11897_s14 + $0x528] ss:$36 sps:$4 sm:$0xff]   ;;  %v11178_v38 = vld [vmem:[%s11897_s14 + $0xf4] ss:$36 sps:$4 sm:$0xff]  }
0x1615   : > { %v11181_v0 = vld [vmem:[%s11897_s14 + $0x574] ss:$36 sps:$4 sm:$0xff]  }
0x1617   : > { %7828 = vmatpush1.bf16.msra.mxu0 %v11122_v36  ;;  %7869 = vmatpush1.bf16.msra.mxu1 %v11125_v51  ;;  %v11176_v36 = vld [vmem:[%s11897_s14 + $0xf0] ss:$36 sps:$4 sm:$0xff]  }
0x1618   : > { %7829 = vmatprep.subr.bf16.mxu0 %v11130_v42  ;;  %7870 = vmatprep.subr.bf16.mxu1 %v11133_v40  ;;  %v11179_v51 = vld [vmem:[%s11897_s14 + $0x570] ss:$36 sps:$4 sm:$0xff]   ;;  %v11184_v42 = vld [vmem:[%s11897_s14 + $0x13c] ss:$36 sps:$4 sm:$0xff]  }
0x1619   : > { %v11187_v40 = vld [vmem:[%s11897_s14 + $0x5bc] ss:$36 sps:$4 sm:$0xff]  }
0x161b   : > { %7830 = vmatpush1.bf16.msra.mxu0 %v11128_v41  ;;  %7871 = vmatpush1.bf16.msra.mxu1 %v11131_v45  ;;  %v11182_v41 = vld [vmem:[%s11897_s14 + $0x138] ss:$36 sps:$4 sm:$0xff]  }
0x161c   : > { %7831 = vmatprep.subr.bf16.mxu0 %v11136_v43  ;;  %7872 = vmatprep.subr.bf16.mxu1 %v11139_v44  ;;  %v11185_v45 = vld [vmem:[%s11897_s14 + $0x5b8] ss:$36 sps:$4 sm:$0xff]   ;;  %v11190_v43 = vld [vmem:[%s11897_s14 + $0x184] ss:$36 sps:$4 sm:$0xff]  }
0x161d   : > { %v11193_v44 = vld [vmem:[%s11897_s14 + $0x604] ss:$36 sps:$4 sm:$0xff]  }
0x161f   : > { %7832 = vmatpush1.bf16.msra.mxu0 %v11134_v6  ;;  %7873 = vmatpush1.bf16.msra.mxu1 %v11137_v11  ;;  %v11188_v6 = vld [vmem:[%s11897_s14 + $0x180] ss:$36 sps:$4 sm:$0xff]  }
0x1620   : > { %7833 = vmatprep.subr.bf16.mxu0 %v11142_v29  ;;  %7874 = vmatprep.subr.bf16.mxu1 %v11145_v14  ;;  %v11191_v11 = vld [vmem:[%s11897_s14 + $0x600] ss:$36 sps:$4 sm:$0xff]   ;;  %v11196_v29 = vld [vmem:[%s11897_s14 + $0x1cc] ss:$36 sps:$4 sm:$0xff]  }
0x1621   : > { %v11199_v14 = vld [vmem:[%s11897_s14 + $0x64c] ss:$36 sps:$4 sm:$0xff]  }
0x1623   : > { %7834 = vmatpush1.bf16.msra.mxu0 %v11140_v48  ;;  %7875 = vmatpush1.bf16.msra.mxu1 %v11143_v46  ;;  %v11194_v48 = vld [vmem:[%s11897_s14 + $0x1c8] ss:$36 sps:$4 sm:$0xff]  }
0x1624   : > { %7835 = vmatprep.subr.bf16.mxu0 %v11148_v49  ;;  %7876 = vmatprep.subr.bf16.mxu1 %v11151_v50  ;;  %v11197_v46 = vld [vmem:[%s11897_s14 + $0x648] ss:$36 sps:$4 sm:$0xff]   ;;  %v11202_v49 = vld [vmem:[%s11897_s14 + $0x214] ss:$36 sps:$4 sm:$0xff]  }
0x1625   : > { %v11205_v50 = vld [vmem:[%s11897_s14 + $0x694] ss:$36 sps:$4 sm:$0xff]  }
0x1627   : > { %7836 = vmatpush1.bf16.msra.mxu0 %v11146_v53  ;;  %7877 = vmatpush1.bf16.msra.mxu1 %v11149_v54  ;;  %v11200_v53 = vld [vmem:[%s11897_s14 + $0x210] ss:$36 sps:$4 sm:$0xff]  }
0x1628   : > { %7837 = vmatprep.subr.bf16.mxu0 %v11154_v56  ;;  %7878 = vmatprep.subr.bf16.mxu1 %v11157_v57  ;;  %v11203_v54 = vld [vmem:[%s11897_s14 + $0x690] ss:$36 sps:$4 sm:$0xff]   ;;  %v11208_v56 = vld [vmem:[%s11897_s14 + $0x25c] ss:$36 sps:$4 sm:$0xff]  }
0x1629   : > { %v11211_v57 = vld [vmem:[%s11897_s14 + $0x6dc] ss:$36 sps:$4 sm:$0xff]  }
0x162b   : > { %7838 = vmatpush1.bf16.msra.mxu0 %v11152_v55  ;;  %7879 = vmatpush1.bf16.msra.mxu1 %v11155_v58  ;;  %v11206_v55 = vld [vmem:[%s11897_s14 + $0x258] ss:$36 sps:$4 sm:$0xff]  }
0x162c   : > { %7889 = vmatprep.subr.bf16.mxu0 %v11160_v59  ;;  %7930 = vmatprep.subr.bf16.mxu1 %v11163_v62  ;;  %v11209_v58 = vld [vmem:[%s11897_s14 + $0x6d8] ss:$36 sps:$4 sm:$0xff]   ;;  %v11214_v59 = vld [vmem:[%s11897_s14 + $0x2a4] ss:$36 sps:$4 sm:$0xff]  }
0x162d   : > { %v11217_v62 = vld [vmem:[%s11897_s14 + $0x724] ss:$36 sps:$4 sm:$0xff]  }
0x16c1   : > { %v7053_v13 = vpop.f32.mrb[0].mxu0  ;;  %v7135_v60 = vpop.f32.mrb[0].mxu1 }
0x16c2   : > { %v9822_v15 = vadd.f32 %v7053_v13, %v6321_v9  ;;  %v9824_v16 = vadd.f32 %v7135_v60, %v6329_v10  ;;  %v7055_v17 = vpop.f32.mrb[1].mxu0  ;;  %v7137_v19 = vpop.f32.mrb[1].mxu1  ;;  %v11223_v9 = vld [vmem:[%s11897_s14 + $0x76c] ss:$36 sps:$4 sm:$0xff]   ;;  %v11229_v13 = vld [vmem:[%s11897_s14 + $0x7b4] ss:$36 sps:$4 sm:$0xff]  }
0x16c3   : > { %v9823_v20 = vadd.f32 %v7055_v17, %v6325_v30  ;;  %v9825_v37 = vadd.f32 %v7137_v19, %v6333_v12  ;;  %v7057_v21 = vpop.f32.mrb[2].mxu0  ;;  %v7139_v24 = vpop.f32.mrb[2].mxu1  ;;  %v11218_v10 = vld [vmem:[%s11897_s14 + $0x2e8] ss:$36 sps:$4 sm:$0xff]   ;;  %v11226_v12 = vld [vmem:[%s11897_s14 + $0x334] ss:$36 sps:$4 sm:$0xff]  }
0x16c4   : > { %v7058_v5 = vpop.f32.mrb[3].mxu0  ;;  %v7140_v25 = vpop.f32.mrb[3].mxu1  ;;  %v12297_v22 = vpack.c.bf16 %v9822_v15, %v9822_v15  ;;  %v12299_v3 = vpack.c.bf16 %v9824_v16, %v9824_v16  ;;  %v11221_v30 = vld [vmem:[%s11897_s14 + $0x768] ss:$36 sps:$4 sm:$0xff]   ;;  %v11224_v60 = vld [vmem:[%s11897_s14 + $0x330] ss:$36 sps:$4 sm:$0xff]  }
0x16c5   : > { %v7143_v28 = vpack.c.bf16 %v9823_v20, %v9823_v20  ;;  %v7145_v18 = vpack.c.bf16 %v9825_v37, %v9825_v37  ;;  %v11227_v15 = vld [vmem:[%s11897_s14 + $0x7b0] ss:$36 sps:$4 sm:$0xff]   ;;  %v11232_v16 = vld [vmem:[%s11897_s14 + $0x37c] ss:$36 sps:$4 sm:$0xff]   ;;  %v11238_v37 = vld [vmem:[%s11897_s14 + $0x3c4] ss:$36 sps:$4 sm:$0xff]  }
0x16c6   : > { %v11235_v17 = vld [vmem:[%s11897_s14 + $0x7fc] ss:$36 sps:$4 sm:$0xff]   ;;  %v11241_v21 = vld [vmem:[%s11897_s14 + $0x844] ss:$36 sps:$4 sm:$0xff]   ;;  %v11244_v25 = vld [vmem:[%s11897_s14 + $0x40c] ss:$36 sps:$4 sm:$0xff]  }
0x16c7   : > { %7839 = vmatprep.mubr.bf16.mxu0 %v7143_v28  ;;  %7880 = vmatprep.mubr.bf16.mxu1 %v7145_v18  ;;  %v11230_v19 = vld [vmem:[%s11897_s14 + $0x378] ss:$36 sps:$4 sm:$0xff]   ;;  %v11236_v24 = vld [vmem:[%s11897_s14 + $0x3c0] ss:$36 sps:$4 sm:$0xff]  }
0x16c8   : > { %7840 = vmatmul.mubr.bf16.vlgmr.msra.gmra.mrb[4].mxu0 %v12297_v22  ;;  %7881 = vmatmul.mubr.bf16.vlgmr.msra.gmra.mrb[4].mxu1 %v12299_v3  ;;  %v11233_v20 = vld [vmem:[%s11897_s14 + $0x7f8] ss:$36 sps:$4 sm:$0xff]   ;;  %v11239_v5 = vld [vmem:[%s11897_s14 + $0x840] ss:$36 sps:$4 sm:$0xff]  }
0x16c9   : > { %7890 = vmatpush1.bf16.msra.mxu0 %v11158_v23  ;;  %7931 = vmatpush1.bf16.msra.mxu1 %v11161_v31  ;;  %v11245_v23 = vld [vmem:[%s11897_s14 + $0x888] ss:$36 sps:$4 sm:$0xff]   ;;  %v11250_v31 = vld [vmem:[%s11897_s14 + $0x454] ss:$36 sps:$4 sm:$0xff]  }
0x16ca   : > { %7921 = vmatprep.mubr.bf16.mxu0 %v7143_v28  ;;  %7962 = vmatprep.mubr.bf16.mxu1 %v7145_v18  ;;  %v11247_v28 = vld [vmem:[%s11897_s14 + $0x88c] ss:$36 sps:$4 sm:$0xff]  }
0x16cb   : > { %7891 = vmatprep.subr.bf16.mxu0 %v11166_v26  ;;  %7932 = vmatprep.subr.bf16.mxu1 %v11169_v27  ;;  %v11242_v18 = vld [vmem:[%s11897_s14 + $0x408] ss:$36 sps:$4 sm:$0xff]   ;;  %v11253_v26 = vld [vmem:[%s11897_s14 + $0x8d4] ss:$36 sps:$4 sm:$0xff]  }
0x16cc   : > { %v11248_v27 = vld [vmem:[%s11897_s14 + $0x450] ss:$36 sps:$4 sm:$0xff]  }
0x16cd   : > { %7892 = vmatpush1.bf16.msra.mxu0 %v11164_v61  ;;  %7933 = vmatpush1.bf16.msra.mxu1 %v11167_v32  ;;  %v11251_v61 = vld [vmem:[%s11897_s14 + $0x8d0] ss:$36 sps:$4 sm:$0xff]  }
0x16ce   : > { %7893 = vmatprep.subr.bf16.mxu0 %v11172_v33  ;;  %7934 = vmatprep.subr.bf16.mxu1 %v11175_v34  ;;  %v9446_v32 = vld [vmem:[%s11905_s20 + $0x1] ss:$8 sm:$0xf] }
0x16cf   : > { %v7150_v33 = vrot.slane %v9446_v32, %v12282_v2  ;;  %v7154_v34 = vrot.slane %v9446_v32, %v12287_v8 }
0x16d1   : > { %7894 = vmatpush1.bf16.msra.mxu0 %v11170_v4  ;;  %7935 = vmatpush1.bf16.msra.mxu1 %v11173_v35 }
0x16d2   : > { %7895 = vmatprep.subr.bf16.mxu0 %v11178_v38  ;;  %7936 = vmatprep.subr.bf16.mxu1 %v11181_v0 }
0x16d5   : > { %7896 = vmatpush1.bf16.msra.mxu0 %v11176_v36  ;;  %7937 = vmatpush1.bf16.msra.mxu1 %v11179_v51 }
0x16d6   : > { %7897 = vmatprep.subr.bf16.mxu0 %v11184_v42  ;;  %7938 = vmatprep.subr.bf16.mxu1 %v11187_v40 }
0x16d9   : > { %7898 = vmatpush1.bf16.msra.mxu0 %v11182_v41  ;;  %7939 = vmatpush1.bf16.msra.mxu1 %v11185_v45 }
0x16da   : > { %7899 = vmatprep.subr.bf16.mxu0 %v11190_v43  ;;  %7940 = vmatprep.subr.bf16.mxu1 %v11193_v44 }
0x16dd   : > { %7900 = vmatpush1.bf16.msra.mxu0 %v11188_v6  ;;  %7941 = vmatpush1.bf16.msra.mxu1 %v11191_v11 }
0x16de   : > { %7901 = vmatprep.subr.bf16.mxu0 %v11196_v29  ;;  %7942 = vmatprep.subr.bf16.mxu1 %v11199_v14  ;;  %v11338_v29 = vld [vmem:[#allocation2] sm:$0xff] }
0x16e1   : > { %7902 = vmatpush1.bf16.msra.mxu0 %v11194_v48  ;;  %7943 = vmatpush1.bf16.msra.mxu1 %v11197_v46  ;;  %v11339_v48 = vld [vmem:[#allocation2 + $0x8] sm:$0xff] }
0x16e2   : > { %7903 = vmatprep.subr.bf16.mxu0 %v11202_v49  ;;  %7944 = vmatprep.subr.bf16.mxu1 %v11205_v50 }
0x16e5   : > { %7904 = vmatpush1.bf16.msra.mxu0 %v11200_v53  ;;  %7945 = vmatpush1.bf16.msra.mxu1 %v11203_v54 }
0x16e6   : > { %7905 = vmatprep.subr.bf16.mxu0 %v11208_v56  ;;  %7946 = vmatprep.subr.bf16.mxu1 %v11211_v57 }
0x16e9   : > { %7906 = vmatpush1.bf16.msra.mxu0 %v11206_v55  ;;  %7947 = vmatpush1.bf16.msra.mxu1 %v11209_v58 }
0x16ea   : > { %7907 = vmatprep.subr.bf16.mxu0 %v11214_v59  ;;  %7948 = vmatprep.subr.bf16.mxu1 %v11217_v62 }
0x16ed   : > { %7908 = vmatpush1.bf16.msra.mxu0 %v11212_v63  ;;  %7949 = vmatpush1.bf16.msra.mxu1 %v11215_v1 }
0x16ee   : > { %7909 = vmatprep.subr.bf16.mxu0 %v11220_v7  ;;  %7950 = vmatprep.subr.bf16.mxu1 %v11223_v9  ;;  %v11340_v7 = vld [vmem:[#allocation2 + $0x18] sm:$0xff] }
0x16f1   : > { %7910 = vmatpush1.bf16.msra.mxu0 %v11218_v10  ;;  %7951 = vmatpush1.bf16.msra.mxu1 %v11221_v30 }
0x16f2   : > { %7911 = vmatprep.subr.bf16.mxu0 %v11226_v12  ;;  %7952 = vmatprep.subr.bf16.mxu1 %v11229_v13  ;;  %v11254_v12 = vld [vmem:[%s11897_s14 + $0x260] ss:$36 sps:$4 sm:$0xff]  }
0x16f3   : > { %v11255_v13 = vld [vmem:[%s11897_s14 + $0x6e0] ss:$36 sps:$4 sm:$0xff]  }
0x16f5   : > { %7912 = vmatpush1.bf16.msra.mxu0 %v11224_v60  ;;  %7953 = vmatpush1.bf16.msra.mxu1 %v11227_v15  ;;  %v11256_v60 = vld [vmem:[%s11897_s14 + $0x20] ss:$36 sps:$4 sm:$0xff]  }
0x16f6   : > { %7913 = vmatprep.subr.bf16.mxu0 %v11232_v16  ;;  %7954 = vmatprep.subr.bf16.mxu1 %v11235_v17  ;;  %v11257_v15 = vld [vmem:[%s11897_s14 + $0x4a0] ss:$36 sps:$4 sm:$0xff]   ;;  %v11258_v16 = vld [vmem:[%s11897_s14 + $0x2a8] ss:$36 sps:$4 sm:$0xff]  }
0x16f7   : > { %v11259_v17 = vld [vmem:[%s11897_s14 + $0x728] ss:$36 sps:$4 sm:$0xff]  }
0x16f9   : > { %7914 = vmatpush1.bf16.msra.mxu0 %v11230_v19  ;;  %7955 = vmatpush1.bf16.msra.mxu1 %v11233_v20  ;;  %v11260_v19 = vld [vmem:[%s11897_s14 + $0x68] ss:$36 sps:$4 sm:$0xff]  }
0x16fa   : > { %7915 = vmatprep.subr.bf16.mxu0 %v11238_v37  ;;  %7956 = vmatprep.subr.bf16.mxu1 %v11241_v21 }
0x16fd   : > { %7916 = vmatpush1.bf16.msra.mxu0 %v11236_v24  ;;  %7957 = vmatpush1.bf16.msra.mxu1 %v11239_v5 }
0x16fe   : > { %7917 = vmatprep.subr.bf16.mxu0 %v11244_v25  ;;  %7958 = vmatprep.subr.bf16.mxu1 %v11247_v28 }
0x1701   : > { %7918 = vmatpush1.bf16.msra.mxu0 %v11242_v18  ;;  %7959 = vmatpush1.bf16.msra.mxu1 %v11245_v23 }
0x1702   : > { %7919 = vmatprep.subr.bf16.mxu0 %v11250_v31  ;;  %7960 = vmatprep.subr.bf16.mxu1 %v11253_v26 }
0x1705   : > { %7920 = vmatpush1.bf16.msra.mxu0 %v11248_v27  ;;  %7961 = vmatpush1.bf16.msra.mxu1 %v11251_v61 }
0x1706   : > { %9778 = vmatprep.subr.bf16.mxu0 %v11254_v12  ;;  %9800 = vmatprep.subr.bf16.mxu1 %v11255_v13 }
0x1708   : > { %7922 = vmatmul.mubr.bf16.vlgmr.msra.gmra.mrb[8].mxu0 %v12297_v22  ;;  %7963 = vmatmul.mubr.bf16.vlgmr.msra.gmra.mrb[8].mxu1 %v12299_v3  ;;  %v7158_v22 = vrot.slane %v9446_v32, %v12284_v47  ;;  %v7162_v3 = vrot.slane %v9446_v32, %v12289_v52  ;;  %v11262_v32 = vld [vmem:[%s11897_s14 + $0x2f0] ss:$36 sps:$4 sm:$0xff]  }
0x1709   : > { %9779 = vmatpush3.bf16.msra.mxu0 %v11256_v60  ;;  %9801 = vmatpush3.bf16.msra.mxu1 %v11257_v15 }
0x170a   : > { %9780 = vmatprep.subr.bf16.mxu0 %v11258_v16  ;;  %9802 = vmatprep.subr.bf16.mxu1 %v11259_v17 }
0x170d   : > { %9781 = vmatpush3.bf16.msra.mxu0 %v11260_v19 }
0x170e   : > { %9782 = vmatprep.subr.bf16.mxu0 %v11262_v32  ;;  %v11292_v32 = vld [vmem:[%s11903_s19 + $0x20] ss:$16 sps:$4 sm:$0xff]  }
0x179b   : > { %v7841_v4 = vpop.f32.mrb[4].mxu0  ;;  %v7882_v35 = vpop.f32.mrb[4].mxu1 }
0x179c   : > { %v7842_v38 = vadd.f32 %v7841_v4, %v7150_v33  ;;  %v7843_v0 = vpop.f32.mrb[5].mxu0  ;;  %v7884_v36 = vpop.f32.mrb[5].mxu1  ;;  %v11263_v33 = vld [vmem:[%s11897_s14 + $0x770] ss:$36 sps:$4 sm:$0xff]  }
0x179d   : > { %v7844_v51 = vadd.f32 %v7843_v0, %v7154_v34  ;;  %v7845_v42 = vpop.f32.mrb[6].mxu0  ;;  %v7886_v40 = vpop.f32.mrb[6].mxu1  ;;  %v11264_v34 = vld [vmem:[%s11897_s14 + $0xb0] ss:$36 sps:$4 sm:$0xff]   ;;  %v11268_v0 = vld [vmem:[%s11897_s14 + $0xf8] ss:$36 sps:$4 sm:$0xff]  }
0x179e   : > { %v7883_v41 = vadd.f32 %v7882_v35, %v7842_v38  ;;  %v7846_v45 = vpop.f32.mrb[7].mxu0  ;;  %v7887_v43 = vpop.f32.mrb[7].mxu1  ;;  %v11265_v4 = vld [vmem:[%s11897_s14 + $0x530] ss:$36 sps:$4 sm:$0xff]   ;;  %9783 = vmatpush3.bf16.msra.mxu0 %v11264_v34  ;;  %v11266_v35 = vld [vmem:[%s11897_s14 + $0x338] ss:$36 sps:$4 sm:$0xff]  }
0x179f   : > { %v7885_v44 = vadd.f32 %v7884_v36, %v7844_v51  ;;  %v11267_v38 = vld [vmem:[%s11897_s14 + $0x7b8] ss:$36 sps:$4 sm:$0xff]   ;;  %9784 = vmatprep.subr.bf16.mxu0 %v11266_v35  ;;  %v11270_v51 = vld [vmem:[%s11897_s14 + $0x380] ss:$36 sps:$4 sm:$0xff]   ;;  %v11274_v45 = vld [vmem:[%s11897_s14 + $0x3c8] ss:$36 sps:$4 sm:$0xff]  }
0x17a0   : > { %v7971_v14 = vadd.f32 %v11338_v29, %v7883_v41  ;;  %v11269_v36 = vld [vmem:[%s11897_s14 + $0x578] ss:$36 sps:$4 sm:$0xff]   ;;  %v11271_v42 = vld [vmem:[%s11897_s14 + $0x800] ss:$36 sps:$4 sm:$0xff]   ;;  %v11275_v43 = vld [vmem:[%s11897_s14 + $0x848] ss:$36 sps:$4 sm:$0xff]  }
0x17a1   : > { %v7972_v46 = vadd.f32 %v11339_v48, %v7885_v44  ;;  %v11272_v40 = vld [vmem:[%s11897_s14 + $0x140] ss:$36 sps:$4 sm:$0xff]   ;;  %v11276_v44 = vld [vmem:[%s11897_s14 + $0x188] ss:$36 sps:$4 sm:$0xff]   ;;  %v11281_v29 = vld [vmem:[%s11897_s14 + $0x650] ss:$36 sps:$4 sm:$0xff]  }
0x17a2   : > { %9785 = vmatpush3.bf16.msra.mxu0 %v11268_v0  ;;  %v11273_v41 = vld [vmem:[%s11897_s14 + $0x5c0] ss:$36 sps:$4 sm:$0xff]   ;;  %v11283_v48 = vld [vmem:[%s11897_s14 + $0x8d8] ss:$36 sps:$4 sm:$0xff]  }
0x17a3   : > { %v7975_v1 = vadd.f32 %v7972_v46, %v7971_v14  ;;  %9786 = vmatprep.subr.bf16.mxu0 %v11270_v51  ;;  %v11300_v34 = vld [vmem:[%s11903_s19 + $0x44] ss:$16 sps:$4 sm:$0xff]   ;;  %v11298_v35 = vld [vmem:[%s11903_s19 + $0x40] ss:$16 sps:$4 sm:$0xff]  }
0x17a4   : > { %v11306_v0 = vld [vmem:[%s11903_s19 + $0x64] ss:$16 sps:$4 sm:$0xff]   ;;  %v11304_v51 = vld [vmem:[%s11903_s19 + $0x60] ss:$16 sps:$4 sm:$0xff]  }
0x17a6   : > { %9787 = vmatpush3.bf16.msra.mxu0 %v11272_v40  ;;  %v11312_v40 = vld [vmem:[%s11903_s19 + $0x84] ss:$16 sps:$4 sm:$0xff]  }
0x17a7   : > { %9788 = vmatprep.subr.bf16.mxu0 %v11274_v45  ;;  %v11310_v45 = vld [vmem:[%s11903_s19 + $0x80] ss:$16 sps:$4 sm:$0xff]  }
0x17aa   : > { %9789 = vmatpush3.bf16.msra.mxu0 %v11276_v44  ;;  %v11318_v44 = vld [vmem:[%s11903_s19 + $0xa4] ss:$16 sps:$4 sm:$0xff]  }
0x17db   : > { %v7923_v6 = vpop.f32.mrb[8].mxu0  ;;  %v7964_v11 = vpop.f32.mrb[8].mxu1 }
0x17dc   : > { %v7924_v49 = vadd.f32 %v7923_v6, %v7158_v22  ;;  %v7925_v50 = vpop.f32.mrb[9].mxu0  ;;  %v7966_v53 = vpop.f32.mrb[9].mxu1  ;;  %v11277_v22 = vld [vmem:[%s11897_s14 + $0x608] ss:$36 sps:$4 sm:$0xff]   ;;  %v11279_v6 = vld [vmem:[%s11897_s14 + $0x890] ss:$36 sps:$4 sm:$0xff]  }
0x17dd   : > { %v7926_v54 = vadd.f32 %v7925_v50, %v7162_v3  ;;  %v7927_v56 = vpop.f32.mrb[10].mxu0  ;;  %v7968_v57 = vpop.f32.mrb[10].mxu1  ;;  %v11278_v3 = vld [vmem:[%s11897_s14 + $0x410] ss:$36 sps:$4 sm:$0xff]  }
0x17de   : > { %v7965_v55 = vadd.f32 %v7964_v11, %v7924_v49  ;;  %v7928_v58 = vpop.f32.mrb[11].mxu0  ;;  %v7969_v59 = vpop.f32.mrb[11].mxu1  ;;  %v11280_v11 = vld [vmem:[%s11897_s14 + $0x1d0] ss:$36 sps:$4 sm:$0xff]   ;;  %9790 = vmatprep.subr.bf16.mxu0 %v11278_v3  ;;  %v11285_v49 = vld [vmem:[%s11897_s14 + $0x698] ss:$36 sps:$4 sm:$0xff]  }
0x17df   : > { %v7967_v62 = vadd.f32 %v7966_v53, %v7926_v54  ;;  %9791 = vmatpush3.bf16.msra.mxu0 %v11280_v11  ;;  %v11288_v50 = vld [vmem:[%s11903_s19 + $0x4] ss:$16 sps:$4 sm:$0xff]   ;;  %v11291_v53 = vld [vmem:[%s11903_s19 + $0xc] ss:$16 sps:$4 sm:$0xff]   ;;  %v11316_v3 = vld [vmem:[%s11903_s19 + $0xa0] ss:$16 sps:$4 sm:$0xff]  }
0x17e0   : > { %v7973_v63 = vadd.f32 %v7965_v55, %v12212_v39  ;;  %v11261_v39 = vld [vmem:[%s11897_s14 + $0x4e8] ss:$36 sps:$4 sm:$0xff]   ;;  %v11324_v11 = vld [vmem:[%s11903_s19 + $0xc4] ss:$16 sps:$4 sm:$0xff]  }
0x17e1   : > { %v7974_v9 = vadd.f32 %v11340_v7, %v7967_v62  ;;  %9803 = vmatpush3.bf16.msra.mxu1 %v11261_v39  ;;  %v9447_v55 = vld [vmem:[%s11905_s20 + $0x2] ss:$8 sm:$0xf]  ;;  %v9448_v58 = vld [vmem:[%s11905_s20 + $0x3] ss:$8 sm:$0xf] }
0x17e2   : > { %v7976_v10 = vadd.f32 %v7975_v1, %v7973_v63  ;;  %9804 = vmatprep.subr.bf16.mxu1 %v11263_v33  ;;  %v8010_v59 = vrot.slane %v9447_v55, %v12287_v8  ;;  %v8018_v62 = vrot.slane %v9447_v55, %v12289_v52  ;;  %v8014_v1 = vrot.slane %v9447_v55, %v12284_v47  ;;  %v11295_v33 = vld [vmem:[%s11903_s19 + $0x28] ss:$16 sps:$4 sm:$0xff]  }
0x17e3   : > { %v8039_v12 = vrot.slane %v9448_v58, %v12284_v47 }
0x17e4   : > { %v7977_v30 = vadd.f32 %v7976_v10, %v7974_v9  ;;  %v8043_v10 = vrot.slane %v9448_v58, %v12289_v52 }
0x17e5   : > { %9805 = vmatpush3.bf16.msra.mxu1 %v11265_v4  ;;  %v11303_v4 = vld [vmem:[%s11903_s19 + $0x4c] ss:$16 sps:$4 sm:$0xff]  }
0x17e6   : > { %7978 = vadd.xlane.f32.xlu0 %v7977_v30  ;;  %9806 = vmatprep.subr.bf16.mxu1 %v11267_v38  ;;  %v8031_v30 = vrot.slane %v9448_v58, %v12282_v2  ;;  %v11301_v38 = vld [vmem:[%s11903_s19 + $0x48] ss:$16 sps:$4 sm:$0xff]  }
0x17e9   : > { %9807 = vmatpush3.bf16.msra.mxu1 %v11269_v36  ;;  %v11309_v36 = vld [vmem:[%s11903_s19 + $0x6c] ss:$16 sps:$4 sm:$0xff]  }
0x17ea   : > { %9808 = vmatprep.subr.bf16.mxu1 %v11271_v42  ;;  %v11307_v42 = vld [vmem:[%s11903_s19 + $0x68] ss:$16 sps:$4 sm:$0xff]  }
0x17ed   : > { %9809 = vmatpush3.bf16.msra.mxu1 %v11273_v41  ;;  %v11315_v41 = vld [vmem:[%s11903_s19 + $0x8c] ss:$16 sps:$4 sm:$0xff]  }
0x17ee   : > { %9810 = vmatprep.subr.bf16.mxu1 %v11275_v43  ;;  %v11313_v43 = vld [vmem:[%s11903_s19 + $0x88] ss:$16 sps:$4 sm:$0xff]  }
0x17f1   : > { %9811 = vmatpush3.bf16.msra.mxu1 %v11277_v22  ;;  %v11321_v22 = vld [vmem:[%s11903_s19 + $0xac] ss:$16 sps:$4 sm:$0xff]  }
0x17f2   : > { %9812 = vmatprep.subr.bf16.mxu1 %v11279_v6  ;;  %v11319_v6 = vld [vmem:[%s11903_s19 + $0xa8] ss:$16 sps:$4 sm:$0xff]  }
0x17f5   : > { %9813 = vmatpush3.bf16.msra.mxu1 %v11281_v29  ;;  %v11327_v29 = vld [vmem:[%s11903_s19 + $0xcc] ss:$16 sps:$4 sm:$0xff]  }
0x17f6   : > { %9814 = vmatprep.subr.bf16.mxu1 %v11283_v48  ;;  %v11325_v48 = vld [vmem:[%s11903_s19 + $0xc8] ss:$16 sps:$4 sm:$0xff]  }
0x17f9   : > { %9815 = vmatpush3.bf16.msra.mxu1 %v11285_v49  ;;  %v11333_v49 = vld [vmem:[%s11903_s19 + $0xec] ss:$16 sps:$4 sm:$0xff]  }
0x17fa   : > { %8552 = vmatprep.subr.bf16.mxu1 %v11291_v53  ;;  %v11331_v53 = vld [vmem:[%s11903_s19 + $0xe8] ss:$16 sps:$4 sm:$0xff]  }
0x1873   : > { %v7979_v20 = vpop.xlane.xlu0 %7978 }
0x1874   : > { %v7981_v37 = vmul.f32 0.001953125, %v7979_v20 }
0x1876   : > { %v12379_v21 = vsub.f32 %v7971_v14, %v7981_v37  ;;  %v12381_v24 = vsub.f32 %v7972_v46, %v7981_v37  ;;  %v12383_v5 = vsub.f32 %v7973_v63, %v7981_v37  ;;  %v12385_v25 = vsub.f32 %v7974_v9, %v7981_v37  ;;  %v11282_v14 = vld [vmem:[%s11897_s14 + $0x458] ss:$36 sps:$4 sm:$0xff]  }
0x1877   : > { %v11284_v46 = vld [vmem:[%s11897_s14 + $0x218] ss:$36 sps:$4 sm:$0xff]   ;;  %9792 = vmatprep.subr.bf16.mxu0 %v11282_v14  ;;  %v8006_v63 = vrot.slane %v9447_v55, %v12282_v2  ;;  %v8035_v9 = vrot.slane %v9448_v58, %v12287_v8  ;;  %v11322_v14 = vld [vmem:[%s11903_s19 + $0xc0] ss:$16 sps:$4 sm:$0xff]   ;;  %v6306_v55 = vld [vmem:[%s11905_s20 + $0x4] ss:$0 sm:$0xff] }
0x1878   : > { %v7986_v28 = vmul.f32 %v12379_v21, %v12379_v21  ;;  %v7987_v18 = vmul.f32 %v12381_v24, %v12381_v24  ;;  %v7988_v23 = vmul.f32 %v12383_v5, %v12383_v5  ;;  %v7989_v26 = vmul.f32 %v12385_v25, %v12385_v25  ;;  %9793 = vmatpush3.bf16.msra.mxu0 %v11284_v46  ;;  %v11330_v46 = vld [vmem:[%s11903_s19 + $0xe4] ss:$16 sps:$4 sm:$0xff]  }
0x1879   : > { %8511 = vmatprep.subr.bf16.mxu0 %v11288_v50  ;;  %v11328_v50 = vld [vmem:[%s11903_s19 + $0xe0] ss:$16 sps:$4 sm:$0xff]  }
0x187a   : > { %v7990_v31 = vadd.f32 %v7987_v18, %v7986_v28 }
0x187c   : > { %v7991_v27 = vadd.f32 %v7990_v31, %v7988_v23  ;;  %v11286_v31 = vld [vmem:[%s11903_s19] ss:$16 sps:$4 sm:$0xff]  }
0x187e   : > { %v7992_v61 = vadd.f32 %v7991_v27, %v7989_v26  ;;  %v11289_v26 = vld [vmem:[%s11903_s19 + $0x8] ss:$16 sps:$4 sm:$0xff]   ;;  %v11294_v27 = vld [vmem:[%s11903_s19 + $0x24] ss:$16 sps:$4 sm:$0xff]  }
0x1880   : > { %7993 = vadd.xlane.f32.xlu0 %v7992_v61  ;;  %v11297_v61 = vld [vmem:[%s11903_s19 + $0x2c] ss:$16 sps:$4 sm:$0xff]  }
0x190d   : > { %v7994_v54 = vpop.xlane.xlu0 %7993 }
0x190e   : > { %v7995_v56 = vmul.f32 0.001953125, %v7994_v54  ;;  %v11608_v54 = vmov 0  }
0x1910   : > { %v7996_v57 = vadd.f32 1e-05, %v7995_v56 }
0x1912   : > { %11334 = vrsqrt.f32 %v7996_v57 }
0x191c   : > { %v11335_v7 = vpop.eup %11334 }
0x191d   : > { %v7999_v13 = vmul.f32 %v11335_v7, %v12381_v24  ;;  %v8001_v60 = vmul.f32 %v11335_v7, %v12385_v25  ;;  %v7998_v15 = vmul.f32 %v11335_v7, %v12379_v21  ;;  %v8000_v16 = vmul.f32 %v11335_v7, %v12383_v5 }
0x191f   : > { %v8024_v17 = vmul.f32 %v8010_v59, %v7999_v13  ;;  %v8026_v19 = vmul.f32 %v8018_v62, %v8001_v60  ;;  %v8023_v39 = vmul.f32 %v8006_v63, %v7998_v15  ;;  %v8025_v20 = vmul.f32 %v8014_v1, %v8000_v16  ;;  %v9449_v15 = vld [vmem:[%s11905_s20 + $0x5] ss:$8 sm:$0xf] }
0x1920   : > { %v8334_v16 = vrot.slane %v9449_v15, %v12282_v2 }
0x1921   : > { %v12435_v37 = vadd.f32 %v8035_v9, %v8024_v17  ;;  %v12437_v28 = vadd.f32 %v8043_v10, %v8026_v19  ;;  %v12439_v18 = vadd.f32 %v8031_v30, %v8023_v39  ;;  %v12441_v24 = vadd.f32 %v8039_v12, %v8025_v20 }
0x1922   : > { %v8342_v17 = vrot.slane %v9449_v15, %v12284_v47  ;;  %v8338_v19 = vrot.slane %v9449_v15, %v12287_v8 }
0x1923   : > { %v8053_v21 = vpack.c.bf16 %v12435_v37, %v12435_v37  ;;  %v8055_v5 = vpack.c.bf16 %v12437_v28, %v12437_v28  ;;  %v8052_v25 = vpack.c.bf16 %v12439_v18, %v12439_v18  ;;  %v8054_v23 = vpack.c.bf16 %v12441_v24, %v12441_v24 }
0x1925   : > { %8280 = vmatprep.mubr.bf16.mxu0 %v8053_v21  ;;  %8320 = vmatprep.mubr.bf16.mxu1 %v8055_v5  ;;  %v8346_v21 = vrot.slane %v9449_v15, %v12289_v52 }
0x1926   : > { %8281 = vmatmul.mubr.bf16.vlgmr.msra.gmra.mrb[12].mxu0 %v8052_v25  ;;  %8321 = vmatmul.mubr.bf16.vlgmr.msra.gmra.mrb[12].mxu1 %v8054_v23 }
0x1927   : > { %8512 = vmatpush1.bf16.msra.mxu0 %v11286_v31  ;;  %8553 = vmatpush1.bf16.msra.mxu1 %v11289_v26 }
0x1928   : > { %8513 = vmatprep.subr.bf16.mxu0 %v11294_v27  ;;  %8554 = vmatprep.subr.bf16.mxu1 %v11297_v61 }
0x1929   : > { %8543 = vmatprep.mubr.bf16.mxu0 %v11608_v54  ;;  %8584 = vmatprep.mubr.bf16.mxu1 %v11608_v54 }
0x192b   : > { %8514 = vmatpush1.bf16.msra.mxu0 %v11292_v32  ;;  %8555 = vmatpush1.bf16.msra.mxu1 %v11295_v33 }
0x192c   : > { %8515 = vmatprep.subr.bf16.mxu0 %v11300_v34  ;;  %8556 = vmatprep.subr.bf16.mxu1 %v11303_v4 }
0x192f   : > { %8516 = vmatpush1.bf16.msra.mxu0 %v11298_v35  ;;  %8557 = vmatpush1.bf16.msra.mxu1 %v11301_v38 }
0x1930   : > { %8517 = vmatprep.subr.bf16.mxu0 %v11306_v0  ;;  %8558 = vmatprep.subr.bf16.mxu1 %v11309_v36 }
0x1933   : > { %8518 = vmatpush1.bf16.msra.mxu0 %v11304_v51  ;;  %8559 = vmatpush1.bf16.msra.mxu1 %v11307_v42 }
0x1934   : > { %8519 = vmatprep.subr.bf16.mxu0 %v11312_v40  ;;  %8560 = vmatprep.subr.bf16.mxu1 %v11315_v41 }
0x1937   : > { %8520 = vmatpush1.bf16.msra.mxu0 %v11310_v45  ;;  %8561 = vmatpush1.bf16.msra.mxu1 %v11313_v43 }
0x1938   : > { %8521 = vmatprep.subr.bf16.mxu0 %v11318_v44  ;;  %8562 = vmatprep.subr.bf16.mxu1 %v11321_v22 }
0x193b   : > { %8522 = vmatpush1.bf16.msra.mxu0 %v11316_v3  ;;  %8563 = vmatpush1.bf16.msra.mxu1 %v11319_v6 }
0x193c   : > { %8523 = vmatprep.subr.bf16.mxu0 %v11324_v11  ;;  %8564 = vmatprep.subr.bf16.mxu1 %v11327_v29 }
0x193f   : > { %8524 = vmatpush1.bf16.msra.mxu0 %v11322_v14  ;;  %8565 = vmatpush1.bf16.msra.mxu1 %v11325_v48 }
0x1940   : > { %8525 = vmatprep.subr.bf16.mxu0 %v11330_v46  ;;  %8566 = vmatprep.subr.bf16.mxu1 %v11333_v49  ;;  %v9450_v46 = vld [vmem:[%s11905_s20 + $0x6] ss:$8 sm:$0xf]  ;;  %v9451_v49 = vld [vmem:[%s11905_s20 + $0x7] ss:$8 sm:$0xf] }
0x1941   : > { %v8635_v54 = vrot.slane %v9450_v46, %v12284_v47 }
0x1943   : > { %8526 = vmatpush1.bf16.msra.mxu0 %v11328_v50  ;;  %8567 = vmatpush1.bf16.msra.mxu1 %v11331_v53  ;;  %v8627_v50 = vrot.slane %v9450_v46, %v12282_v2  ;;  %v8631_v53 = vrot.slane %v9450_v46, %v12287_v8 }
0x19f9   : > { %v9794_v56 = vpop.f32.mrb[12].mxu0  ;;  %v9816_v57 = vpop.f32.mrb[12].mxu1 }
0x19fa   : > { %v9795_v58 = vpop.f32.mrb[13].mxu0  ;;  %v9817_v59 = vpop.f32.mrb[13].mxu1 }
0x19fb   : > { %v9796_v62 = vadd.f32 %v9795_v58, %v9794_v56  ;;  %v9818_v63 = vadd.f32 %v9817_v59, %v9816_v57  ;;  %v9797_v1 = vpop.f32.mrb[14].mxu0  ;;  %v9819_v7 = vpop.f32.mrb[14].mxu1  ;;  %v8639_v56 = vrot.slane %v9450_v46, %v12289_v52  ;;  %v8656_v58 = vrot.slane %v9451_v49, %v12287_v8 }
0x19fc   : > { %v9798_v9 = vpop.f32.mrb[15].mxu0  ;;  %v9820_v10 = vpop.f32.mrb[15].mxu1  ;;  %v8660_v59 = vrot.slane %v9451_v49, %v12284_v47 }
0x19fd   : > { %v8283_v30 = vadd.f32 %v9796_v62, %v6306_v55  ;;  %v8652_v55 = vrot.slane %v9451_v49, %v12282_v2  ;;  %v8664_v62 = vrot.slane %v9451_v49, %v12289_v52 }
0x19ff   : > { %v8323_v12 = vadd.f32 %v9818_v63, %v8283_v30 }
0x1a01   : > { %v8328_v13 = vmax.f32 %v8323_v12, 0.0 }
0x1a03   : > { %v8329_v60 = vpack.c.bf16 %v8328_v13, %v8328_v13 }
0x1a05   : > { %8544 = vmatmul.mubr.bf16.vlgmr.msra.gmra.mrb[16].mxu0 %v8329_v60  ;;  %8585 = vmatmul.mubr.bf16.vlgmr.msra.gmra.mrb[16].mxu1 %v8329_v60 }
0x1ad8   : > { %v8545_v39 = vpop.f32.mrb[16].mxu0  ;;  %v8586_v20 = vpop.f32.mrb[16].mxu1 }
0x1ad9   : > { %v8546_v5 = vadd.f32 %v8545_v39, %v8334_v16  ;;  %v8547_v25 = vpop.f32.mrb[17].mxu0  ;;  %v8588_v23 = vpop.f32.mrb[17].mxu1  ;;  %v8587_v31 = vadd.f32 %v8586_v20, %v8342_v17 }
0x1ada   : > { %v8548_v26 = vadd.f32 %v8547_v25, %v8338_v19  ;;  %v8549_v27 = vpop.f32.mrb[18].mxu0  ;;  %v8590_v61 = vpop.f32.mrb[18].mxu1  ;;  %v8589_v35 = vadd.f32 %v8588_v23, %v8346_v21 }
0x1adb   : > { %v8593_v32 = vadd.f32 %v8546_v5, %v12439_v18  ;;  %v8550_v33 = vpop.f32.mrb[19].mxu0  ;;  %v8591_v34 = vpop.f32.mrb[19].mxu1  ;;  %v8595_v38 = vadd.f32 %v8587_v31, %v12441_v24 }
0x1adc   : > { %v8594_v4 = vadd.f32 %v8548_v26, %v12435_v37  ;;  %v8596_v36 = vadd.f32 %v8589_v35, %v12437_v28 }
0x1ade   : > { %v8597_v0 = vadd.f32 %v8594_v4, %v8593_v32 }
0x1ae0   : > { %v8598_v51 = vadd.f32 %v8597_v0, %v8595_v38 }
0x1ae2   : > { %v8599_v42 = vadd.f32 %v8598_v51, %v8596_v36 }
0x1ae4   : > { %8600 = vadd.xlane.f32.xlu1 %v8599_v42 }
0x1b71   : > { %v8601_v40 = vpop.xlane.xlu1 %8600 }
0x1b72   : > { %v8602_v41 = vmul.f32 0.001953125, %v8601_v40 }
0x1b74   : > { %v8603_v45 = vsub.f32 %v8593_v32, %v8602_v41  ;;  %v8604_v43 = vsub.f32 %v8594_v4, %v8602_v41  ;;  %v8605_v18 = vsub.f32 %v8595_v38, %v8602_v41  ;;  %v8606_v44 = vsub.f32 %v8596_v36, %v8602_v41 }
0x1b76   : > { %v8607_v22 = vmul.f32 %v8603_v45, %v8603_v45  ;;  %v8608_v3 = vmul.f32 %v8604_v43, %v8604_v43  ;;  %v8609_v37 = vmul.f32 %v8605_v18, %v8605_v18  ;;  %v8610_v11 = vmul.f32 %v8606_v44, %v8606_v44 }
0x1b78   : > { %v8611_v6 = vadd.f32 %v8608_v3, %v8607_v22 }
0x1b7a   : > { %v8612_v24 = vadd.f32 %v8611_v6, %v8609_v37 }
0x1b7c   : > { %v8613_v29 = vadd.f32 %v8612_v24, %v8610_v11 }
0x1b7e   : > { %8614 = vadd.xlane.f32.xlu1 %v8613_v29 }
0x1c0b   : > { %v8615_v28 = vpop.xlane.xlu1 %8614 }
0x1c0c   : > { %v8616_v14 = vmul.f32 0.001953125, %v8615_v28 }
0x1c0e   : > { %v8617_v48 = vadd.f32 1e-05, %v8616_v14 }
0x1c10   : > { %11336 = vrsqrt.f32 %v8617_v48 }
0x1c1a   : > { %v11337_v57 = vpop.eup %11336 }
0x1c1b   : > { %v8619_v63 = vmul.f32 %v11337_v57, %v8603_v45  ;;  %v8620_v1 = vmul.f32 %v11337_v57, %v8604_v43  ;;  %v8621_v7 = vmul.f32 %v11337_v57, %v8605_v18  ;;  %v8622_v9 = vmul.f32 %v11337_v57, %v8606_v44 }
0x1c1d   : > { %v8644_v10 = vmul.f32 %v8627_v50, %v8619_v63  ;;  %v8645_v30 = vmul.f32 %v8631_v53, %v8620_v1  ;;  %v8646_v12 = vmul.f32 %v8635_v54, %v8621_v7  ;;  %v8647_v13 = vmul.f32 %v8639_v56, %v8622_v9 }
0x1c1f   : > { %v8669_v60 = vadd.f32 %v8652_v55, %v8644_v10  ;;  %v8670_v2 = vadd.f32 %v8656_v58, %v8645_v30  ;;  %v8671_v15 = vadd.f32 %v8660_v59, %v8646_v12  ;;  %v8672_v8 = vadd.f32 %v8664_v62, %v8647_v13 }
0x1c21   : > { %8673 = vst [vmem:[#allocation2] sm:$0xff] %v8669_v60  ;;  %8674 = vst [vmem:[#allocation2 + $0x8] sm:$0xff] %v8670_v2 }
0x1c22   : > { %8675 = vst [vmem:[#allocation2 + $0x10] sm:$0xff] %v8671_v15  ;;  %8676 = vst [vmem:[#allocation2 + $0x18] sm:$0xff] %v8672_v8 }
0x1c23   : > { %8677 = vst [vmem:[#allocation14] sm:$0xff] %v8669_v60  ;;  %8678 = vst [vmem:[#allocation14 + $0x8] sm:$0xff] %v8670_v2 }
0x1c24   : > { %8679 = vst [vmem:[#allocation14 + $0x10] sm:$0xff] %v8671_v15  ;;  %8680 = vst [vmem:[#allocation14 + $0x18] sm:$0xff] %v8672_v8 }
0x1c25   : > { %11528 = shalt.err (!%p11525_p0)
}
0x1c26   : > { %s11529_s17 = scalar_lea.hbm %s12544_s7, 512 }
0x1c27   : > { %p11530_p8 = scmp.ne.s32.totalorder %s12544_s7, %s11529_s17  ;;  %p11535_p3 = scmp.lt.u32.totalorder %s11529_s17, %s12544_s7 }
0x1c29   : > { %p11531_p5 = pnand %p11530_p8, %p9886_p1 }
0x1c2b   : > { %p11532_p13 = pneg %p11531_p5 }
0x1c2d   : > { %p11537_p12 = pnand %p11535_p3, %p11532_p13 }
0x1c2f   : > { %11540 = shalt.err (!%p11537_p12)
}
0x1c30   : > { %9856 = dma.vmem_to_hbm [thread:$0]  (%p9886_p1), %s8689_s27, 512, %s12544_s7, [#allocation5]  }
0x1c31   : > { %11574 = dma.done.wait (%p9886_p1), [#allocation5], 512  }
0x1c32   : > { %11576 = vsyncadd (%p9886_p1), [#allocation5], 4294966784 }
0x1c33 PF: > { %s12584_s27 = sld [smem:[#allocation21_spill]]  ;;  %s12585_s12 = sld [smem:[#allocation20_spill]] }
0x1c34   : > { %s12586_s26 = sld [smem:[#allocation22_spill]]  ;;  %s12587_s24 = smov %s11583_s25 }
0x1c39   : > { %p23_p10 = scmp.ge.s32.totalorder %s12584_s27, 4   ;;  %s12588_s25 = smov %s12585_s12 }
0x1c3b   :  { %25 = sbr.rel (!%p23_p10) target bundleno = 11 (0xb), region = 140 }
0x1c42   :  { %8701 = vsyncpa [#allocation4], 1 }
0x1c43   :  { %8703 = vsyncpa [#allocation4 + $0x1], 1 }
0x1c44   :  { %8704 = vsyncpa [#allocation7], 1 }
0x1c45   :  { %8705 = vsyncpa [#allocation10], 1 }
0x1c46   :  { %8707 = vsyncpa [#allocation10 + $0x1], 1 }
0x1c47   :  { %8708 = vsyncpa [#allocation13], 1 }
0x1c48   :  { %8710 = vsyncpa [#allocation13 + $0x1], 1 }
0x1c49   :  { %8711 = vsyncpa [#allocation5], 1 }
0x1c4a   :  { %8713 = vsyncpa [#allocation5 + $0x1], 1 }

</bundles_post_ra>
